<compile_context>
chip_gen: v7x
topology: tpu7x:2x2x1
jax: 0.10.0
libtpu: 0.0.40
codegen_flags: <defaults>
</compile_context>

<pallas_src>
import jax
import jax.numpy as jnp
import numpy as np
from jax import lax
from jax.experimental import pallas as pl
from jax.experimental.pallas import tpu as pltpu


# ----------------------------- Pallas kernel --------------------------------
def _disc_fused_kernel(x_ref,
                       s0, m0, s1, m1, s2, m2, s3, m3, s4, m4,
                       b1, b2, b3,
                       o_ref):
    """Whole 5-layer discriminator forward for one batch element.

    x_ref : (H0, W0*C0) bf16 input slab for this batch element.
    s{l}  : (4, Ho_l, H_l)          bf16 0/1 row-gather matrices (per kernel row kh).
    m{l}  : (4, W_l*C_l, Wo_l*Co_l) bf16 banded weights (BN scale folded in).
    b{l}  : (1, Wo_l*Co_l)          f32 BN bias rows (layers 1-3 only).
    o_ref : (1, 1, 128) f32 output (column 0 holds the real sigmoid logit).
    """
    s_refs = (s0, s1, s2, s3, s4)
    m_refs = (m0, m1, m2, m3, m4)
    b_refs = {1: b1, 2: b2, 3: b3}

    r = x_ref[...]                                        # bf16 activation slab
    for layer in range(5):                                # fully unrolled
        nrow = s_refs[layer].shape[1]
        ncol = m_refs[layer].shape[2]
        acc = jnp.zeros((nrow, ncol), jnp.float32)
        for kh in range(4):                               # 4x (row-gather, conv) matmuls
            x_kh = jnp.dot(s_refs[layer][kh], r,
                           preferred_element_type=jnp.float32).astype(jnp.bfloat16)
            acc = acc + jnp.dot(x_kh, m_refs[layer][kh],
                                preferred_element_type=jnp.float32)
        if layer in b_refs:                               # BN bias (scale already in M)
            acc = acc + b_refs[layer][...]
        if layer < 4:
            # LeakyReLU(0.2); Dropout2d is identity in eval mode.
            r = jnp.where(acc > 0, acc, 0.2 * acc).astype(jnp.bfloat16)
        else:
            # Sigmoid via exp + EUP reciprocal.
            o_ref[...] = pl.reciprocal(1.0 + jnp.exp(-acc),
                                       approx=True).reshape(o_ref.shape)


def discriminator_forward(x_nchw, s_mats, m_mats, b_rows):
    n, c, h, w = x_nchw.shape
    # NCHW -> lane-dense (N*H, W*C) slab, bf16 for the MXU.
    x = jnp.transpose(x_nchw, (0, 2, 3, 1)).reshape(n * h, w * c).astype(jnp.bfloat16)

    in_specs = [pl.BlockSpec((h, w * c), lambda i: (i, 0))]
    operands = [x]
    for smat, mmat in zip(s_mats, m_mats):
        in_specs.append(pl.BlockSpec(smat.shape, lambda i: (0, 0, 0)))
        operands.append(smat)
        in_specs.append(pl.BlockSpec(mmat.shape, lambda i: (0, 0, 0)))
        operands.append(mmat)
    for brow in b_rows:
        in_specs.append(pl.BlockSpec(brow.shape, lambda i: (0, 0)))
        operands.append(brow)

    out = pl.pallas_call(
        _disc_fused_kernel,
        out_shape=jax.ShapeDtypeStruct((n, 1, 128), jnp.float32),
        grid_spec=pltpu.PrefetchScalarGridSpec(
            num_scalar_prefetch=0,
            grid=(n,),                                    # batch split (2 TCs on v7x)
            in_specs=in_specs,
            out_specs=pl.BlockSpec((1, 1, 128), lambda i: (i, 0, 0)),
        ),
        compiler_params=pltpu.CompilerParams(dimension_semantics=("parallel",)),
    )(*operands)
    return out[:, 0, :1].reshape(n, 1, 1, 1)              # (N, 1, 1, 1)


# ------------------------- parameter setup (init time) -----------------------
def spectral_normalize(w, u):
    """nn.utils.spectral_norm: one power iteration, W / sigma.  w is OIHW."""
    w_mat = w.reshape(w.shape[0], -1)
    v = w_mat.T @ u
    v = v / (jnp.linalg.norm(v) + 1e-12)
    u_new = w_mat @ v
    u_new = u_new / (jnp.linalg.norm(u_new) + 1e-12)
    sigma = u_new @ (w_mat @ v)
    return w / sigma


def init_params(key, filters, img_chnls):
    chans = [img_chnls, filters, filters * 2, filters * 4, filters * 8, 1]
    strides = [2, 2, 2, 2, 1]
    pads = [1, 1, 1, 1, 0]
    has_bn = [False, True, True, True, False]
    layers = []
    for li in range(5):
        cin, cout = chans[li], chans[li + 1]
        key, kw_, ku_, kg_, kb_, krm_, krv_ = jax.random.split(key, 7)
        fan_in = cin * 4 * 4
        w = jax.random.normal(kw_, (cout, cin, 4, 4), jnp.float32) / jnp.sqrt(fan_in)
        u = jax.random.normal(ku_, (cout,), jnp.float32)
        u = u / (jnp.linalg.norm(u) + 1e-12)
        w_sn = spectral_normalize(w, u)
        if has_bn[li]:
            gamma = 1.0 + 0.1 * jax.random.normal(kg_, (cout,), jnp.float32)
            beta = 0.1 * jax.random.normal(kb_, (cout,), jnp.float32)
            rm = 0.1 * jax.random.normal(krm_, (cout,), jnp.float32)
            rv = 1.0 + 0.1 * jax.random.uniform(krv_, (cout,), jnp.float32)
            eps = 1e-5
            scale = gamma / jnp.sqrt(rv + eps)
            bias = beta - rm * scale
        else:
            scale = jnp.ones((cout,), jnp.float32)
            bias = jnp.zeros((cout,), jnp.float32)
        layers.append(dict(w=w_sn, scale=scale, bias=bias, has_bn=has_bn[li],
                           stride=strides[li], pad=pads[li],
                           act="sigmoid" if li == 4 else "leaky"))
    return layers


def build_fused_operands(layers, height, width):
    """Build the constant row-gather (S), banded-weight (M) and bias operands.

    S[kh][ho, hin] = 1  iff  hin == s*ho + kh - pad           (absorbs H pad/stride)
    M[kh][w*Cin+ci, wo*Co+co] = w_eff[co, ci, kh, kw]  with kw = w - s*wo + pad
                                                               (absorbs W pad/stride)
    BN scale is folded into w_eff; the final layer's Cout(=1) is lane-padded to 128.
    Built in numpy once at init -> no per-call XLA im2col / weight prep.
    """
    s_mats, m_mats, b_rows = [], [], []
    h, w_sp, cin = height, width, int(layers[0]["w"].shape[1])
    for li, layer in enumerate(layers):
        wt = np.asarray(layer["w"], np.float32)            # (Cout, Cin, 4, 4)
        scale = np.asarray(layer["scale"], np.float32)
        bias = np.asarray(layer["bias"], np.float32)
        cout = wt.shape[0]
        s, p = layer["stride"], layer["pad"]
        ho = (h + 2 * p - 4) // s + 1
        wo = (w_sp + 2 * p - 4) // s + 1
        cu = 128 if li == 4 else cout                      # lane-dense final output
        w_eff = wt * scale[:, None, None, None]            # fold BN scale into weights

        smat = np.zeros((4, ho, h), np.float32)
        mmat = np.zeros((4, w_sp * cin, wo * cu), np.float32)
        for kh in range(4):
            for oh in range(ho):
                r = s * oh + kh - p
                if 0 <= r < h:
                    smat[kh, oh, r] = 1.0
            for ow in range(wo):
                for kw in range(4):
                    col = s * ow + kw - p
                    if 0 <= col < w_sp:
                        mmat[kh, col * cin:(col + 1) * cin,
                             ow * cu:ow * cu + cout] = w_eff[:, :, kh, kw].T
        s_mats.append(jnp.asarray(smat, jnp.bfloat16))
        m_mats.append(jnp.asarray(mmat, jnp.bfloat16))
        if layer["has_bn"]:
            b_rows.append(jnp.asarray(np.tile(bias, wo)[None, :], jnp.float32))
        h, w_sp, cin = ho, wo, cout
    return tuple(s_mats), tuple(m_mats), tuple(b_rows)


# ----------------------------- pure-JAX reference ----------------------------
def reference_forward(x_nchw, layers):
    """lax.conv reference (f32) for a correctness check."""
    x = x_nchw
    for layer in layers:
        s, p = layer["stride"], layer["pad"]
        y = lax.conv_general_dilated(
            x, layer["w"], (s, s), ((p, p), (p, p)),
            dimension_numbers=("NCHW", "OIHW", "NCHW"))
        y = y * layer["scale"][None, :, None, None] + layer["bias"][None, :, None, None]
        y = jnp.where(y > 0, y, 0.2 * y) if layer["act"] == "leaky" else jax.nn.sigmoid(y)
        x = y
    return x


if __name__ == "__main__":
    key = jax.random.PRNGKey(0)
    k_x, k_p = jax.random.split(key)

    batch, img_chnls, filters, spatial = 2, 3, 8, 64
    x = jax.random.normal(k_x, (batch, img_chnls, spatial, spatial), jnp.float32)

    layers = init_params(k_p, filters, img_chnls)
    s_mats, m_mats, b_rows = build_fused_operands(layers, spatial, spatial)

    fwd = jax.jit(discriminator_forward)
    out = jax.block_until_ready(fwd(x, s_mats, m_mats, b_rows))

    ref = jax.block_until_ready(reference_forward(x, layers))
    assert out.shape == (batch, 1, 1, 1), out.shape
    assert bool(jnp.all(jnp.isfinite(out)))
    assert bool(jnp.allclose(out, ref, rtol=2e-2, atol=2e-2)), (out, ref)

    print("KERNEL_OK")
</pallas_src>

<mosaic_0001>
module attributes {stable_mosaic.version = 11 : i64} {
  func.func @_disc_fused_kernel(%arg0: i32, %arg1: memref<64x192xbf16, #tpu.memory_space<vmem>>, %arg2: memref<4x32x64xbf16, #tpu.memory_space<vmem>>, %arg3: memref<4x192x256xbf16, #tpu.memory_space<vmem>>, %arg4: memref<4x16x32xbf16, #tpu.memory_space<vmem>>, %arg5: memref<4x256x256xbf16, #tpu.memory_space<vmem>>, %arg6: memref<4x8x16xbf16, #tpu.memory_space<vmem>>, %arg7: memref<4x256x256xbf16, #tpu.memory_space<vmem>>, %arg8: memref<4x4x8xbf16, #tpu.memory_space<vmem>>, %arg9: memref<4x256x256xbf16, #tpu.memory_space<vmem>>, %arg10: memref<4x1x4xbf16, #tpu.memory_space<vmem>>, %arg11: memref<4x256x128xbf16, #tpu.memory_space<vmem>>, %arg12: memref<1x256xf32, #tpu.memory_space<vmem>>, %arg13: memref<1x256xf32, #tpu.memory_space<vmem>>, %arg14: memref<1x256xf32, #tpu.memory_space<vmem>>, %arg15: memref<1x1x128xf32, #tpu.memory_space<vmem>>) attributes {dimension_semantics = [#tpu.dimension_semantics<parallel>], iteration_bounds = array<i64: 2>, scalar_prefetch = 0 : i64, scratch_operands = 0 : i64, tpu.core_type = #tpu.core_type<tc>, window_params = [{transform_indices = @transform_0, window_bounds = array<i64: 64, 192>}, {pipeline_mode = #tpu.pipeline_mode<synchronous>, transform_indices = @transform_1, window_bounds = array<i64: 4, 32, 64>}, {pipeline_mode = #tpu.pipeline_mode<synchronous>, transform_indices = @transform_2, window_bounds = array<i64: 4, 192, 256>}, {pipeline_mode = #tpu.pipeline_mode<synchronous>, transform_indices = @transform_3, window_bounds = array<i64: 4, 16, 32>}, {pipeline_mode = #tpu.pipeline_mode<synchronous>, transform_indices = @transform_4, window_bounds = array<i64: 4, 256, 256>}, {pipeline_mode = #tpu.pipeline_mode<synchronous>, transform_indices = @transform_5, window_bounds = array<i64: 4, 8, 16>}, {pipeline_mode = #tpu.pipeline_mode<synchronous>, transform_indices = @transform_6, window_bounds = array<i64: 4, 256, 256>}, {pipeline_mode = #tpu.pipeline_mode<synchronous>, transform_indices = @transform_7, window_bounds = array<i64: 4, 4, 8>}, {pipeline_mode = #tpu.pipeline_mode<synchronous>, transform_indices = @transform_8, window_bounds = array<i64: 4, 256, 256>}, {pipeline_mode = #tpu.pipeline_mode<synchronous>, transform_indices = @transform_9, window_bounds = array<i64: 4, 1, 4>}, {pipeline_mode = #tpu.pipeline_mode<synchronous>, transform_indices = @transform_10, window_bounds = array<i64: 4, 256, 128>}, {pipeline_mode = #tpu.pipeline_mode<synchronous>, transform_indices = @transform_11, window_bounds = array<i64: 1, 256>}, {pipeline_mode = #tpu.pipeline_mode<synchronous>, transform_indices = @transform_12, window_bounds = array<i64: 1, 256>}, {pipeline_mode = #tpu.pipeline_mode<synchronous>, transform_indices = @transform_13, window_bounds = array<i64: 1, 256>}, {transform_indices = @transform_14, window_bounds = array<i64: 1, 1, 128>}]} {
    %c0 = arith.constant 0 : index
    %c0_0 = arith.constant 0 : index
    %0 = vector.load %arg1[%c0, %c0_0] : memref<64x192xbf16, #tpu.memory_space<vmem>>, vector<64x192xbf16>
    %cst = arith.constant 0.000000e+00 : f32
    %1 = vector.broadcast %cst : f32 to vector<32x256xf32>
    %c0_1 = arith.constant 0 : index
    %c0_2 = arith.constant 0 : index
    %c0_3 = arith.constant 0 : index
    %2 = vector.load %arg2[%c0_1, %c0_2, %c0_3] : memref<4x32x64xbf16, #tpu.memory_space<vmem>>, vector<1x32x64xbf16>
    %3 = vector.shape_cast %2 : vector<1x32x64xbf16> to vector<32x64xbf16>
    %cst_4 = arith.constant dense<0.000000e+00> : vector<32x192xf32>
    %4 = tpu.matmul %3, %0, %cst_4 {dimension_numbers = #tpu.dot_dimension_numbers<[1], [0], [0], [1], [0, 0, 1, 1], [], []>} : vector<32x64xbf16>, vector<64x192xbf16>, vector<32x192xf32> -> vector<32x192xf32>
    %5 = arith.truncf %4 : vector<32x192xf32> to vector<32x192xbf16>
    %c0_5 = arith.constant 0 : index
    %c0_6 = arith.constant 0 : index
    %c0_7 = arith.constant 0 : index
    %6 = vector.load %arg3[%c0_5, %c0_6, %c0_7] : memref<4x192x256xbf16, #tpu.memory_space<vmem>>, vector<1x192x256xbf16>
    %7 = vector.shape_cast %6 : vector<1x192x256xbf16> to vector<192x256xbf16>
    %cst_8 = arith.constant dense<0.000000e+00> : vector<32x256xf32>
    %8 = tpu.matmul %5, %7, %cst_8 {dimension_numbers = #tpu.dot_dimension_numbers<[1], [0], [0], [1], [0, 0, 1, 1], [], []>} : vector<32x192xbf16>, vector<192x256xbf16>, vector<32x256xf32> -> vector<32x256xf32>
    %9 = arith.addf %1, %8 : vector<32x256xf32>
    %c1 = arith.constant 1 : index
    %c0_9 = arith.constant 0 : index
    %c0_10 = arith.constant 0 : index
    %10 = vector.load %arg2[%c1, %c0_9, %c0_10] : memref<4x32x64xbf16, #tpu.memory_space<vmem>>, vector<1x32x64xbf16>
    %11 = vector.shape_cast %10 : vector<1x32x64xbf16> to vector<32x64xbf16>
    %cst_11 = arith.constant dense<0.000000e+00> : vector<32x192xf32>
    %12 = tpu.matmul %11, %0, %cst_11 {dimension_numbers = #tpu.dot_dimension_numbers<[1], [0], [0], [1], [0, 0, 1, 1], [], []>} : vector<32x64xbf16>, vector<64x192xbf16>, vector<32x192xf32> -> vector<32x192xf32>
    %13 = arith.truncf %12 : vector<32x192xf32> to vector<32x192xbf16>
    %c1_12 = arith.constant 1 : index
    %c0_13 = arith.constant 0 : index
    %c0_14 = arith.constant 0 : index
    %14 = vector.load %arg3[%c1_12, %c0_13, %c0_14] : memref<4x192x256xbf16, #tpu.memory_space<vmem>>, vector<1x192x256xbf16>
    %15 = vector.shape_cast %14 : vector<1x192x256xbf16> to vector<192x256xbf16>
    %cst_15 = arith.constant dense<0.000000e+00> : vector<32x256xf32>
    %16 = tpu.matmul %13, %15, %cst_15 {dimension_numbers = #tpu.dot_dimension_numbers<[1], [0], [0], [1], [0, 0, 1, 1], [], []>} : vector<32x192xbf16>, vector<192x256xbf16>, vector<32x256xf32> -> vector<32x256xf32>
    %17 = arith.addf %9, %16 : vector<32x256xf32>
    %c2 = arith.constant 2 : index
    %c0_16 = arith.constant 0 : index
    %c0_17 = arith.constant 0 : index
    %18 = vector.load %arg2[%c2, %c0_16, %c0_17] : memref<4x32x64xbf16, #tpu.memory_space<vmem>>, vector<1x32x64xbf16>
    %19 = vector.shape_cast %18 : vector<1x32x64xbf16> to vector<32x64xbf16>
    %cst_18 = arith.constant dense<0.000000e+00> : vector<32x192xf32>
    %20 = tpu.matmul %19, %0, %cst_18 {dimension_numbers = #tpu.dot_dimension_numbers<[1], [0], [0], [1], [0, 0, 1, 1], [], []>} : vector<32x64xbf16>, vector<64x192xbf16>, vector<32x192xf32> -> vector<32x192xf32>
    %21 = arith.truncf %20 : vector<32x192xf32> to vector<32x192xbf16>
    %c2_19 = arith.constant 2 : index
    %c0_20 = arith.constant 0 : index
    %c0_21 = arith.constant 0 : index
    %22 = vector.load %arg3[%c2_19, %c0_20, %c0_21] : memref<4x192x256xbf16, #tpu.memory_space<vmem>>, vector<1x192x256xbf16>
    %23 = vector.shape_cast %22 : vector<1x192x256xbf16> to vector<192x256xbf16>
    %cst_22 = arith.constant dense<0.000000e+00> : vector<32x256xf32>
    %24 = tpu.matmul %21, %23, %cst_22 {dimension_numbers = #tpu.dot_dimension_numbers<[1], [0], [0], [1], [0, 0, 1, 1], [], []>} : vector<32x192xbf16>, vector<192x256xbf16>, vector<32x256xf32> -> vector<32x256xf32>
    %25 = arith.addf %17, %24 : vector<32x256xf32>
    %c3 = arith.constant 3 : index
    %c0_23 = arith.constant 0 : index
    %c0_24 = arith.constant 0 : index
    %26 = vector.load %arg2[%c3, %c0_23, %c0_24] : memref<4x32x64xbf16, #tpu.memory_space<vmem>>, vector<1x32x64xbf16>
    %27 = vector.shape_cast %26 : vector<1x32x64xbf16> to vector<32x64xbf16>
    %cst_25 = arith.constant dense<0.000000e+00> : vector<32x192xf32>
    %28 = tpu.matmul %27, %0, %cst_25 {dimension_numbers = #tpu.dot_dimension_numbers<[1], [0], [0], [1], [0, 0, 1, 1], [], []>} : vector<32x64xbf16>, vector<64x192xbf16>, vector<32x192xf32> -> vector<32x192xf32>
    %29 = arith.truncf %28 : vector<32x192xf32> to vector<32x192xbf16>
    %c3_26 = arith.constant 3 : index
    %c0_27 = arith.constant 0 : index
    %c0_28 = arith.constant 0 : index
    %30 = vector.load %arg3[%c3_26, %c0_27, %c0_28] : memref<4x192x256xbf16, #tpu.memory_space<vmem>>, vector<1x192x256xbf16>
    %31 = vector.shape_cast %30 : vector<1x192x256xbf16> to vector<192x256xbf16>
    %cst_29 = arith.constant dense<0.000000e+00> : vector<32x256xf32>
    %32 = tpu.matmul %29, %31, %cst_29 {dimension_numbers = #tpu.dot_dimension_numbers<[1], [0], [0], [1], [0, 0, 1, 1], [], []>} : vector<32x192xbf16>, vector<192x256xbf16>, vector<32x256xf32> -> vector<32x256xf32>
    %33 = arith.addf %25, %32 : vector<32x256xf32>
    %cst_30 = arith.constant 0.000000e+00 : f32
    %34 = vector.broadcast %cst_30 : f32 to vector<32x256xf32>
    %35 = arith.cmpf ogt, %33, %34 : vector<32x256xf32>
    %cst_31 = arith.constant 2.000000e-01 : f32
    %36 = vector.broadcast %cst_31 : f32 to vector<32x256xf32>
    %37 = arith.mulf %36, %33 : vector<32x256xf32>
    %38 = arith.select %35, %33, %37 : vector<32x256xi1>, vector<32x256xf32>
    %39 = arith.truncf %38 : vector<32x256xf32> to vector<32x256xbf16>
    %cst_32 = arith.constant 0.000000e+00 : f32
    %40 = vector.broadcast %cst_32 : f32 to vector<16x256xf32>
    %c0_33 = arith.constant 0 : index
    %c0_34 = arith.constant 0 : index
    %c0_35 = arith.constant 0 : index
    %41 = vector.load %arg4[%c0_33, %c0_34, %c0_35] : memref<4x16x32xbf16, #tpu.memory_space<vmem>>, vector<1x16x32xbf16>
    %42 = vector.shape_cast %41 : vector<1x16x32xbf16> to vector<16x32xbf16>
    %cst_36 = arith.constant dense<0.000000e+00> : vector<16x256xf32>
    %43 = tpu.matmul %42, %39, %cst_36 {dimension_numbers = #tpu.dot_dimension_numbers<[1], [0], [0], [1], [0, 0, 1, 1], [], []>} : vector<16x32xbf16>, vector<32x256xbf16>, vector<16x256xf32> -> vector<16x256xf32>
    %44 = arith.truncf %43 : vector<16x256xf32> to vector<16x256xbf16>
    %c0_37 = arith.constant 0 : index
    %c0_38 = arith.constant 0 : index
    %c0_39 = arith.constant 0 : index
    %45 = vector.load %arg5[%c0_37, %c0_38, %c0_39] : memref<4x256x256xbf16, #tpu.memory_space<vmem>>, vector<1x256x256xbf16>
    %46 = vector.shape_cast %45 : vector<1x256x256xbf16> to vector<256x256xbf16>
    %cst_40 = arith.constant dense<0.000000e+00> : vector<16x256xf32>
    %47 = tpu.matmul %44, %46, %cst_40 {dimension_numbers = #tpu.dot_dimension_numbers<[1], [0], [0], [1], [0, 0, 1, 1], [], []>} : vector<16x256xbf16>, vector<256x256xbf16>, vector<16x256xf32> -> vector<16x256xf32>
    %48 = arith.addf %40, %47 : vector<16x256xf32>
    %c1_41 = arith.constant 1 : index
    %c0_42 = arith.constant 0 : index
    %c0_43 = arith.constant 0 : index
    %49 = vector.load %arg4[%c1_41, %c0_42, %c0_43] : memref<4x16x32xbf16, #tpu.memory_space<vmem>>, vector<1x16x32xbf16>
    %50 = vector.shape_cast %49 : vector<1x16x32xbf16> to vector<16x32xbf16>
    %cst_44 = arith.constant dense<0.000000e+00> : vector<16x256xf32>
    %51 = tpu.matmul %50, %39, %cst_44 {dimension_numbers = #tpu.dot_dimension_numbers<[1], [0], [0], [1], [0, 0, 1, 1], [], []>} : vector<16x32xbf16>, vector<32x256xbf16>, vector<16x256xf32> -> vector<16x256xf32>
    %52 = arith.truncf %51 : vector<16x256xf32> to vector<16x256xbf16>
    %c1_45 = arith.constant 1 : index
    %c0_46 = arith.constant 0 : index
    %c0_47 = arith.constant 0 : index
    %53 = vector.load %arg5[%c1_45, %c0_46, %c0_47] : memref<4x256x256xbf16, #tpu.memory_space<vmem>>, vector<1x256x256xbf16>
    %54 = vector.shape_cast %53 : vector<1x256x256xbf16> to vector<256x256xbf16>
    %cst_48 = arith.constant dense<0.000000e+00> : vector<16x256xf32>
    %55 = tpu.matmul %52, %54, %cst_48 {dimension_numbers = #tpu.dot_dimension_numbers<[1], [0], [0], [1], [0, 0, 1, 1], [], []>} : vector<16x256xbf16>, vector<256x256xbf16>, vector<16x256xf32> -> vector<16x256xf32>
    %56 = arith.addf %48, %55 : vector<16x256xf32>
    %c2_49 = arith.constant 2 : index
    %c0_50 = arith.constant 0 : index
    %c0_51 = arith.constant 0 : index
    %57 = vector.load %arg4[%c2_49, %c0_50, %c0_51] : memref<4x16x32xbf16, #tpu.memory_space<vmem>>, vector<1x16x32xbf16>
    %58 = vector.shape_cast %57 : vector<1x16x32xbf16> to vector<16x32xbf16>
    %cst_52 = arith.constant dense<0.000000e+00> : vector<16x256xf32>
    %59 = tpu.matmul %58, %39, %cst_52 {dimension_numbers = #tpu.dot_dimension_numbers<[1], [0], [0], [1], [0, 0, 1, 1], [], []>} : vector<16x32xbf16>, vector<32x256xbf16>, vector<16x256xf32> -> vector<16x256xf32>
    %60 = arith.truncf %59 : vector<16x256xf32> to vector<16x256xbf16>
    %c2_53 = arith.constant 2 : index
    %c0_54 = arith.constant 0 : index
    %c0_55 = arith.constant 0 : index
    %61 = vector.load %arg5[%c2_53, %c0_54, %c0_55] : memref<4x256x256xbf16, #tpu.memory_space<vmem>>, vector<1x256x256xbf16>
    %62 = vector.shape_cast %61 : vector<1x256x256xbf16> to vector<256x256xbf16>
    %cst_56 = arith.constant dense<0.000000e+00> : vector<16x256xf32>
    %63 = tpu.matmul %60, %62, %cst_56 {dimension_numbers = #tpu.dot_dimension_numbers<[1], [0], [0], [1], [0, 0, 1, 1], [], []>} : vector<16x256xbf16>, vector<256x256xbf16>, vector<16x256xf32> -> vector<16x256xf32>
    %64 = arith.addf %56, %63 : vector<16x256xf32>
    %c3_57 = arith.constant 3 : index
    %c0_58 = arith.constant 0 : index
    %c0_59 = arith.constant 0 : index
    %65 = vector.load %arg4[%c3_57, %c0_58, %c0_59] : memref<4x16x32xbf16, #tpu.memory_space<vmem>>, vector<1x16x32xbf16>
    %66 = vector.shape_cast %65 : vector<1x16x32xbf16> to vector<16x32xbf16>
    %cst_60 = arith.constant dense<0.000000e+00> : vector<16x256xf32>
    %67 = tpu.matmul %66, %39, %cst_60 {dimension_numbers = #tpu.dot_dimension_numbers<[1], [0], [0], [1], [0, 0, 1, 1], [], []>} : vector<16x32xbf16>, vector<32x256xbf16>, vector<16x256xf32> -> vector<16x256xf32>
    %68 = arith.truncf %67 : vector<16x256xf32> to vector<16x256xbf16>
    %c3_61 = arith.constant 3 : index
    %c0_62 = arith.constant 0 : index
    %c0_63 = arith.constant 0 : index
    %69 = vector.load %arg5[%c3_61, %c0_62, %c0_63] : memref<4x256x256xbf16, #tpu.memory_space<vmem>>, vector<1x256x256xbf16>
    %70 = vector.shape_cast %69 : vector<1x256x256xbf16> to vector<256x256xbf16>
    %cst_64 = arith.constant dense<0.000000e+00> : vector<16x256xf32>
    %71 = tpu.matmul %68, %70, %cst_64 {dimension_numbers = #tpu.dot_dimension_numbers<[1], [0], [0], [1], [0, 0, 1, 1], [], []>} : vector<16x256xbf16>, vector<256x256xbf16>, vector<16x256xf32> -> vector<16x256xf32>
    %72 = arith.addf %64, %71 : vector<16x256xf32>
    %c0_65 = arith.constant 0 : index
    %c0_66 = arith.constant 0 : index
    %73 = vector.load %arg12[%c0_65, %c0_66] : memref<1x256xf32, #tpu.memory_space<vmem>>, vector<1x256xf32>
    %74 = vector.broadcast %73 : vector<1x256xf32> to vector<16x256xf32>
    %75 = arith.addf %72, %74 : vector<16x256xf32>
    %cst_67 = arith.constant 0.000000e+00 : f32
    %76 = vector.broadcast %cst_67 : f32 to vector<16x256xf32>
    %77 = arith.cmpf ogt, %75, %76 : vector<16x256xf32>
    %cst_68 = arith.constant 2.000000e-01 : f32
    %78 = vector.broadcast %cst_68 : f32 to vector<16x256xf32>
    %79 = arith.mulf %78, %75 : vector<16x256xf32>
    %80 = arith.select %77, %75, %79 : vector<16x256xi1>, vector<16x256xf32>
    %81 = arith.truncf %80 : vector<16x256xf32> to vector<16x256xbf16>
    %cst_69 = arith.constant 0.000000e+00 : f32
    %82 = vector.broadcast %cst_69 : f32 to vector<8x256xf32>
    %c0_70 = arith.constant 0 : index
    %c0_71 = arith.constant 0 : index
    %c0_72 = arith.constant 0 : index
    %83 = vector.load %arg6[%c0_70, %c0_71, %c0_72] : memref<4x8x16xbf16, #tpu.memory_space<vmem>>, vector<1x8x16xbf16>
    %84 = vector.shape_cast %83 : vector<1x8x16xbf16> to vector<8x16xbf16>
    %cst_73 = arith.constant dense<0.000000e+00> : vector<8x256xf32>
    %85 = tpu.matmul %84, %81, %cst_73 {dimension_numbers = #tpu.dot_dimension_numbers<[1], [0], [0], [1], [0, 0, 1, 1], [], []>} : vector<8x16xbf16>, vector<16x256xbf16>, vector<8x256xf32> -> vector<8x256xf32>
    %86 = arith.truncf %85 : vector<8x256xf32> to vector<8x256xbf16>
    %c0_74 = arith.constant 0 : index
    %c0_75 = arith.constant 0 : index
    %c0_76 = arith.constant 0 : index
    %87 = vector.load %arg7[%c0_74, %c0_75, %c0_76] : memref<4x256x256xbf16, #tpu.memory_space<vmem>>, vector<1x256x256xbf16>
    %88 = vector.shape_cast %87 : vector<1x256x256xbf16> to vector<256x256xbf16>
    %cst_77 = arith.constant dense<0.000000e+00> : vector<8x256xf32>
    %89 = tpu.matmul %86, %88, %cst_77 {dimension_numbers = #tpu.dot_dimension_numbers<[1], [0], [0], [1], [0, 0, 1, 1], [], []>} : vector<8x256xbf16>, vector<256x256xbf16>, vector<8x256xf32> -> vector<8x256xf32>
    %90 = arith.addf %82, %89 : vector<8x256xf32>
    %c1_78 = arith.constant 1 : index
    %c0_79 = arith.constant 0 : index
    %c0_80 = arith.constant 0 : index
    %91 = vector.load %arg6[%c1_78, %c0_79, %c0_80] : memref<4x8x16xbf16, #tpu.memory_space<vmem>>, vector<1x8x16xbf16>
    %92 = vector.shape_cast %91 : vector<1x8x16xbf16> to vector<8x16xbf16>
    %cst_81 = arith.constant dense<0.000000e+00> : vector<8x256xf32>
    %93 = tpu.matmul %92, %81, %cst_81 {dimension_numbers = #tpu.dot_dimension_numbers<[1], [0], [0], [1], [0, 0, 1, 1], [], []>} : vector<8x16xbf16>, vector<16x256xbf16>, vector<8x256xf32> -> vector<8x256xf32>
    %94 = arith.truncf %93 : vector<8x256xf32> to vector<8x256xbf16>
    %c1_82 = arith.constant 1 : index
    %c0_83 = arith.constant 0 : index
    %c0_84 = arith.constant 0 : index
    %95 = vector.load %arg7[%c1_82, %c0_83, %c0_84] : memref<4x256x256xbf16, #tpu.memory_space<vmem>>, vector<1x256x256xbf16>
    %96 = vector.shape_cast %95 : vector<1x256x256xbf16> to vector<256x256xbf16>
    %cst_85 = arith.constant dense<0.000000e+00> : vector<8x256xf32>
    %97 = tpu.matmul %94, %96, %cst_85 {dimension_numbers = #tpu.dot_dimension_numbers<[1], [0], [0], [1], [0, 0, 1, 1], [], []>} : vector<8x256xbf16>, vector<256x256xbf16>, vector<8x256xf32> -> vector<8x256xf32>
    %98 = arith.addf %90, %97 : vector<8x256xf32>
    %c2_86 = arith.constant 2 : index
    %c0_87 = arith.constant 0 : index
    %c0_88 = arith.constant 0 : index
    %99 = vector.load %arg6[%c2_86, %c0_87, %c0_88] : memref<4x8x16xbf16, #tpu.memory_space<vmem>>, vector<1x8x16xbf16>
    %100 = vector.shape_cast %99 : vector<1x8x16xbf16> to vector<8x16xbf16>
    %cst_89 = arith.constant dense<0.000000e+00> : vector<8x256xf32>
    %101 = tpu.matmul %100, %81, %cst_89 {dimension_numbers = #tpu.dot_dimension_numbers<[1], [0], [0], [1], [0, 0, 1, 1], [], []>} : vector<8x16xbf16>, vector<16x256xbf16>, vector<8x256xf32> -> vector<8x256xf32>
    %102 = arith.truncf %101 : vector<8x256xf32> to vector<8x256xbf16>
    %c2_90 = arith.constant 2 : index
    %c0_91 = arith.constant 0 : index
    %c0_92 = arith.constant 0 : index
    %103 = vector.load %arg7[%c2_90, %c0_91, %c0_92] : memref<4x256x256xbf16, #tpu.memory_space<vmem>>, vector<1x256x256xbf16>
    %104 = vector.shape_cast %103 : vector<1x256x256xbf16> to vector<256x256xbf16>
    %cst_93 = arith.constant dense<0.000000e+00> : vector<8x256xf32>
    %105 = tpu.matmul %102, %104, %cst_93 {dimension_numbers = #tpu.dot_dimension_numbers<[1], [0], [0], [1], [0, 0, 1, 1], [], []>} : vector<8x256xbf16>, vector<256x256xbf16>, vector<8x256xf32> -> vector<8x256xf32>
    %106 = arith.addf %98, %105 : vector<8x256xf32>
    %c3_94 = arith.constant 3 : index
    %c0_95 = arith.constant 0 : index
    %c0_96 = arith.constant 0 : index
    %107 = vector.load %arg6[%c3_94, %c0_95, %c0_96] : memref<4x8x16xbf16, #tpu.memory_space<vmem>>, vector<1x8x16xbf16>
    %108 = vector.shape_cast %107 : vector<1x8x16xbf16> to vector<8x16xbf16>
    %cst_97 = arith.constant dense<0.000000e+00> : vector<8x256xf32>
    %109 = tpu.matmul %108, %81, %cst_97 {dimension_numbers = #tpu.dot_dimension_numbers<[1], [0], [0], [1], [0, 0, 1, 1], [], []>} : vector<8x16xbf16>, vector<16x256xbf16>, vector<8x256xf32> -> vector<8x256xf32>
    %110 = arith.truncf %109 : vector<8x256xf32> to vector<8x256xbf16>
    %c3_98 = arith.constant 3 : index
    %c0_99 = arith.constant 0 : index
    %c0_100 = arith.constant 0 : index
    %111 = vector.load %arg7[%c3_98, %c0_99, %c0_100] : memref<4x256x256xbf16, #tpu.memory_space<vmem>>, vector<1x256x256xbf16>
    %112 = vector.shape_cast %111 : vector<1x256x256xbf16> to vector<256x256xbf16>
    %cst_101 = arith.constant dense<0.000000e+00> : vector<8x256xf32>
    %113 = tpu.matmul %110, %112, %cst_101 {dimension_numbers = #tpu.dot_dimension_numbers<[1], [0], [0], [1], [0, 0, 1, 1], [], []>} : vector<8x256xbf16>, vector<256x256xbf16>, vector<8x256xf32> -> vector<8x256xf32>
    %114 = arith.addf %106, %113 : vector<8x256xf32>
    %c0_102 = arith.constant 0 : index
    %c0_103 = arith.constant 0 : index
    %115 = vector.load %arg13[%c0_102, %c0_103] : memref<1x256xf32, #tpu.memory_space<vmem>>, vector<1x256xf32>
    %116 = vector.broadcast %115 : vector<1x256xf32> to vector<8x256xf32>
    %117 = arith.addf %114, %116 : vector<8x256xf32>
    %cst_104 = arith.constant 0.000000e+00 : f32
    %118 = vector.broadcast %cst_104 : f32 to vector<8x256xf32>
    %119 = arith.cmpf ogt, %117, %118 : vector<8x256xf32>
    %cst_105 = arith.constant 2.000000e-01 : f32
    %120 = vector.broadcast %cst_105 : f32 to vector<8x256xf32>
    %121 = arith.mulf %120, %117 : vector<8x256xf32>
    %122 = arith.select %119, %117, %121 : vector<8x256xi1>, vector<8x256xf32>
    %123 = arith.truncf %122 : vector<8x256xf32> to vector<8x256xbf16>
    %cst_106 = arith.constant 0.000000e+00 : f32
    %124 = vector.broadcast %cst_106 : f32 to vector<4x256xf32>
    %c0_107 = arith.constant 0 : index
    %c0_108 = arith.constant 0 : index
    %c0_109 = arith.constant 0 : index
    %125 = vector.load %arg8[%c0_107, %c0_108, %c0_109] : memref<4x4x8xbf16, #tpu.memory_space<vmem>>, vector<1x4x8xbf16>
    %126 = vector.shape_cast %125 : vector<1x4x8xbf16> to vector<4x8xbf16>
    %cst_110 = arith.constant dense<0.000000e+00> : vector<4x256xf32>
    %127 = tpu.matmul %126, %123, %cst_110 {dimension_numbers = #tpu.dot_dimension_numbers<[1], [0], [0], [1], [0, 0, 1, 1], [], []>} : vector<4x8xbf16>, vector<8x256xbf16>, vector<4x256xf32> -> vector<4x256xf32>
    %128 = arith.truncf %127 : vector<4x256xf32> to vector<4x256xbf16>
    %c0_111 = arith.constant 0 : index
    %c0_112 = arith.constant 0 : index
    %c0_113 = arith.constant 0 : index
    %129 = vector.load %arg9[%c0_111, %c0_112, %c0_113] : memref<4x256x256xbf16, #tpu.memory_space<vmem>>, vector<1x256x256xbf16>
    %130 = vector.shape_cast %129 : vector<1x256x256xbf16> to vector<256x256xbf16>
    %cst_114 = arith.constant dense<0.000000e+00> : vector<4x256xf32>
    %131 = tpu.matmul %128, %130, %cst_114 {dimension_numbers = #tpu.dot_dimension_numbers<[1], [0], [0], [1], [0, 0, 1, 1], [], []>} : vector<4x256xbf16>, vector<256x256xbf16>, vector<4x256xf32> -> vector<4x256xf32>
    %132 = arith.addf %124, %131 : vector<4x256xf32>
    %c1_115 = arith.constant 1 : index
    %c0_116 = arith.constant 0 : index
    %c0_117 = arith.constant 0 : index
    %133 = vector.load %arg8[%c1_115, %c0_116, %c0_117] : memref<4x4x8xbf16, #tpu.memory_space<vmem>>, vector<1x4x8xbf16>
    %134 = vector.shape_cast %133 : vector<1x4x8xbf16> to vector<4x8xbf16>
    %cst_118 = arith.constant dense<0.000000e+00> : vector<4x256xf32>
    %135 = tpu.matmul %134, %123, %cst_118 {dimension_numbers = #tpu.dot_dimension_numbers<[1], [0], [0], [1], [0, 0, 1, 1], [], []>} : vector<4x8xbf16>, vector<8x256xbf16>, vector<4x256xf32> -> vector<4x256xf32>
    %136 = arith.truncf %135 : vector<4x256xf32> to vector<4x256xbf16>
    %c1_119 = arith.constant 1 : index
    %c0_120 = arith.constant 0 : index
    %c0_121 = arith.constant 0 : index
    %137 = vector.load %arg9[%c1_119, %c0_120, %c0_121] : memref<4x256x256xbf16, #tpu.memory_space<vmem>>, vector<1x256x256xbf16>
    %138 = vector.shape_cast %137 : vector<1x256x256xbf16> to vector<256x256xbf16>
    %cst_122 = arith.constant dense<0.000000e+00> : vector<4x256xf32>
    %139 = tpu.matmul %136, %138, %cst_122 {dimension_numbers = #tpu.dot_dimension_numbers<[1], [0], [0], [1], [0, 0, 1, 1], [], []>} : vector<4x256xbf16>, vector<256x256xbf16>, vector<4x256xf32> -> vector<4x256xf32>
    %140 = arith.addf %132, %139 : vector<4x256xf32>
    %c2_123 = arith.constant 2 : index
    %c0_124 = arith.constant 0 : index
    %c0_125 = arith.constant 0 : index
    %141 = vector.load %arg8[%c2_123, %c0_124, %c0_125] : memref<4x4x8xbf16, #tpu.memory_space<vmem>>, vector<1x4x8xbf16>
    %142 = vector.shape_cast %141 : vector<1x4x8xbf16> to vector<4x8xbf16>
    %cst_126 = arith.constant dense<0.000000e+00> : vector<4x256xf32>
    %143 = tpu.matmul %142, %123, %cst_126 {dimension_numbers = #tpu.dot_dimension_numbers<[1], [0], [0], [1], [0, 0, 1, 1], [], []>} : vector<4x8xbf16>, vector<8x256xbf16>, vector<4x256xf32> -> vector<4x256xf32>
    %144 = arith.truncf %143 : vector<4x256xf32> to vector<4x256xbf16>
    %c2_127 = arith.constant 2 : index
    %c0_128 = arith.constant 0 : index
    %c0_129 = arith.constant 0 : index
    %145 = vector.load %arg9[%c2_127, %c0_128, %c0_129] : memref<4x256x256xbf16, #tpu.memory_space<vmem>>, vector<1x256x256xbf16>
    %146 = vector.shape_cast %145 : vector<1x256x256xbf16> to vector<256x256xbf16>
    %cst_130 = arith.constant dense<0.000000e+00> : vector<4x256xf32>
    %147 = tpu.matmul %144, %146, %cst_130 {dimension_numbers = #tpu.dot_dimension_numbers<[1], [0], [0], [1], [0, 0, 1, 1], [], []>} : vector<4x256xbf16>, vector<256x256xbf16>, vector<4x256xf32> -> vector<4x256xf32>
    %148 = arith.addf %140, %147 : vector<4x256xf32>
    %c3_131 = arith.constant 3 : index
    %c0_132 = arith.constant 0 : index
    %c0_133 = arith.constant 0 : index
    %149 = vector.load %arg8[%c3_131, %c0_132, %c0_133] : memref<4x4x8xbf16, #tpu.memory_space<vmem>>, vector<1x4x8xbf16>
    %150 = vector.shape_cast %149 : vector<1x4x8xbf16> to vector<4x8xbf16>
    %cst_134 = arith.constant dense<0.000000e+00> : vector<4x256xf32>
    %151 = tpu.matmul %150, %123, %cst_134 {dimension_numbers = #tpu.dot_dimension_numbers<[1], [0], [0], [1], [0, 0, 1, 1], [], []>} : vector<4x8xbf16>, vector<8x256xbf16>, vector<4x256xf32> -> vector<4x256xf32>
    %152 = arith.truncf %151 : vector<4x256xf32> to vector<4x256xbf16>
    %c3_135 = arith.constant 3 : index
    %c0_136 = arith.constant 0 : index
    %c0_137 = arith.constant 0 : index
    %153 = vector.load %arg9[%c3_135, %c0_136, %c0_137] : memref<4x256x256xbf16, #tpu.memory_space<vmem>>, vector<1x256x256xbf16>
    %154 = vector.shape_cast %153 : vector<1x256x256xbf16> to vector<256x256xbf16>
    %cst_138 = arith.constant dense<0.000000e+00> : vector<4x256xf32>
    %155 = tpu.matmul %152, %154, %cst_138 {dimension_numbers = #tpu.dot_dimension_numbers<[1], [0], [0], [1], [0, 0, 1, 1], [], []>} : vector<4x256xbf16>, vector<256x256xbf16>, vector<4x256xf32> -> vector<4x256xf32>
    %156 = arith.addf %148, %155 : vector<4x256xf32>
    %c0_139 = arith.constant 0 : index
    %c0_140 = arith.constant 0 : index
    %157 = vector.load %arg14[%c0_139, %c0_140] : memref<1x256xf32, #tpu.memory_space<vmem>>, vector<1x256xf32>
    %158 = vector.broadcast %157 : vector<1x256xf32> to vector<4x256xf32>
    %159 = arith.addf %156, %158 : vector<4x256xf32>
    %cst_141 = arith.constant 0.000000e+00 : f32
    %160 = vector.broadcast %cst_141 : f32 to vector<4x256xf32>
    %161 = arith.cmpf ogt, %159, %160 : vector<4x256xf32>
    %cst_142 = arith.constant 2.000000e-01 : f32
    %162 = vector.broadcast %cst_142 : f32 to vector<4x256xf32>
    %163 = arith.mulf %162, %159 : vector<4x256xf32>
    %164 = arith.select %161, %159, %163 : vector<4x256xi1>, vector<4x256xf32>
    %165 = arith.truncf %164 : vector<4x256xf32> to vector<4x256xbf16>
    %cst_143 = arith.constant 0.000000e+00 : f32
    %166 = vector.broadcast %cst_143 : f32 to vector<1x128xf32>
    %c0_144 = arith.constant 0 : index
    %c0_145 = arith.constant 0 : index
    %c0_146 = arith.constant 0 : index
    %167 = vector.load %arg10[%c0_144, %c0_145, %c0_146] : memref<4x1x4xbf16, #tpu.memory_space<vmem>>, vector<1x1x4xbf16>
    %168 = vector.shape_cast %167 : vector<1x1x4xbf16> to vector<1x4xbf16>
    %cst_147 = arith.constant dense<0.000000e+00> : vector<1x256xf32>
    %169 = tpu.matmul %168, %165, %cst_147 {dimension_numbers = #tpu.dot_dimension_numbers<[1], [0], [0], [1], [0, 0, 1, 1], [], []>} : vector<1x4xbf16>, vector<4x256xbf16>, vector<1x256xf32> -> vector<1x256xf32>
    %170 = arith.truncf %169 : vector<1x256xf32> to vector<1x256xbf16>
    %c0_148 = arith.constant 0 : index
    %c0_149 = arith.constant 0 : index
    %c0_150 = arith.constant 0 : index
    %171 = vector.load %arg11[%c0_148, %c0_149, %c0_150] : memref<4x256x128xbf16, #tpu.memory_space<vmem>>, vector<1x256x128xbf16>
    %172 = vector.shape_cast %171 : vector<1x256x128xbf16> to vector<256x128xbf16>
    %cst_151 = arith.constant dense<0.000000e+00> : vector<1x128xf32>
    %173 = tpu.matmul %170, %172, %cst_151 {dimension_numbers = #tpu.dot_dimension_numbers<[1], [0], [0], [1], [0, 0, 1, 1], [], []>} : vector<1x256xbf16>, vector<256x128xbf16>, vector<1x128xf32> -> vector<1x128xf32>
    %174 = arith.addf %166, %173 : vector<1x128xf32>
    %c1_152 = arith.constant 1 : index
    %c0_153 = arith.constant 0 : index
    %c0_154 = arith.constant 0 : index
    %175 = vector.load %arg10[%c1_152, %c0_153, %c0_154] : memref<4x1x4xbf16, #tpu.memory_space<vmem>>, vector<1x1x4xbf16>
    %176 = vector.shape_cast %175 : vector<1x1x4xbf16> to vector<1x4xbf16>
    %cst_155 = arith.constant dense<0.000000e+00> : vector<1x256xf32>
    %177 = tpu.matmul %176, %165, %cst_155 {dimension_numbers = #tpu.dot_dimension_numbers<[1], [0], [0], [1], [0, 0, 1, 1], [], []>} : vector<1x4xbf16>, vector<4x256xbf16>, vector<1x256xf32> -> vector<1x256xf32>
    %178 = arith.truncf %177 : vector<1x256xf32> to vector<1x256xbf16>
    %c1_156 = arith.constant 1 : index
    %c0_157 = arith.constant 0 : index
    %c0_158 = arith.constant 0 : index
    %179 = vector.load %arg11[%c1_156, %c0_157, %c0_158] : memref<4x256x128xbf16, #tpu.memory_space<vmem>>, vector<1x256x128xbf16>
    %180 = vector.shape_cast %179 : vector<1x256x128xbf16> to vector<256x128xbf16>
    %cst_159 = arith.constant dense<0.000000e+00> : vector<1x128xf32>
    %181 = tpu.matmul %178, %180, %cst_159 {dimension_numbers = #tpu.dot_dimension_numbers<[1], [0], [0], [1], [0, 0, 1, 1], [], []>} : vector<1x256xbf16>, vector<256x128xbf16>, vector<1x128xf32> -> vector<1x128xf32>
    %182 = arith.addf %174, %181 : vector<1x128xf32>
    %c2_160 = arith.constant 2 : index
    %c0_161 = arith.constant 0 : index
    %c0_162 = arith.constant 0 : index
    %183 = vector.load %arg10[%c2_160, %c0_161, %c0_162] : memref<4x1x4xbf16, #tpu.memory_space<vmem>>, vector<1x1x4xbf16>
    %184 = vector.shape_cast %183 : vector<1x1x4xbf16> to vector<1x4xbf16>
    %cst_163 = arith.constant dense<0.000000e+00> : vector<1x256xf32>
    %185 = tpu.matmul %184, %165, %cst_163 {dimension_numbers = #tpu.dot_dimension_numbers<[1], [0], [0], [1], [0, 0, 1, 1], [], []>} : vector<1x4xbf16>, vector<4x256xbf16>, vector<1x256xf32> -> vector<1x256xf32>
    %186 = arith.truncf %185 : vector<1x256xf32> to vector<1x256xbf16>
    %c2_164 = arith.constant 2 : index
    %c0_165 = arith.constant 0 : index
    %c0_166 = arith.constant 0 : index
    %187 = vector.load %arg11[%c2_164, %c0_165, %c0_166] : memref<4x256x128xbf16, #tpu.memory_space<vmem>>, vector<1x256x128xbf16>
    %188 = vector.shape_cast %187 : vector<1x256x128xbf16> to vector<256x128xbf16>
    %cst_167 = arith.constant dense<0.000000e+00> : vector<1x128xf32>
    %189 = tpu.matmul %186, %188, %cst_167 {dimension_numbers = #tpu.dot_dimension_numbers<[1], [0], [0], [1], [0, 0, 1, 1], [], []>} : vector<1x256xbf16>, vector<256x128xbf16>, vector<1x128xf32> -> vector<1x128xf32>
    %190 = arith.addf %182, %189 : vector<1x128xf32>
    %c3_168 = arith.constant 3 : index
    %c0_169 = arith.constant 0 : index
    %c0_170 = arith.constant 0 : index
    %191 = vector.load %arg10[%c3_168, %c0_169, %c0_170] : memref<4x1x4xbf16, #tpu.memory_space<vmem>>, vector<1x1x4xbf16>
    %192 = vector.shape_cast %191 : vector<1x1x4xbf16> to vector<1x4xbf16>
    %cst_171 = arith.constant dense<0.000000e+00> : vector<1x256xf32>
    %193 = tpu.matmul %192, %165, %cst_171 {dimension_numbers = #tpu.dot_dimension_numbers<[1], [0], [0], [1], [0, 0, 1, 1], [], []>} : vector<1x4xbf16>, vector<4x256xbf16>, vector<1x256xf32> -> vector<1x256xf32>
    %194 = arith.truncf %193 : vector<1x256xf32> to vector<1x256xbf16>
    %c3_172 = arith.constant 3 : index
    %c0_173 = arith.constant 0 : index
    %c0_174 = arith.constant 0 : index
    %195 = vector.load %arg11[%c3_172, %c0_173, %c0_174] : memref<4x256x128xbf16, #tpu.memory_space<vmem>>, vector<1x256x128xbf16>
    %196 = vector.shape_cast %195 : vector<1x256x128xbf16> to vector<256x128xbf16>
    %cst_175 = arith.constant dense<0.000000e+00> : vector<1x128xf32>
    %197 = tpu.matmul %194, %196, %cst_175 {dimension_numbers = #tpu.dot_dimension_numbers<[1], [0], [0], [1], [0, 0, 1, 1], [], []>} : vector<1x256xbf16>, vector<256x128xbf16>, vector<1x128xf32> -> vector<1x128xf32>
    %198 = arith.addf %190, %197 : vector<1x128xf32>
    %cst_176 = arith.constant 0.000000e+00 : f32
    %199 = vector.broadcast %cst_176 : f32 to vector<1x128xf32>
    %200 = arith.subf %199, %198 : vector<1x128xf32>
    %201 = math.exp %200 : vector<1x128xf32>
    %cst_177 = arith.constant 1.000000e+00 : f32
    %202 = vector.broadcast %cst_177 : f32 to vector<1x128xf32>
    %203 = arith.addf %202, %201 : vector<1x128xf32>
    %204 = tpu.reciprocal %203 {approx = true} : vector<1x128xf32> -> vector<1x128xf32>
    %205 = vector.shape_cast %204 : vector<1x128xf32> to vector<1x1x128xf32>
    %c0_178 = arith.constant 0 : index
    %c0_179 = arith.constant 0 : index
    %c0_180 = arith.constant 0 : index
    %206 = vector.load %arg15[%c0_178, %c0_179, %c0_180] : memref<1x1x128xf32, #tpu.memory_space<vmem>>, vector<1x1x128xf32>
    tpu.vector_store %arg15[%c0_178, %c0_179, %c0_180], %205 {strides = array<i32>} : memref<1x1x128xf32, #tpu.memory_space<vmem>>, vector<1x1x128xf32>,
    return
  }
  func.func @transform_0(%arg0: i32) -> (i32, i32) {
    %c0_i32 = arith.constant 0 : i32
    %c0_i32_0 = arith.constant 0 : i32
    return %arg0, %c0_i32 : i32, i32
  }
  func.func @transform_1(%arg0: i32) -> (i32, i32, i32) {
    %c0_i32 = arith.constant 0 : i32
    %c0_i32_0 = arith.constant 0 : i32
    %c0_i32_1 = arith.constant 0 : i32
    %c0_i32_2 = arith.constant 0 : i32
    return %c0_i32, %c0_i32_0, %c0_i32_1 : i32, i32, i32
  }
  func.func @transform_2(%arg0: i32) -> (i32, i32, i32) {
    %c0_i32 = arith.constant 0 : i32
    %c0_i32_0 = arith.constant 0 : i32
    %c0_i32_1 = arith.constant 0 : i32
    %c0_i32_2 = arith.constant 0 : i32
    return %c0_i32, %c0_i32_0, %c0_i32_1 : i32, i32, i32
  }
  func.func @transform_3(%arg0: i32) -> (i32, i32, i32) {
    %c0_i32 = arith.constant 0 : i32
    %c0_i32_0 = arith.constant 0 : i32
    %c0_i32_1 = arith.constant 0 : i32
    %c0_i32_2 = arith.constant 0 : i32
    return %c0_i32, %c0_i32_0, %c0_i32_1 : i32, i32, i32
  }
  func.func @transform_4(%arg0: i32) -> (i32, i32, i32) {
    %c0_i32 = arith.constant 0 : i32
    %c0_i32_0 = arith.constant 0 : i32
    %c0_i32_1 = arith.constant 0 : i32
    %c0_i32_2 = arith.constant 0 : i32
    return %c0_i32, %c0_i32_0, %c0_i32_1 : i32, i32, i32
  }
  func.func @transform_5(%arg0: i32) -> (i32, i32, i32) {
    %c0_i32 = arith.constant 0 : i32
    %c0_i32_0 = arith.constant 0 : i32
    %c0_i32_1 = arith.constant 0 : i32
    %c0_i32_2 = arith.constant 0 : i32
    return %c0_i32, %c0_i32_0, %c0_i32_1 : i32, i32, i32
  }
  func.func @transform_6(%arg0: i32) -> (i32, i32, i32) {
    %c0_i32 = arith.constant 0 : i32
    %c0_i32_0 = arith.constant 0 : i32
    %c0_i32_1 = arith.constant 0 : i32
    %c0_i32_2 = arith.constant 0 : i32
    return %c0_i32, %c0_i32_0, %c0_i32_1 : i32, i32, i32
  }
  func.func @transform_7(%arg0: i32) -> (i32, i32, i32) {
    %c0_i32 = arith.constant 0 : i32
    %c0_i32_0 = arith.constant 0 : i32
    %c0_i32_1 = arith.constant 0 : i32
    %c0_i32_2 = arith.constant 0 : i32
    return %c0_i32, %c0_i32_0, %c0_i32_1 : i32, i32, i32
  }
  func.func @transform_8(%arg0: i32) -> (i32, i32, i32) {
    %c0_i32 = arith.constant 0 : i32
    %c0_i32_0 = arith.constant 0 : i32
    %c0_i32_1 = arith.constant 0 : i32
    %c0_i32_2 = arith.constant 0 : i32
    return %c0_i32, %c0_i32_0, %c0_i32_1 : i32, i32, i32
  }
  func.func @transform_9(%arg0: i32) -> (i32, i32, i32) {
    %c0_i32 = arith.constant 0 : i32
    %c0_i32_0 = arith.constant 0 : i32
    %c0_i32_1 = arith.constant 0 : i32
    %c0_i32_2 = arith.constant 0 : i32
    return %c0_i32, %c0_i32_0, %c0_i32_1 : i32, i32, i32
  }
  func.func @transform_10(%arg0: i32) -> (i32, i32, i32) {
    %c0_i32 = arith.constant 0 : i32
    %c0_i32_0 = arith.constant 0 : i32
    %c0_i32_1 = arith.constant 0 : i32
    %c0_i32_2 = arith.constant 0 : i32
    return %c0_i32, %c0_i32_0, %c0_i32_1 : i32, i32, i32
  }
  func.func @transform_11(%arg0: i32) -> (i32, i32) {
    %c0_i32 = arith.constant 0 : i32
    %c0_i32_0 = arith.constant 0 : i32
    %c0_i32_1 = arith.constant 0 : i32
    return %c0_i32, %c0_i32_0 : i32, i32
  }
  func.func @transform_12(%arg0: i32) -> (i32, i32) {
    %c0_i32 = arith.constant 0 : i32
    %c0_i32_0 = arith.constant 0 : i32
    %c0_i32_1 = arith.constant 0 : i32
    return %c0_i32, %c0_i32_0 : i32, i32
  }
  func.func @transform_13(%arg0: i32) -> (i32, i32) {
    %c0_i32 = arith.constant 0 : i32
    %c0_i32_0 = arith.constant 0 : i32
    %c0_i32_1 = arith.constant 0 : i32
    return %c0_i32, %c0_i32_0 : i32, i32
  }
  func.func @transform_14(%arg0: i32) -> (i32, i32, i32) {
    %c0_i32 = arith.constant 0 : i32
    %c0_i32_0 = arith.constant 0 : i32
    %c0_i32_1 = arith.constant 0 : i32
    return %arg0, %c0_i32, %c0_i32_0 : i32, i32, i32
  }
}

</mosaic_0001>

<bundles_post_ra>
// kernel: discriminator_forward.1
= control target key start
LH: loop header
LB: loop body
LE: loop exit
PB: predicated region body
PF: predicated region fallthrough
CT: control target
= control target key end

     0   :  { %s9109_s0 = inlined_call_operand.vmem [shape: bf16[128,192], index: 0, kind: input, shape index: {}]   ;;  %s9110_s1 = inlined_call_operand.vmem [shape: bf16[4,32,64], index: 1, kind: input, shape index: {}]   ;;  %s9111_s2 = inlined_call_operand.hbm [shape: bf16[4,192,256], index: 2, kind: input, shape index: {}]   ;;  %s9112_s3 = inlined_call_operand.vmem [shape: bf16[4,16,32], index: 3, kind: input, shape index: {}]   ;;  %s9113_s4 = inlined_call_operand.vmem [shape: bf16[4,256,256], index: 4, kind: input, shape index: {}]   ;;  %s9114_s5 = inlined_call_operand.vmem [shape: bf16[4,8,16], index: 5, kind: input, shape index: {}]   ;;  %s9115_s6 = inlined_call_operand.hbm [shape: bf16[4,256,256], index: 6, kind: input, shape index: {}]   ;;  %s9116_s7 = inlined_call_operand.vmem [shape: bf16[4,4,8], index: 7, kind: input, shape index: {}]   ;;  %s9117_s8 = inlined_call_operand.hbm [shape: bf16[4,256,256], index: 8, kind: input, shape index: {}]   ;;  %s9118_s9 = inlined_call_operand.vmem [shape: bf16[4,1,4], index: 9, kind: input, shape index: {}]   ;;  %s9119_s10 = inlined_call_operand.hbm [shape: bf16[4,256,128], index: 10, kind: input, shape index: {}]   ;;  %s9120_s11 = inlined_call_operand.vmem [shape: f32[1,256], index: 11, kind: input, shape index: {}]   ;;  %s9121_s12 = inlined_call_operand.vmem [shape: f32[1,256], index: 12, kind: input, shape index: {}]   ;;  %s9122_s13 = inlined_call_operand.vmem [shape: f32[1,256], index: 13, kind: input, shape index: {}]   ;;  %s9123_s14 = inlined_call_operand.vmem [shape: f32[2,1,128], index: 14, kind: output, shape index: {}]  }
   0x1   :  { %9128 = sst [smem:[#allocation13_spill]] %s9118_s9 }
   0x2   :  { %9129 = sst [smem:[#allocation14_spill]] %s9122_s13 }
   0x3   :  { %9130 = sst [smem:[#allocation15_spill]] %s9123_s14 }
   0x4   :  { %19 = vsyncpa [#allocation3], 0 }
   0x5   :  { %20 = vsyncpa [#allocation5], 0 }
   0x6   :  { %21 = vsyncpa [#allocation8], 0  ;;  %s8188_s29 = smov 0  }
   0x7 LB: > { %9131 = sst [smem:[#allocation12_spill]] %s8102_s29  ;;  %s8194_s30 = sadd.s32 4294967295, %s8102_s29   ;;  %s8102_s29 = sphi %s8188_s29, %s27_s29  }
   0x8   : > { %p6238_p0 = scmp.ge.s32.totalorder %s8102_s29, 1  ;;  %p357_p1 = scmp.lt.s32.totalorder %s8102_s29, 3 }
   0x9   : > { %p9126_p2 = scmp.eq.s32.totalorder %s8194_s30, 0  ;;  %s8104_s16 = smov [#allocation4]  }
   0xa   : > { %p8199_p3 = pnand %p6238_p0, %p357_p1  ;;  %s394_s17 = sshll.u32 %s8104_s16, 4  ;;  %s8203_s17 = int_to_ptr.vmem [resolvable:$true] %s394_s17 }
   0xb   : > { %s8105_s18 = smov [#allocation2]   ;;  %s8106_s21 = smov [#allocation6]  }
   0xc   : > { %s9132_s15 = scalar_select %p8199_p3, 1, 0 }
   0xd   : > { %p7122_p4 = pneg %p8199_p3  ;;  %s372_s19 = sshll.u32 %s8105_s18, 4  ;;  %s8207_s19 = int_to_ptr.vmem [resolvable:$true] %s372_s19 }
   0xe   : > { %s410_s22 = sshll.u32 %s8106_s21, 4  ;;  %s8107_s23 = smov [#allocation7]   ;;  %s8215_s22 = int_to_ptr.vmem [resolvable:$true] %s410_s22 }
   0xf   : > { %p8211_p5 = pnand %p9126_p2, %p7122_p4  ;;  %s8217_s24 = sshll.u32 %s8107_s23, 4  ;;  %s427_s24 = int_to_ptr.vmem [resolvable:$true] %s8217_s24 }
  0x10   : > { %s7972_s27 = scalar_lea.hbm %s9115_s6, 16384 }
  0x11   : > { %p7973_p6 = scmp.ne.s32.totalorder %s9115_s6, %s7972_s27  ;;  %p8227_p7 = pneg %p8211_p5 }
  0x12   : > { %p7979_p10 = scmp.lt.u32.totalorder %s7972_s27, %s9115_s6 }
  0x13   : > { %p7975_p8 = pnand %p8227_p7, %p7973_p6 }
  0x15   : > { %p7976_p9 = pneg %p7975_p8 }
  0x17   : > { %p7981_p11 = pnand %p7979_p10, %p7976_p9 }
  0x19   : > { %7984 = shalt.err (!%p7981_p11)
}
  0x1a   : > { %s7985_s25 = scalar_lea.vmem %s8203_s17, 16384  ;;  %p7993_p1 = scmp.lt.s32.totalorder %s8203_s17, %s8203_s17 }
  0x1b   : > { %p7986_p12 = scmp.ne.s32.totalorder %s8203_s17, %s7985_s25  ;;  %p7994_p4 = scmp.lt.s32.totalorder %s7985_s25, %s7985_s25 }
  0x1d   : > { %p7988_p13 = pnand %p7986_p12, %p8227_p7  ;;  %p7995_p6 = por %p7994_p4, %p7993_p1 }
  0x1f   : > { %p7989_p0 = pneg %p7988_p13 }
  0x21   : > { %p7996_p8 = pnand %p7995_p6, %p7989_p0 }
  0x23   : > { %7999 = shalt.err (!%p7996_p8)
}
  0x24   : > { %s8108_s26 = smov 128   ;;  %s8109_s27 = smov 8  }
  0x25   : > { %7128 = dma.hbm_to_vmem [thread:$0]  (!%p8211_p5), %s9115_s6, 16384, %s8203_s17, [#allocation5], %s8108_s26, %s8108_s26, %s8109_s27  }
  0x26   : > { %s8000_s25 = scalar_lea.hbm %s9111_s2, 12288 }
  0x27   : > { %p8001_p9 = scmp.ne.s32.totalorder %s9111_s2, %s8000_s25  ;;  %p8007_p12 = scmp.lt.u32.totalorder %s8000_s25, %s9111_s2 }
  0x29   : > { %p8003_p10 = pnand %p8001_p9, %p8227_p7 }
  0x2b   : > { %p8004_p11 = pneg %p8003_p10 }
  0x2d   : > { %p8009_p13 = pnand %p8007_p12, %p8004_p11 }
  0x2f   : > { %8012 = shalt.err (!%p8009_p13)
}
  0x30   : > { %s8013_s17 = scalar_lea.vmem %s8207_s19, 12288  ;;  %p8021_p6 = scmp.lt.s32.totalorder %s8207_s19, %s8207_s19 }
  0x31   : > { %p8014_p0 = scmp.ne.s32.totalorder %s8207_s19, %s8013_s17  ;;  %p8022_p8 = scmp.lt.s32.totalorder %s8013_s17, %s8013_s17 }
  0x33   : > { %p8016_p1 = pnand %p8014_p0, %p8227_p7  ;;  %p8023_p9 = por %p8022_p8, %p8021_p6 }
  0x35   : > { %p8017_p4 = pneg %p8016_p1 }
  0x37   : > { %p8024_p10 = pnand %p8023_p9, %p8017_p4 }
  0x39   : > { %8027 = shalt.err (!%p8024_p10)
}
  0x3a   : > { %7125 = dma.hbm_to_vmem [thread:$0]  (!%p8211_p5), %s9111_s2, 12288, %s8207_s19, [#allocation3], %s8108_s26, %s8108_s26, %s8109_s27  }
  0x3b   : > { %s8028_s28 = scalar_lea.hbm %s9117_s8, 16384 }
  0x3c   : > { %p8029_p11 = scmp.ne.s32.totalorder %s9117_s8, %s8028_s28  ;;  %p8035_p0 = scmp.lt.u32.totalorder %s8028_s28, %s9117_s8 }
  0x3e   : > { %p8031_p12 = pnand %p8029_p11, %p8227_p7 }
  0x40   : > { %p8032_p13 = pneg %p8031_p12 }
  0x42   : > { %p8037_p1 = pnand %p8035_p0, %p8032_p13 }
  0x44   : > { %8040 = shalt.err (!%p8037_p1)
}
  0x45   : > { %s8041_s19 = scalar_lea.vmem %s8215_s22, 16384  ;;  %p8049_p9 = scmp.lt.s32.totalorder %s8215_s22, %s8215_s22 }
  0x46   : > { %p8042_p4 = scmp.ne.s32.totalorder %s8215_s22, %s8041_s19  ;;  %p8050_p10 = scmp.lt.s32.totalorder %s8041_s19, %s8041_s19 }
  0x48   : > { %p8044_p6 = pnand %p8042_p4, %p8227_p7  ;;  %p8051_p11 = por %p8050_p10, %p8049_p9 }
  0x4a   : > { %p8045_p8 = pneg %p8044_p6 }
  0x4c   : > { %p8052_p12 = pnand %p8051_p11, %p8045_p8 }
  0x4e   : > { %8055 = shalt.err (!%p8052_p12)
}
  0x4f   : > { %7131 = dma.hbm_to_vmem [thread:$0]  (!%p8211_p5), %s9117_s8, 16384, %s8215_s22, [#allocation5], %s8108_s26, %s8108_s26, %s8109_s27  }
  0x50   : > { %s8056_s29 = scalar_lea.hbm %s9119_s10, 8192 }
  0x51   : > { %p8057_p13 = scmp.ne.s32.totalorder %s9119_s10, %s8056_s29  ;;  %p8063_p4 = scmp.lt.u32.totalorder %s8056_s29, %s9119_s10 }
  0x53   : > { %p8059_p0 = pnand %p8057_p13, %p8227_p7 }
  0x55   : > { %p8060_p1 = pneg %p8059_p0 }
  0x57   : > { %p8065_p6 = pnand %p8063_p4, %p8060_p1 }
  0x59   : > { %8068 = shalt.err (!%p8065_p6)
}
  0x5a   : > { %s8069_s25 = scalar_lea.vmem %s427_s24, 8192  ;;  %p8077_p11 = scmp.lt.s32.totalorder %s427_s24, %s427_s24 }
  0x5b   : > { %p8070_p8 = scmp.ne.s32.totalorder %s427_s24, %s8069_s25  ;;  %p8078_p12 = scmp.lt.s32.totalorder %s8069_s25, %s8069_s25 }
  0x5d   : > { %p8072_p9 = pnand %p8070_p8, %p8227_p7  ;;  %p8079_p2 = por %p8078_p12, %p8077_p11 }
  0x5f   : > { %p8073_p10 = pneg %p8072_p9 }
  0x61   : > { %p8080_p3 = pnand %p8079_p2, %p8073_p10 }
  0x63   : > { %8083 = shalt.err (!%p8080_p3)
}
  0x64   : > { %s8110_s22 = smov 64   ;;  %s8111_s26 = smov 4  }
  0x65   : > { %7134 = dma.hbm_to_vmem [thread:$0]  (!%p8211_p5), %s9119_s10, 8192, %s427_s24, [#allocation8], %s8110_s22, %s8110_s22, %s8111_s26  }
  0x66   : > { %p9135_p13 = scmp.ne.s32.totalorder %s9132_s15, 0 }
  0x67   : > { %p9136_p0 = scmp.eq.s32.totalorder (!%p9135_p13), %s8194_s30, 0 }
  0x68   : > { %461 = sbr.rel (%p9135_p13) target bundleno = 3819 (0xeeb), region = 76 }
  0x6f   : > { %8089 = dma.done.wait (%p9136_p0), [#allocation3], 12288   ;;  %p9137_p7 = pmov %p9136_p0 }
  0x70   : > { %p9138_p2 = pmov %p9136_p0 }
  0x71   : > { %8091 = vsyncadd (%p9137_p7), [#allocation3], 4294955008 }
  0x72   : > { %8093 = dma.done.wait (%p9138_p2), [#allocation5], 32768   ;;  %p9139_p3 = pmov %p9136_p0 }
  0x73   : > { %p9140_p1 = pmov %p9136_p0 }
  0x74   : > { %8095 = vsyncadd (%p9139_p3), [#allocation5], 4294934528 }
  0x75   : > { %8097 = dma.done.wait (%p9140_p1), [#allocation8], 8192   ;;  %p9141_p5 = pmov %p9136_p0 }
  0x76   : > { %s6249_s15 = sshll.u32 %s8194_s30, 3  ;;  %v8112_v0 = vmov 0   ;;  %v7172_v9 = vld [vmem:[%s9110_s1 + $0x10] sm:$0xff]   ;;  %v7174_v10 = vld [vmem:[%s9110_s1] sm:$0xff]   ;;  %vm591_vm0 = vcmask 523264   ;;  %v7173_v15 = vld [vmem:[%s9110_s1 + $0x18] sm:$0xff]  }
  0x77   : > { %8099 = vsyncadd (%p9141_p5), [#allocation8], 4294959104  ;;  %p519_p4 = scmp.lt.s32.totalorder %s6249_s15, 15  ;;  %732 = vmatprep.mubr.bf16.mxu1 %v8112_v0  ;;  %630 = vmatprep.mubr.bf16.mxu0 %v8112_v0  ;;  %v7182_v11 = vld [vmem:[#allocation2 + $0xc4] ss:$8 sps:$4 sm:$0xff]   ;;  %v7178_v31 = vld [vmem:[%s9110_s1 + $0x30] sm:$0xff]  }
  0x78   : > { %v7180_v12 = vld [vmem:[#allocation2 + $0xc0] ss:$8 sps:$4 sm:$0xff]   ;;  %v7185_v13 = vld [vmem:[#allocation2 + $0xd4] ss:$8 sps:$4 sm:$0xff]   ;;  %v7183_v14 = vld [vmem:[#allocation2 + $0xd0] ss:$8 sps:$4 sm:$0xff]  }
  0x79   : > { %s9147_s15 = smov (!%p519_p4, %s6249_s15), 15  ;;  %v7175_v16 = vld [vmem:[%s9110_s1 + $0x8] sm:$0xff]   ;;  %v7191_v19 = vld [vmem:[#allocation2 + $0xf4] ss:$8 sps:$4 sm:$0xff]   ;;  %v7189_v20 = vld [vmem:[#allocation2 + $0xf0] ss:$8 sps:$4 sm:$0xff]  }
  0x7a   : > { %s6981_s20 = sshll.u32 %s9147_s15, 3  ;;  %v7188_v17 = vld [vmem:[#allocation2 + $0xe4] ss:$8 sps:$4 sm:$0xff]   ;;  %v7186_v18 = vld [vmem:[#allocation2 + $0xe0] ss:$8 sps:$4 sm:$0xff]   ;;  %v7179_v36 = vld [vmem:[%s9110_s1 + $0x38] sm:$0xff]  }
  0x7b   : > { %s523_s17 = scalar_lea.vmem %s9109_s0, %s6981_s20  ;;  %v7176_v21 = vld [vmem:[%s9110_s1 + $0x20] sm:$0xff]   ;;  %v7197_v24 = vld [vmem:[#allocation2 + $0x114] ss:$8 sps:$4 sm:$0xff]   ;;  %v7195_v25 = vld [vmem:[#allocation2 + $0x110] ss:$8 sps:$4 sm:$0xff]   ;;  %vm1755_vm9 = vcmask 261120  }
  0x7c   : > { %v7160_v1 = vld [vmem:[%s523_s17 + $0x4] ss:$8 sps:$4 sm:$0xff]   ;;  %v8342_v2 = vld [vmem:[%s523_s17] ss:$8 sps:$4 sm:$0xff]   ;;  %v8344_v3 = vld [vmem:[%s523_s17 + $0x14] ss:$8 sps:$4 sm:$0xff]  }
  0x7d   : > { %700 = vmatprep.subr.bf16.mxu1 %v7160_v1  ;;  %598 = vmatprep.subr.bf16.mxu0 %v7160_v1  ;;  %v8347_v4 = vld [vmem:[%s523_s17 + $0x10] ss:$8 sps:$4 sm:$0xff]   ;;  %v8351_v5 = vld [vmem:[%s523_s17 + $0x24] ss:$8 sps:$4 sm:$0xff]   ;;  %v8355_v6 = vld [vmem:[%s523_s17 + $0x20] ss:$8 sps:$4 sm:$0xff]  }
  0x7e   : > { %701 = vmatpush1.bf16.msra.mxu1 %v8342_v2  ;;  %599 = vmatpush1.bf16.msra.mxu0 %v8342_v2  ;;  %v8359_v7 = vld [vmem:[%s523_s17 + $0x34] ss:$8 sps:$4 sm:$0xff]   ;;  %v8363_v8 = vld [vmem:[%s523_s17 + $0x30] ss:$8 sps:$4 sm:$0xff]   ;;  %v7194_v22 = vld [vmem:[#allocation2 + $0x104] ss:$8 sps:$4 sm:$0xff]  }
  0x7f   : > { %702 = vmatprep.subr.bf16.mxu1 %v8344_v3  ;;  %600 = vmatprep.subr.bf16.mxu0 %v8344_v3  ;;  %v7192_v23 = vld [vmem:[#allocation2 + $0x100] ss:$8 sps:$4 sm:$0xff]   ;;  %v7200_v27 = vld [vmem:[#allocation2 + $0x124] ss:$8 sps:$4 sm:$0xff]   ;;  %v7203_v29 = vld [vmem:[#allocation2 + $0x134] ss:$8 sps:$4 sm:$0xff]  }
  0x80   : > { %v7177_v26 = vld [vmem:[%s9110_s1 + $0x28] sm:$0xff]   ;;  %v7201_v30 = vld [vmem:[#allocation2 + $0x130] ss:$8 sps:$4 sm:$0xff]   ;;  %v7209_v34 = vld [vmem:[#allocation2 + $0x154] ss:$8 sps:$4 sm:$0xff]   ;;  %vm2954_vm14 = vcmask 130048  }
  0x81   : > { %v7198_v28 = vld [vmem:[#allocation2 + $0x120] ss:$8 sps:$4 sm:$0xff]   ;;  %v7206_v32 = vld [vmem:[#allocation2 + $0x144] ss:$8 sps:$4 sm:$0xff]   ;;  %v7207_v35 = vld [vmem:[#allocation2 + $0x150] ss:$8 sps:$4 sm:$0xff]  }
  0x82   : > { %703 = vmatpush1.bf16.msra.mxu1 %v8347_v4  ;;  %601 = vmatpush1.bf16.msra.mxu0 %v8347_v4  ;;  %v7204_v33 = vld [vmem:[#allocation2 + $0x140] ss:$8 sps:$4 sm:$0xff]   ;;  %v7212_v37 = vld [vmem:[#allocation2 + $0x164] ss:$8 sps:$4 sm:$0xff]   ;;  %v7215_v39 = vld [vmem:[#allocation2 + $0x174] ss:$8 sps:$4 sm:$0xff]  }
  0x83   : > { %704 = vmatprep.subr.bf16.mxu1 %v8351_v5  ;;  %602 = vmatprep.subr.bf16.mxu0 %v8351_v5  ;;  %v7210_v38 = vld [vmem:[#allocation2 + $0x160] ss:$8 sps:$4 sm:$0xff]   ;;  %v7213_v40 = vld [vmem:[#allocation2 + $0x170] ss:$8 sps:$4 sm:$0xff]   ;;  %v7218_v41 = vld [vmem:[#allocation2 + $0x4] ss:$8 sps:$4 sm:$0xff]  }
  0x84   : > { %v7216_v53 = vld [vmem:[#allocation2] ss:$8 sps:$4 sm:$0xff]   ;;  %v7221_v54 = vld [vmem:[#allocation2 + $0x14] ss:$8 sps:$4 sm:$0xff]   ;;  %v7219_v56 = vld [vmem:[#allocation2 + $0x10] ss:$8 sps:$4 sm:$0xff]  }
  0x85   : > { %v7224_v57 = vld [vmem:[#allocation2 + $0x24] ss:$8 sps:$4 sm:$0xff]   ;;  %s9142_s20 = sld [smem:[#allocation14_spill]]  ;;  %s9143_s17 = sld [smem:[#allocation13_spill]] }
  0x86   : > { %705 = vmatpush1.bf16.msra.mxu1 %v8355_v6  ;;  %603 = vmatpush1.bf16.msra.mxu0 %v8355_v6  ;;  %p525_p6 = scmp.lt.s32.totalorder %s8194_s30, 1  ;;  %s9144_s25 = sld [smem:[#allocation15_spill]] }
  0x87   : > { %706 = vmatprep.subr.bf16.mxu1 %v8359_v7  ;;  %604 = vmatprep.subr.bf16.mxu0 %v8359_v7 }
  0x88   : > { %s9149_s30 = smov (!%p525_p6, %s8194_s30), 1 }
  0x8a   : > { %707 = vmatpush1.bf16.msra.mxu1 %v8363_v8  ;;  %605 = vmatpush1.bf16.msra.mxu0 %v8363_v8 }
  0x8b   : > { %1161 = vmatprep.subr.bf16.mxu1 %v7160_v1  ;;  %908 = vmatprep.subr.bf16.mxu0 %v7182_v11 }
  0x8c   : > { %s527_s22 = scalar_lea.vmem %s9144_s25, %s9149_s30 }
  0x8d   : > { %6270 = vmatmul.mubr.msk.bf16.vlgmr.msra.gmra.mrb[0].mxu1 %vm591_vm0, %v7172_v9  ;;  %6262 = vmatmul.mubr.msk.bf16.vlgmr.msra.gmra.mrb[0].mxu0 %vm591_vm0, %v7174_v10  ;;  %v7225_v9 = vld [vmem:[#allocation2 + $0x30] ss:$8 sps:$4 sm:$0xff]   ;;  %v7230_v10 = vld [vmem:[#allocation2 + $0x44] ss:$8 sps:$4 sm:$0xff]  }
  0x8e   : > { %742 = vmatprep.mubr.bf16.mxu1 %v8112_v0  ;;  %1162 = vmatpush1.bf16.msra.mxu1 %v8342_v2 }
  0x8f   : > { %1163 = vmatprep.subr.bf16.mxu1 %v8344_v3  ;;  %640 = vmatprep.mubr.bf16.mxu0 %v8112_v0 }
  0x90   : > { %909 = vmatpush1.bf16.msra.mxu0 %v7180_v12 }
  0x91   : > { %910 = vmatprep.subr.bf16.mxu0 %v7185_v13  ;;  %v7228_v13 = vld [vmem:[#allocation2 + $0x40] ss:$8 sps:$4 sm:$0xff]  }
  0x92   : > { %1164 = vmatpush1.bf16.msra.mxu1 %v8347_v4 }
  0x93   : > { %1165 = vmatprep.subr.bf16.mxu1 %v8351_v5 }
  0x94   : > { %911 = vmatpush1.bf16.msra.mxu0 %v7183_v14 }
  0x95   : > { %6271 = vmatmul.mubr.msk.bf16.gmra.mrb[4].mxu1 %vm591_vm0, %v7173_v15  ;;  %6263 = vmatmul.mubr.msk.bf16.gmra.mrb[4].mxu0 %vm591_vm0, %v7175_v16  ;;  %v7233_v15 = vld [vmem:[#allocation2 + $0x54] ss:$8 sps:$4 sm:$0xff]  }
  0x96   : > { %1166 = vmatpush1.bf16.msra.mxu1 %v8355_v6  ;;  %1193 = vmatprep.mubr.bf16.mxu1 %v8112_v0 }
  0x97   : > { %1167 = vmatprep.subr.bf16.mxu1 %v8359_v7  ;;  %912 = vmatprep.subr.bf16.mxu0 %v7188_v17 }
  0x98   : > { %913 = vmatpush1.bf16.msra.mxu0 %v7186_v18 }
  0x99   : > { %914 = vmatprep.subr.bf16.mxu0 %v7191_v19  ;;  %v7231_v19 = vld [vmem:[#allocation2 + $0x50] ss:$8 sps:$4 sm:$0xff]  }
  0x9a   : > { %1168 = vmatpush1.bf16.msra.mxu1 %v8363_v8 }
  0x9b   : > { %1451 = vmatprep.subr.bf16.mxu1 %v7160_v1 }
  0x9c   : > { %915 = vmatpush1.bf16.msra.mxu0 %v7189_v20  ;;  %v7236_v20 = vld [vmem:[#allocation2 + $0x64] ss:$8 sps:$4 sm:$0xff]  }
  0x9d   : > { %6330 = vmatmul.mubr.msk.bf16.vlgmr.msra.gmra.mrb[8].mxu1 %vm591_vm0, %v7176_v21  ;;  %916 = vmatprep.subr.bf16.mxu0 %v7194_v22 }
  0x9e   : > { %1452 = vmatpush1.bf16.msra.mxu1 %v8342_v2  ;;  %1203 = vmatprep.mubr.bf16.mxu1 %v8112_v0 }
  0x9f   : > { %1453 = vmatprep.subr.bf16.mxu1 %v8344_v3 }
  0xa0   : > { %917 = vmatpush1.bf16.msra.mxu0 %v7192_v23 }
  0xa1   : > { %918 = vmatprep.subr.bf16.mxu0 %v7197_v24 }
  0xa2   : > { %1454 = vmatpush1.bf16.msra.mxu1 %v8347_v4 }
  0xa3   : > { %1455 = vmatprep.subr.bf16.mxu1 %v8351_v5  ;;  %v7222_v5 = vld [vmem:[#allocation2 + $0x20] ss:$8 sps:$4 sm:$0xff]  }
  0xa4   : > { %919 = vmatpush1.bf16.msra.mxu0 %v7195_v25 }
  0xa5   : > { %6331 = vmatmul.mubr.msk.bf16.gmra.mrb[12].mxu1 %vm591_vm0, %v7177_v26  ;;  %920 = vmatprep.subr.bf16.mxu0 %v7200_v27  ;;  %v7234_v26 = vld [vmem:[#allocation2 + $0x60] ss:$8 sps:$4 sm:$0xff]  }
  0xa6   : > { %1456 = vmatpush1.bf16.msra.mxu1 %v8355_v6  ;;  %1483 = vmatprep.mubr.bf16.mxu1 %v8112_v0  ;;  %v7227_v6 = vld [vmem:[#allocation2 + $0x34] ss:$8 sps:$4 sm:$0xff]  }
  0xa7   : > { %1457 = vmatprep.subr.bf16.mxu1 %v8359_v7 }
  0xa8   : > { %921 = vmatpush1.bf16.msra.mxu0 %v7198_v28  ;;  %v7239_v28 = vld [vmem:[#allocation2 + $0x74] ss:$8 sps:$4 sm:$0xff]  }
  0xa9   : > { %922 = vmatprep.subr.bf16.mxu0 %v7203_v29  ;;  %v7237_v29 = vld [vmem:[#allocation2 + $0x70] ss:$8 sps:$4 sm:$0xff]  }
  0xaa   : > { %1458 = vmatpush1.bf16.msra.mxu1 %v8363_v8 }
  0xac   : > { %923 = vmatpush1.bf16.msra.mxu0 %v7201_v30 }
  0xad   : > { %6364 = vmatmul.mubr.msk.bf16.vlgmr.msra.gmra.mrb[16].mxu1 %vm591_vm0, %v7178_v31  ;;  %924 = vmatprep.subr.bf16.mxu0 %v7206_v32  ;;  %v7242_v31 = vld [vmem:[#allocation2 + $0x84] ss:$8 sps:$4 sm:$0xff]  }
  0xae   : > { %1493 = vmatprep.mubr.bf16.mxu1 %v8112_v0 }
  0xb0   : > { %925 = vmatpush1.bf16.msra.mxu0 %v7204_v33 }
  0xb1   : > { %926 = vmatprep.subr.bf16.mxu0 %v7209_v34 }
  0xb4   : > { %927 = vmatpush1.bf16.msra.mxu0 %v7207_v35 }
  0xb5   : > { %6365 = vmatmul.mubr.msk.bf16.gmra.mrb[20].mxu1 %vm591_vm0, %v7179_v36  ;;  %928 = vmatprep.subr.bf16.mxu0 %v7212_v37  ;;  %v7240_v36 = vld [vmem:[#allocation2 + $0x80] ss:$8 sps:$4 sm:$0xff]  }
  0xb6   : > { %1791 = vmatprep.mubr.bf16.mxu1 %v8112_v0 }
  0xb8   : > { %929 = vmatpush1.bf16.msra.mxu0 %v7210_v38  ;;  %v7245_v38 = vld [vmem:[#allocation2 + $0x94] ss:$8 sps:$4 sm:$0xff]  }
  0xb9   : > { %930 = vmatprep.subr.bf16.mxu0 %v7215_v39  ;;  %v7243_v39 = vld [vmem:[#allocation2 + $0x90] ss:$8 sps:$4 sm:$0xff]  }
  0xbc   : > { %931 = vmatpush1.bf16.msra.mxu0 %v7213_v40 }
  0xbd   : > { %1087 = vmatprep.subr.bf16.mxu0 %v7218_v41  ;;  %v7248_v41 = vld [vmem:[#allocation2 + $0xa4] ss:$8 sps:$4 sm:$0xff]  }
 0x160   : > { %v734_v42 = vpop.f32.mrb[0].mxu1  ;;  %v8423_v43 = vpop.f32.mrb[0].mxu0 }
 0x161   : > { %v736_v44 = vpop.f32.mrb[1].mxu1  ;;  %v634_v45 = vpop.f32.mrb[1].mxu0 }
 0x162   : > { %v738_v46 = vpop.f32.mrb[2].mxu1  ;;  %v8425_v47 = vpop.f32.mrb[2].mxu0 }
 0x163   : > { %v753_v48 = vpack.c.bf16 %v738_v46, %v734_v42  ;;  %v740_v49 = vpop.f32.mrb[3].mxu1  ;;  %v651_v50 = vpack.c.bf16 %v8425_v47, %v8423_v43  ;;  %v638_v51 = vpop.f32.mrb[3].mxu0  ;;  %v7261_v43 = vld [vmem:[#allocation2 + $0x1b0] ss:$8 sps:$4 sm:$0xff]   ;;  %v7266_v47 = vld [vmem:[#allocation2 + $0x1c4] ss:$8 sps:$4 sm:$0xff]  }
 0x164   : > { %v754_v52 = vpack.c.bf16 %v740_v49, %v736_v44  ;;  %v652_v55 = vpack.c.bf16 %v638_v51, %v634_v45  ;;  %v7251_v51 = vld [vmem:[#allocation2 + $0xb4] ss:$8 sps:$4 sm:$0xff]  }
 0x166   : > { %6296 = vmatprep.mubr.msk.bf16.mxu0 %vm591_vm0, %v754_v52  ;;  %v7249_v52 = vld [vmem:[#allocation2 + $0xb0] ss:$8 sps:$4 sm:$0xff]  }
 0x167   : > { %941 = vmatmul.mubr.bf16.vlgmr.msra.gmra.mrb[8].mxu0 %v753_v48  ;;  %v7246_v48 = vld [vmem:[#allocation2 + $0xa0] ss:$8 sps:$4 sm:$0xff]  }
 0x168   : > { %1088 = vmatpush1.bf16.msra.mxu0 %v7216_v53  ;;  %v744_v58 = vpop.f32.mrb[4].mxu1  ;;  %v8430_v59 = vpop.f32.mrb[4].mxu0  ;;  %v7254_v53 = vld [vmem:[#allocation2 + $0x184] ss:$8 sps:$4 sm:$0xff]  }
 0x169   : > { %1089 = vmatprep.subr.bf16.mxu0 %v7221_v54  ;;  %v746_v60 = vpop.f32.mrb[5].mxu1  ;;  %v8432_v61 = vpop.f32.mrb[5].mxu0  ;;  %v7252_v54 = vld [vmem:[#allocation2 + $0x180] ss:$8 sps:$4 sm:$0xff]  }
 0x16a   : > { %v748_v62 = vpop.f32.mrb[6].mxu1  ;;  %v8434_v63 = vpop.f32.mrb[6].mxu0 }
 0x16b   : > { %v755_v1 = vpack.c.bf16 %v748_v62, %v744_v58  ;;  %v750_v2 = vpop.f32.mrb[7].mxu1  ;;  %v653_v3 = vpack.c.bf16 %v8434_v63, %v8430_v59  ;;  %v8438_v4 = vpop.f32.mrb[7].mxu0  ;;  %v7258_v58 = vld [vmem:[#allocation2 + $0x1a0] ss:$8 sps:$4 sm:$0xff]   ;;  %v7267_v62 = vld [vmem:[#allocation2 + $0x1d0] ss:$8 sps:$4 sm:$0xff]  }
 0x16c   : > { %1090 = vmatpush1.bf16.msra.mxu0 %v7219_v56  ;;  %v756_v7 = vpack.c.bf16 %v750_v2, %v746_v60  ;;  %v654_v8 = vpack.c.bf16 %v8438_v4, %v8432_v61  ;;  %v7255_v56 = vld [vmem:[#allocation2 + $0x190] ss:$8 sps:$4 sm:$0xff]   ;;  %v7263_v60 = vld [vmem:[#allocation2 + $0x1b4] ss:$8 sps:$4 sm:$0xff]   ;;  %v7270_v59 = vld [vmem:[#allocation2 + $0x1e0] ss:$8 sps:$4 sm:$0xff]  }
 0x16d   : > { %1091 = vmatprep.subr.bf16.mxu0 %v7224_v57  ;;  %v7260_v57 = vld [vmem:[#allocation2 + $0x1a4] ss:$8 sps:$4 sm:$0xff]   ;;  %v7269_v61 = vld [vmem:[#allocation2 + $0x1d4] ss:$8 sps:$4 sm:$0xff]   ;;  %v7273_v2 = vld [vmem:[#allocation2 + $0x1f0] ss:$8 sps:$4 sm:$0xff]  }
 0x16e   : > { %6297 = vmatprep.mubr.msk.bf16.mxu0 %vm591_vm0, %v756_v7  ;;  %v7275_v63 = vld [vmem:[#allocation2 + $0x1f4] ss:$8 sps:$4 sm:$0xff]   ;;  %v7276_v4 = vld [vmem:[#allocation2 + $0x200] ss:$8 sps:$4 sm:$0xff]   ;;  %v7284_v7 = vld [vmem:[#allocation2 + $0x224] ss:$8 sps:$4 sm:$0xff]  }
 0x16f   : > { %951 = vmatmul.mubr.bf16.gmra.mrb[12].mxu0 %v755_v1  ;;  %v7272_v1 = vld [vmem:[#allocation2 + $0x1e4] ss:$8 sps:$4 sm:$0xff]  }
 0x170   : > { %1092 = vmatpush1.bf16.msra.mxu0 %v7222_v5  ;;  %6322 = vmatprep.mubr.msk.bf16.mxu0 %vm591_vm0, %v652_v55  ;;  %v8444_v11 = vpop.f32.mrb[8].mxu1  ;;  %v7257_v55 = vld [vmem:[#allocation2 + $0x194] ss:$8 sps:$4 sm:$0xff]  }
 0x171   : > { %1093 = vmatprep.subr.bf16.mxu0 %v7227_v6  ;;  %v8446_v12 = vpop.f32.mrb[9].mxu1  ;;  %v7281_v5 = vld [vmem:[#allocation2 + $0x214] ss:$8 sps:$4 sm:$0xff]   ;;  %v7279_v6 = vld [vmem:[#allocation2 + $0x210] ss:$8 sps:$4 sm:$0xff]  }
 0x172   : > { %v8448_v14 = vpop.f32.mrb[10].mxu1 }
 0x173   : > { %v1214_v16 = vpack.c.bf16 %v8448_v14, %v8444_v11  ;;  %v8452_v17 = vpop.f32.mrb[11].mxu1  ;;  %v7297_v11 = vld [vmem:[#allocation2 + $0x270] ss:$8 sps:$4 sm:$0xff]   ;;  %v7302_v14 = vld [vmem:[#allocation2 + $0x284] ss:$8 sps:$4 sm:$0xff]  }
 0x174   : > { %1094 = vmatpush1.bf16.msra.mxu0 %v7225_v9  ;;  %v1215_v18 = vpack.c.bf16 %v8452_v17, %v8446_v12  ;;  %v7287_v9 = vld [vmem:[#allocation2 + $0x234] ss:$8 sps:$4 sm:$0xff]   ;;  %v7290_v12 = vld [vmem:[#allocation2 + $0x244] ss:$8 sps:$4 sm:$0xff]   ;;  %v7291_v17 = vld [vmem:[#allocation2 + $0x250] ss:$8 sps:$4 sm:$0xff]  }
 0x175   : > { %1095 = vmatprep.subr.bf16.mxu0 %v7230_v10  ;;  %v7285_v10 = vld [vmem:[#allocation2 + $0x230] ss:$8 sps:$4 sm:$0xff]  }
 0x178   : > { %1096 = vmatpush1.bf16.msra.mxu0 %v7228_v13  ;;  %v8456_v21 = vpop.f32.mrb[12].mxu1  ;;  %v7288_v13 = vld [vmem:[#allocation2 + $0x240] ss:$8 sps:$4 sm:$0xff]  }
 0x179   : > { %1097 = vmatprep.subr.bf16.mxu0 %v7233_v15  ;;  %v8458_v22 = vpop.f32.mrb[13].mxu1  ;;  %v7293_v15 = vld [vmem:[#allocation2 + $0x254] ss:$8 sps:$4 sm:$0xff]  }
 0x17a   : > { %v8460_v23 = vpop.f32.mrb[14].mxu1 }
 0x17b   : > { %v1216_v24 = vpack.c.bf16 %v8460_v23, %v8456_v21  ;;  %v8464_v25 = vpop.f32.mrb[15].mxu1  ;;  %v7306_v21 = vld [vmem:[#allocation2 + $0x2a0] ss:$8 sps:$4 sm:$0xff]   ;;  %v7311_v23 = vld [vmem:[#allocation2 + $0x2b4] ss:$8 sps:$4 sm:$0xff]  }
 0x17c   : > { %1098 = vmatpush1.bf16.msra.mxu0 %v7231_v19  ;;  %v1217_v27 = vpack.c.bf16 %v8464_v25, %v8458_v22  ;;  %v7294_v19 = vld [vmem:[#allocation2 + $0x260] ss:$8 sps:$4 sm:$0xff]   ;;  %v7305_v22 = vld [vmem:[#allocation2 + $0x294] ss:$8 sps:$4 sm:$0xff]   ;;  %v7303_v25 = vld [vmem:[#allocation2 + $0x290] ss:$8 sps:$4 sm:$0xff]  }
 0x17d   : > { %1099 = vmatprep.subr.bf16.mxu0 %v7236_v20  ;;  %v7299_v20 = vld [vmem:[#allocation2 + $0x274] ss:$8 sps:$4 sm:$0xff]  }
 0x180   : > { %1100 = vmatpush1.bf16.msra.mxu0 %v7234_v26  ;;  %v8468_v30 = vpop.f32.mrb[16].mxu1  ;;  %v7308_v26 = vld [vmem:[#allocation2 + $0x2a4] ss:$8 sps:$4 sm:$0xff]  }
 0x181   : > { %1101 = vmatprep.subr.bf16.mxu0 %v7239_v28  ;;  %v8470_v32 = vpop.f32.mrb[17].mxu1  ;;  %v7312_v28 = vld [vmem:[#allocation2 + $0x2c0] ss:$8 sps:$4 sm:$0xff]  }
 0x182   : > { %v8472_v33 = vpop.f32.mrb[18].mxu1 }
 0x183   : > { %v1504_v34 = vpack.c.bf16 %v8472_v33, %v8468_v30  ;;  %v8476_v35 = vpop.f32.mrb[19].mxu1 }
 0x184   : > { %1102 = vmatpush1.bf16.msra.mxu0 %v7237_v29  ;;  %v1505_v37 = vpack.c.bf16 %v8476_v35, %v8470_v32  ;;  %v7317_v29 = vld [vmem:[#allocation2 + $0x2d4] ss:$8 sps:$4 sm:$0xff]   ;;  %v7320_v32 = vld [vmem:[#allocation2 + $0x2e4] ss:$8 sps:$4 sm:$0xff]   ;;  %v7318_v35 = vld [vmem:[#allocation2 + $0x2e0] ss:$8 sps:$4 sm:$0xff]  }
 0x185   : > { %1103 = vmatprep.subr.bf16.mxu0 %v7242_v31  ;;  %v7315_v31 = vld [vmem:[#allocation2 + $0x2d0] ss:$8 sps:$4 sm:$0xff]  }
 0x188   : > { %1104 = vmatpush1.bf16.msra.mxu0 %v7240_v36  ;;  %v8480_v40 = vpop.f32.mrb[20].mxu1  ;;  %v7323_v36 = vld [vmem:[#allocation2 + $0x2f4] ss:$8 sps:$4 sm:$0xff]  }
 0x189   : > { %1105 = vmatprep.subr.bf16.mxu0 %v7245_v38  ;;  %v8482_v42 = vpop.f32.mrb[21].mxu1 }
 0x18a   : > { %v8484_v44 = vpop.f32.mrb[22].mxu1 }
 0x18b   : > { %v1506_v45 = vpack.c.bf16 %v8484_v44, %v8480_v40  ;;  %v8488_v46 = vpop.f32.mrb[23].mxu1 }
 0x18c   : > { %1106 = vmatpush1.bf16.msra.mxu0 %v7243_v39  ;;  %v1507_v49 = vpack.c.bf16 %v8488_v46, %v8482_v42 }
 0x18d   : > { %1107 = vmatprep.subr.bf16.mxu0 %v7248_v41 }
 0x190   : > { %1108 = vmatpush1.bf16.msra.mxu0 %v7246_v48 }
 0x191   : > { %1109 = vmatprep.subr.bf16.mxu0 %v7251_v51 }
 0x194   : > { %1110 = vmatpush1.bf16.msra.mxu0 %v7249_v52 }
 0x195   : > { %1369 = vmatprep.subr.bf16.mxu0 %v7254_v53 }
 0x197   : > { %1120 = vmatmul.mubr.bf16.vlgmr.msra.gmra.mrb[8].mxu0 %v651_v50  ;;  %v7264_v50 = vld [vmem:[#allocation2 + $0x1c0] ss:$8 sps:$4 sm:$0xff]  }
 0x198   : > { %1370 = vmatpush1.bf16.msra.mxu0 %v7252_v54  ;;  %6323 = vmatprep.mubr.msk.bf16.mxu0 %vm591_vm0, %v654_v8  ;;  %v7282_v8 = vld [vmem:[#allocation2 + $0x220] ss:$8 sps:$4 sm:$0xff]  }
 0x199   : > { %1371 = vmatprep.subr.bf16.mxu0 %v7257_v55 }
 0x19c   : > { %1372 = vmatpush1.bf16.msra.mxu0 %v7255_v56 }
 0x19d   : > { %1373 = vmatprep.subr.bf16.mxu0 %v7260_v57 }
 0x19f   : > { %1130 = vmatmul.mubr.bf16.gmra.mrb[12].mxu0 %v653_v3  ;;  %v7278_v3 = vld [vmem:[#allocation2 + $0x204] ss:$8 sps:$4 sm:$0xff]  }
 0x1a0   : > { %1374 = vmatpush1.bf16.msra.mxu0 %v7258_v58  ;;  %6356 = vmatprep.mubr.msk.bf16.mxu0 %vm591_vm0, %v1215_v18  ;;  %v7296_v18 = vld [vmem:[#allocation2 + $0x264] ss:$8 sps:$4 sm:$0xff]  }
 0x1a1   : > { %1375 = vmatprep.subr.bf16.mxu0 %v7263_v60 }
 0x1a4   : > { %1376 = vmatpush1.bf16.msra.mxu0 %v7261_v43 }
 0x1a5   : > { %1377 = vmatprep.subr.bf16.mxu0 %v7266_v47 }
 0x1a8   : > { %1378 = vmatpush1.bf16.msra.mxu0 %v7264_v50 }
 0x1a9   : > { %1379 = vmatprep.subr.bf16.mxu0 %v7269_v61 }
 0x1ac   : > { %1380 = vmatpush1.bf16.msra.mxu0 %v7267_v62 }
 0x1ad   : > { %1381 = vmatprep.subr.bf16.mxu0 %v7272_v1 }
 0x1b0   : > { %1382 = vmatpush1.bf16.msra.mxu0 %v7270_v59  ;;  %v7324_v59 = vld [vmem:[%s9112_s3] sm:$0xff]  }
 0x1b1   : > { %1383 = vmatprep.subr.bf16.mxu0 %v7275_v63  ;;  %v7328_v63 = vld [vmem:[%s9113_s4 + $0x104] ss:$8 sps:$4 sm:$0xff]  }
 0x1b4   : > { %1384 = vmatpush1.bf16.msra.mxu0 %v7273_v2  ;;  %v7325_v2 = vld [vmem:[%s9112_s3 + $0x8] sm:$0xff]  }
 0x1b5   : > { %1385 = vmatprep.subr.bf16.mxu0 %v7278_v3  ;;  %v7326_v3 = vld [vmem:[%s9113_s4 + $0x100] ss:$8 sps:$4 sm:$0xff]  }
 0x1b8   : > { %1386 = vmatpush1.bf16.msra.mxu0 %v7276_v4  ;;  %v7331_v4 = vld [vmem:[%s9113_s4 + $0x114] ss:$8 sps:$4 sm:$0xff]  }
 0x1b9   : > { %1387 = vmatprep.subr.bf16.mxu0 %v7281_v5  ;;  %v7329_v5 = vld [vmem:[%s9113_s4 + $0x110] ss:$8 sps:$4 sm:$0xff]  }
 0x1bc   : > { %1388 = vmatpush1.bf16.msra.mxu0 %v7279_v6  ;;  %v7334_v6 = vld [vmem:[%s9113_s4 + $0x124] ss:$8 sps:$4 sm:$0xff]  }
 0x1bd   : > { %1389 = vmatprep.subr.bf16.mxu0 %v7284_v7  ;;  %v7332_v7 = vld [vmem:[%s9113_s4 + $0x120] ss:$8 sps:$4 sm:$0xff]  }
 0x1c0   : > { %1390 = vmatpush1.bf16.msra.mxu0 %v7282_v8  ;;  %v7337_v8 = vld [vmem:[%s9113_s4 + $0x134] ss:$8 sps:$4 sm:$0xff]  }
 0x1c1   : > { %1391 = vmatprep.subr.bf16.mxu0 %v7287_v9  ;;  %v7335_v9 = vld [vmem:[%s9113_s4 + $0x130] ss:$8 sps:$4 sm:$0xff]  }
 0x1c4   : > { %1392 = vmatpush1.bf16.msra.mxu0 %v7285_v10  ;;  %v7340_v10 = vld [vmem:[%s9113_s4 + $0x144] ss:$8 sps:$4 sm:$0xff]  }
 0x1c5   : > { %1659 = vmatprep.subr.bf16.mxu0 %v7290_v12  ;;  %v7338_v12 = vld [vmem:[%s9113_s4 + $0x140] ss:$8 sps:$4 sm:$0xff]  }
 0x1c7   : > { %1402 = vmatmul.mubr.bf16.vlgmr.msra.gmra.mrb[8].mxu0 %v1214_v16  ;;  %v7300_v16 = vld [vmem:[#allocation2 + $0x280] ss:$8 sps:$4 sm:$0xff]  }
 0x1c8   : > { %1660 = vmatpush1.bf16.msra.mxu0 %v7288_v13  ;;  %6357 = vmatprep.mubr.msk.bf16.mxu0 %vm591_vm0, %v1217_v27  ;;  %v7314_v27 = vld [vmem:[#allocation2 + $0x2c4] ss:$8 sps:$4 sm:$0xff]   ;;  %v7343_v13 = vld [vmem:[%s9113_s4 + $0x154] ss:$8 sps:$4 sm:$0xff]  }
 0x1c9   : > { %1661 = vmatprep.subr.bf16.mxu0 %v7293_v15  ;;  %v7341_v15 = vld [vmem:[%s9113_s4 + $0x150] ss:$8 sps:$4 sm:$0xff]  }
 0x1cc   : > { %1662 = vmatpush1.bf16.msra.mxu0 %v7291_v17  ;;  %v7346_v17 = vld [vmem:[%s9113_s4 + $0x164] ss:$8 sps:$4 sm:$0xff]  }
 0x1cd   : > { %1663 = vmatprep.subr.bf16.mxu0 %v7296_v18  ;;  %v7344_v18 = vld [vmem:[%s9113_s4 + $0x160] ss:$8 sps:$4 sm:$0xff]  }
 0x1cf   : > { %1412 = vmatmul.mubr.bf16.gmra.mrb[12].mxu0 %v1216_v24  ;;  %v7309_v24 = vld [vmem:[#allocation2 + $0x2b0] ss:$8 sps:$4 sm:$0xff]  }
 0x1d0   : > { %1664 = vmatpush1.bf16.msra.mxu0 %v7294_v19  ;;  %6390 = vmatprep.mubr.msk.bf16.mxu0 %vm591_vm0, %v1505_v37  ;;  %v7321_v37 = vld [vmem:[#allocation2 + $0x2f0] ss:$8 sps:$4 sm:$0xff]   ;;  %v7349_v19 = vld [vmem:[%s9113_s4 + $0x174] ss:$8 sps:$4 sm:$0xff]  }
 0x1d1   : > { %1665 = vmatprep.subr.bf16.mxu0 %v7299_v20  ;;  %v7347_v20 = vld [vmem:[%s9113_s4 + $0x170] ss:$8 sps:$4 sm:$0xff]  }
 0x1d4   : > { %1666 = vmatpush1.bf16.msra.mxu0 %v7297_v11  ;;  %v7352_v11 = vld [vmem:[%s9113_s4 + $0x184] ss:$8 sps:$4 sm:$0xff]  }
 0x1d5   : > { %1667 = vmatprep.subr.bf16.mxu0 %v7302_v14  ;;  %v7350_v14 = vld [vmem:[%s9113_s4 + $0x180] ss:$8 sps:$4 sm:$0xff]  }
 0x1d8   : > { %1668 = vmatpush1.bf16.msra.mxu0 %v7300_v16  ;;  %v7355_v16 = vld [vmem:[%s9113_s4 + $0x194] ss:$8 sps:$4 sm:$0xff]  }
 0x1d9   : > { %1669 = vmatprep.subr.bf16.mxu0 %v7305_v22  ;;  %v7353_v22 = vld [vmem:[%s9113_s4 + $0x190] ss:$8 sps:$4 sm:$0xff]  }
 0x1dc   : > { %1670 = vmatpush1.bf16.msra.mxu0 %v7303_v25  ;;  %v7358_v25 = vld [vmem:[%s9113_s4 + $0x1a4] ss:$8 sps:$4 sm:$0xff]  }
 0x1dd   : > { %1671 = vmatprep.subr.bf16.mxu0 %v7308_v26  ;;  %v7356_v26 = vld [vmem:[%s9113_s4 + $0x1a0] ss:$8 sps:$4 sm:$0xff]  }
 0x1e0   : > { %1672 = vmatpush1.bf16.msra.mxu0 %v7306_v21  ;;  %v7361_v21 = vld [vmem:[%s9113_s4 + $0x1b4] ss:$8 sps:$4 sm:$0xff]  }
 0x1e1   : > { %1673 = vmatprep.subr.bf16.mxu0 %v7311_v23  ;;  %v7359_v23 = vld [vmem:[%s9113_s4 + $0x1b0] ss:$8 sps:$4 sm:$0xff]  }
 0x1e4   : > { %1674 = vmatpush1.bf16.msra.mxu0 %v7309_v24  ;;  %v7364_v24 = vld [vmem:[%s9113_s4 + $0x1c4] ss:$8 sps:$4 sm:$0xff]  }
 0x1e5   : > { %1675 = vmatprep.subr.bf16.mxu0 %v7314_v27  ;;  %v7362_v27 = vld [vmem:[%s9113_s4 + $0x1c0] ss:$8 sps:$4 sm:$0xff]  }
 0x1e8   : > { %1676 = vmatpush1.bf16.msra.mxu0 %v7312_v28  ;;  %v7367_v28 = vld [vmem:[%s9113_s4 + $0x1d4] ss:$8 sps:$4 sm:$0xff]  }
 0x1e9   : > { %1677 = vmatprep.subr.bf16.mxu0 %v7317_v29  ;;  %v7365_v29 = vld [vmem:[%s9113_s4 + $0x1d0] ss:$8 sps:$4 sm:$0xff]  }
 0x1ec   : > { %1678 = vmatpush1.bf16.msra.mxu0 %v7315_v31  ;;  %v7368_v31 = vld [vmem:[%s9113_s4 + $0x1e0] ss:$8 sps:$4 sm:$0xff]  }
 0x1ed   : > { %1679 = vmatprep.subr.bf16.mxu0 %v7320_v32  ;;  %v7370_v32 = vld [vmem:[%s9113_s4 + $0x1e4] ss:$8 sps:$4 sm:$0xff]  }
 0x1f0   : > { %1680 = vmatpush1.bf16.msra.mxu0 %v7318_v35  ;;  %v7373_v35 = vld [vmem:[%s9113_s4 + $0x1f4] ss:$8 sps:$4 sm:$0xff]  }
 0x1f1   : > { %1681 = vmatprep.subr.bf16.mxu0 %v7323_v36  ;;  %v7371_v36 = vld [vmem:[%s9113_s4 + $0x1f0] ss:$8 sps:$4 sm:$0xff]  }
 0x1f4   : > { %1682 = vmatpush1.bf16.msra.mxu0 %v7321_v37  ;;  %v7376_v37 = vld [vmem:[%s9113_s4 + $0x4] ss:$8 sps:$4 sm:$0xff]  }
 0x1f7   : > { %1692 = vmatmul.mubr.bf16.vlgmr.msra.gmra.mrb[8].mxu0 %v1504_v34 }
 0x1f8   : > { %6391 = vmatprep.mubr.msk.bf16.mxu0 %vm591_vm0, %v1507_v49 }
 0x1ff   : > { %1702 = vmatmul.mubr.bf16.gmra.mrb[12].mxu0 %v1506_v45 }
 0x200   : > { %2990 = vmatprep.mubr.bf16.mxu0 %v8112_v0 }
 0x2ca   : > { %v1693_v38 = vpop.f32.mrb[8].mxu0 }
 0x2cb   : > { %v1728_v39 = vmul.f32 0.2, %v1693_v38  ;;  %v1695_v41 = vpop.f32.mrb[9].mxu0  ;;  %vm1720_vm1 = vcmp.gt.f32.partialorder %v1693_v38, 0.0 }
 0x2cc   : > { %v1729_v48 = vmul.f32 0.2, %v1695_v41  ;;  %v1697_v51 = vpop.f32.mrb[10].mxu0  ;;  %vm1721_vm2 = vcmp.gt.f32.partialorder %v1695_v41, 0.0 }
 0x2cd   : > { %vm1722_vm3 = vcmp.gt.f32.partialorder %v1697_v51, 0.0  ;;  %v1730_v30 = vmul.f32 0.2, %v1697_v51  ;;  %v1699_v33 = vpop.f32.mrb[11].mxu0  ;;  %v1736_v42 = vsel %vm1720_vm1, %v1693_v38, %v1728_v39  ;;  %vm4111_vm1 = vcmask 1043456  }
 0x2ce   : > { %vm1723_vm4 = vcmp.gt.f32.partialorder %v1699_v33, 0.0  ;;  %v1731_v34 = vmul.f32 0.2, %v1699_v33  ;;  %v1737_v49 = vsel %vm1721_vm2, %v1695_v41, %v1729_v48  ;;  %vm4107_vm2 = vcmask 64512  }
 0x2cf   : > { %v1738_v46 = vsel %vm1722_vm3, %v1697_v51, %v1730_v30 }
 0x2d0   : > { %v8531_v52 = vpack.c.bf16 %v1738_v46, %v1736_v42  ;;  %v1739_v40 = vsel %vm1723_vm4, %v1699_v33, %v1731_v34 }
 0x2d1   : > { %v8533_v44 = vpack.c.bf16 %v1739_v40, %v1737_v49 }
 0x2d2   : > { %v1703_v45 = vpop.f32.mrb[12].mxu0 }
 0x2d3   : > { %v1732_v53 = vmul.f32 0.2, %v1703_v45  ;;  %v1705_v54 = vpop.f32.mrb[13].mxu0  ;;  %1759 = vmatprep.subr.bf16.mxu1 %v8533_v44  ;;  %vm1724_vm5 = vcmp.gt.f32.partialorder %v1703_v45, 0.0 }
 0x2d4   : > { %v1733_v55 = vmul.f32 0.2, %v1705_v54  ;;  %v1707_v56 = vpop.f32.mrb[14].mxu0  ;;  %1760 = vmatpush1.bf16.msra.mxu1 %v8531_v52  ;;  %vm1725_vm6 = vcmp.gt.f32.partialorder %v1705_v54, 0.0 }
 0x2d5   : > { %vm1726_vm7 = vcmp.gt.f32.partialorder %v1707_v56, 0.0  ;;  %v1734_v57 = vmul.f32 0.2, %v1707_v56  ;;  %v1709_v58 = vpop.f32.mrb[15].mxu0  ;;  %v1740_v43 = vsel %vm1724_vm5, %v1703_v45, %v1732_v53  ;;  %v7374_v45 = vld [vmem:[%s9113_s4] ss:$8 sps:$4 sm:$0xff]  }
 0x2d6   : > { %vm1727_vm8 = vcmp.gt.f32.partialorder %v1709_v58, 0.0  ;;  %v1735_v60 = vmul.f32 0.2, %v1709_v58  ;;  %v1741_v50 = vsel %vm1725_vm6, %v1705_v54, %v1733_v55  ;;  %v7379_v53 = vld [vmem:[%s9113_s4 + $0x14] ss:$8 sps:$4 sm:$0xff]   ;;  %vm5271_vm5 = vcmask 1041408  }
 0x2d7   : > { %v1742_v47 = vsel %vm1726_vm7, %v1707_v56, %v1734_v57  ;;  %v7377_v54 = vld [vmem:[%s9113_s4 + $0x10] ss:$8 sps:$4 sm:$0xff]   ;;  %v7382_v55 = vld [vmem:[%s9113_s4 + $0x24] ss:$8 sps:$4 sm:$0xff]   ;;  %v7380_v56 = vld [vmem:[%s9113_s4 + $0x20] ss:$8 sps:$4 sm:$0xff]  }
 0x2d8   : > { %v8537_v61 = vpack.c.bf16 %v1742_v47, %v1740_v43  ;;  %v1743_v62 = vsel %vm1727_vm8, %v1709_v58, %v1735_v60  ;;  %v7385_v57 = vld [vmem:[%s9113_s4 + $0x34] ss:$8 sps:$4 sm:$0xff]   ;;  %v7383_v58 = vld [vmem:[%s9113_s4 + $0x30] ss:$8 sps:$4 sm:$0xff]   ;;  %v7388_v60 = vld [vmem:[%s9113_s4 + $0x44] ss:$8 sps:$4 sm:$0xff]  }
 0x2d9   : > { %v8539_v1 = vpack.c.bf16 %v1743_v62, %v1741_v50  ;;  %v7386_v43 = vld [vmem:[%s9113_s4 + $0x40] ss:$8 sps:$4 sm:$0xff]   ;;  %v7391_v47 = vld [vmem:[%s9113_s4 + $0x54] ss:$8 sps:$4 sm:$0xff]   ;;  %v7389_v50 = vld [vmem:[%s9113_s4 + $0x50] ss:$8 sps:$4 sm:$0xff]  }
 0x2da   : > { %v7394_v62 = vld [vmem:[%s9113_s4 + $0x64] ss:$8 sps:$4 sm:$0xff]   ;;  %vm5267_vm6 = vcmask 31744  }
 0x2db   : > { %1761 = vmatprep.subr.bf16.mxu1 %v8539_v1 }
 0x2dc   : > { %1762 = vmatpush1.bf16.msra.mxu1 %v8537_v61 }
 0x2dd   : > { %1847 = vmatprep.subr.bf16.mxu1 %v8533_v44 }
 0x2df   : > { %6393 = vmatmul.mubr.msk.bf16.vlgmr.msra.gmra.mrb[24].mxu1 %vm1755_vm9, %v7324_v59  ;;  %v7392_v59 = vld [vmem:[%s9113_s4 + $0x60] ss:$8 sps:$4 sm:$0xff]  }
 0x2e0   : > { %1848 = vmatpush1.bf16.msra.mxu1 %v8531_v52  ;;  %1879 = vmatprep.mubr.bf16.mxu1 %v8112_v0 }
 0x2e1   : > { %1849 = vmatprep.subr.bf16.mxu1 %v8539_v1 }
 0x2e4   : > { %1850 = vmatpush1.bf16.msra.mxu1 %v8537_v61 }
 0x2e5   : > { %2085 = vmatprep.subr.bf16.mxu1 %v7328_v63  ;;  %v7397_v63 = vld [vmem:[%s9113_s4 + $0x74] ss:$8 sps:$4 sm:$0xff]  }
 0x2e7   : > { %6397 = vmatmul.mubr.msk.bf16.vlgmr.msra.gmra.mrb[28].mxu1 %vm1755_vm9, %v7325_v2  ;;  %v7395_v2 = vld [vmem:[%s9113_s4 + $0x70] ss:$8 sps:$4 sm:$0xff]  }
 0x2e8   : > { %2086 = vmatpush1.bf16.msra.mxu1 %v7326_v3  ;;  %v7400_v3 = vld [vmem:[%s9113_s4 + $0x84] ss:$8 sps:$4 sm:$0xff]  }
 0x2e9   : > { %2087 = vmatprep.subr.bf16.mxu1 %v7331_v4  ;;  %v7398_v4 = vld [vmem:[%s9113_s4 + $0x80] ss:$8 sps:$4 sm:$0xff]  }
 0x2ec   : > { %2088 = vmatpush1.bf16.msra.mxu1 %v7329_v5  ;;  %v7403_v5 = vld [vmem:[%s9113_s4 + $0x94] ss:$8 sps:$4 sm:$0xff]  }
 0x2ed   : > { %2089 = vmatprep.subr.bf16.mxu1 %v7334_v6  ;;  %v7401_v6 = vld [vmem:[%s9113_s4 + $0x90] ss:$8 sps:$4 sm:$0xff]  }
 0x2f0   : > { %2090 = vmatpush1.bf16.msra.mxu1 %v7332_v7  ;;  %v7406_v7 = vld [vmem:[%s9113_s4 + $0xa4] ss:$8 sps:$4 sm:$0xff]  }
 0x2f1   : > { %2091 = vmatprep.subr.bf16.mxu1 %v7337_v8  ;;  %v7404_v8 = vld [vmem:[%s9113_s4 + $0xa0] ss:$8 sps:$4 sm:$0xff]  }
 0x2f4   : > { %2092 = vmatpush1.bf16.msra.mxu1 %v7335_v9  ;;  %v7409_v9 = vld [vmem:[%s9113_s4 + $0xb4] ss:$8 sps:$4 sm:$0xff]  }
 0x2f5   : > { %2093 = vmatprep.subr.bf16.mxu1 %v7340_v10  ;;  %v7407_v10 = vld [vmem:[%s9113_s4 + $0xb0] ss:$8 sps:$4 sm:$0xff]  }
 0x2f8   : > { %2094 = vmatpush1.bf16.msra.mxu1 %v7338_v12  ;;  %v7412_v12 = vld [vmem:[%s9113_s4 + $0xc4] ss:$8 sps:$4 sm:$0xff]  }
 0x2f9   : > { %2095 = vmatprep.subr.bf16.mxu1 %v7343_v13  ;;  %v7410_v13 = vld [vmem:[%s9113_s4 + $0xc0] ss:$8 sps:$4 sm:$0xff]  }
 0x2fc   : > { %2096 = vmatpush1.bf16.msra.mxu1 %v7341_v15  ;;  %v7415_v15 = vld [vmem:[%s9113_s4 + $0xd4] ss:$8 sps:$4 sm:$0xff]  }
 0x2fd   : > { %2097 = vmatprep.subr.bf16.mxu1 %v7346_v17  ;;  %v7413_v17 = vld [vmem:[%s9113_s4 + $0xd0] ss:$8 sps:$4 sm:$0xff]  }
 0x300   : > { %2098 = vmatpush1.bf16.msra.mxu1 %v7344_v18  ;;  %v7418_v18 = vld [vmem:[%s9113_s4 + $0xe4] ss:$8 sps:$4 sm:$0xff]  }
 0x301   : > { %2099 = vmatprep.subr.bf16.mxu1 %v7349_v19  ;;  %v7416_v19 = vld [vmem:[%s9113_s4 + $0xe0] ss:$8 sps:$4 sm:$0xff]  }
 0x304   : > { %2100 = vmatpush1.bf16.msra.mxu1 %v7347_v20  ;;  %v7421_v20 = vld [vmem:[%s9113_s4 + $0xf4] ss:$8 sps:$4 sm:$0xff]  }
 0x305   : > { %2101 = vmatprep.subr.bf16.mxu1 %v7352_v11  ;;  %v7419_v11 = vld [vmem:[%s9113_s4 + $0xf0] ss:$8 sps:$4 sm:$0xff]  }
 0x308   : > { %2102 = vmatpush1.bf16.msra.mxu1 %v7350_v14  ;;  %v7425_v14 = vld [vmem:[%s9113_s4 + $0x204] ss:$8 sps:$4 sm:$0xff]  }
 0x309   : > { %2103 = vmatprep.subr.bf16.mxu1 %v7355_v16  ;;  %v7422_v16 = vld [vmem:[%s9112_s3 + $0x10] sm:$0xff]  }
 0x30c   : > { %2104 = vmatpush1.bf16.msra.mxu1 %v7353_v22  ;;  %v7423_v22 = vld [vmem:[%s9113_s4 + $0x200] ss:$8 sps:$4 sm:$0xff]  }
 0x30d   : > { %2105 = vmatprep.subr.bf16.mxu1 %v7358_v25  ;;  %v7428_v25 = vld [vmem:[%s9113_s4 + $0x214] ss:$8 sps:$4 sm:$0xff]  }
 0x310   : > { %2106 = vmatpush1.bf16.msra.mxu1 %v7356_v26  ;;  %v7426_v26 = vld [vmem:[%s9113_s4 + $0x210] ss:$8 sps:$4 sm:$0xff]  }
 0x311   : > { %2107 = vmatprep.subr.bf16.mxu1 %v7361_v21  ;;  %v7431_v21 = vld [vmem:[%s9113_s4 + $0x224] ss:$8 sps:$4 sm:$0xff]  }
 0x314   : > { %2108 = vmatpush1.bf16.msra.mxu1 %v7359_v23  ;;  %v7429_v23 = vld [vmem:[%s9113_s4 + $0x220] ss:$8 sps:$4 sm:$0xff]  }
 0x315   : > { %2109 = vmatprep.subr.bf16.mxu1 %v7364_v24  ;;  %v7434_v24 = vld [vmem:[%s9113_s4 + $0x234] ss:$8 sps:$4 sm:$0xff]  }
 0x318   : > { %2110 = vmatpush1.bf16.msra.mxu1 %v7362_v27  ;;  %v7432_v27 = vld [vmem:[%s9113_s4 + $0x230] ss:$8 sps:$4 sm:$0xff]  }
 0x319   : > { %2111 = vmatprep.subr.bf16.mxu1 %v7367_v28  ;;  %v7437_v28 = vld [vmem:[%s9113_s4 + $0x244] ss:$8 sps:$4 sm:$0xff]  }
 0x31c   : > { %2112 = vmatpush1.bf16.msra.mxu1 %v7365_v29  ;;  %v7435_v29 = vld [vmem:[%s9113_s4 + $0x240] ss:$8 sps:$4 sm:$0xff]  }
 0x31d   : > { %2113 = vmatprep.subr.bf16.mxu1 %v7370_v32  ;;  %v7438_v32 = vld [vmem:[%s9113_s4 + $0x250] ss:$8 sps:$4 sm:$0xff]  }
 0x320   : > { %2114 = vmatpush1.bf16.msra.mxu1 %v7368_v31  ;;  %v7440_v31 = vld [vmem:[%s9113_s4 + $0x254] ss:$8 sps:$4 sm:$0xff]  }
 0x321   : > { %2115 = vmatprep.subr.bf16.mxu1 %v7373_v35  ;;  %v7443_v35 = vld [vmem:[%s9113_s4 + $0x264] ss:$8 sps:$4 sm:$0xff]  }
 0x324   : > { %2116 = vmatpush1.bf16.msra.mxu1 %v7371_v36  ;;  %v7441_v36 = vld [vmem:[%s9113_s4 + $0x260] ss:$8 sps:$4 sm:$0xff]  }
 0x325   : > { %2288 = vmatprep.subr.bf16.mxu1 %v7376_v37  ;;  %v7446_v37 = vld [vmem:[%s9113_s4 + $0x274] ss:$8 sps:$4 sm:$0xff]  }
 0x3b2   : > { %v8655_v38 = vpop.f32.mrb[24].mxu1 }
 0x3b3   : > { %v1795_v39 = vpop.f32.mrb[25].mxu1 }
 0x3b4   : > { %v8657_v41 = vpop.f32.mrb[26].mxu1 }
 0x3b5   : > { %v1802_v48 = vpack.c.bf16 %v8657_v41, %v8655_v38  ;;  %v1799_v51 = vpop.f32.mrb[27].mxu1  ;;  %v7444_v38 = vld [vmem:[%s9113_s4 + $0x270] ss:$8 sps:$4 sm:$0xff]   ;;  %v7447_v41 = vld [vmem:[%s9113_s4 + $0x280] ss:$8 sps:$4 sm:$0xff]  }
 0x3b6   : > { %v1803_v30 = vpack.c.bf16 %v1799_v51, %v1795_v39  ;;  %v7449_v39 = vld [vmem:[%s9113_s4 + $0x284] ss:$8 sps:$4 sm:$0xff]   ;;  %v7450_v51 = vld [vmem:[%s9113_s4 + $0x290] ss:$8 sps:$4 sm:$0xff]  }
 0x3ba   : > { %v1881_v33 = vpop.f32.mrb[28].mxu1 }
 0x3bb   : > { %v1883_v34 = vpop.f32.mrb[29].mxu1 }
 0x3bc   : > { %v1885_v42 = vpop.f32.mrb[30].mxu1 }
 0x3bd   : > { %v1890_v46 = vpack.c.bf16 %v1885_v42, %v1881_v33  ;;  %v1887_v49 = vpop.f32.mrb[31].mxu1  ;;  %v7453_v33 = vld [vmem:[%s9113_s4 + $0x2a0] ss:$8 sps:$4 sm:$0xff]   ;;  %v7456_v42 = vld [vmem:[%s9113_s4 + $0x2b0] ss:$8 sps:$4 sm:$0xff]  }
 0x3be   : > { %v1891_v40 = vpack.c.bf16 %v1887_v49, %v1883_v34  ;;  %v7458_v34 = vld [vmem:[%s9113_s4 + $0x2b4] ss:$8 sps:$4 sm:$0xff]   ;;  %v7459_v49 = vld [vmem:[%s9113_s4 + $0x2c0] ss:$8 sps:$4 sm:$0xff]  }
 0x3c0   : > { %2117 = vmatprep.mubr.bf16.mxu1 %v1891_v40  ;;  %v7464_v40 = vld [vmem:[%s9113_s4 + $0x2d4] ss:$8 sps:$4 sm:$0xff]  }
 0x3c1   : > { %2118 = vmatmul.mubr.bf16.vlgmr.msra.gmra.mrb[32].mxu1 %v1890_v46  ;;  %v7461_v46 = vld [vmem:[%s9113_s4 + $0x2c4] ss:$8 sps:$4 sm:$0xff]  }
 0x3c2   : > { %2289 = vmatpush1.bf16.msra.mxu1 %v7374_v45  ;;  %2320 = vmatprep.mubr.bf16.mxu1 %v1803_v30  ;;  %v7455_v30 = vld [vmem:[%s9113_s4 + $0x2a4] ss:$8 sps:$4 sm:$0xff]   ;;  %v7462_v45 = vld [vmem:[%s9113_s4 + $0x2d0] ss:$8 sps:$4 sm:$0xff]  }
 0x3c3   : > { %2290 = vmatprep.subr.bf16.mxu1 %v7379_v53  ;;  %v7467_v53 = vld [vmem:[%s9113_s4 + $0x2e4] ss:$8 sps:$4 sm:$0xff]  }
 0x3c6   : > { %2291 = vmatpush1.bf16.msra.mxu1 %v7377_v54  ;;  %v7465_v54 = vld [vmem:[%s9113_s4 + $0x2e0] ss:$8 sps:$4 sm:$0xff]  }
 0x3c7   : > { %2292 = vmatprep.subr.bf16.mxu1 %v7382_v55  ;;  %v7470_v55 = vld [vmem:[%s9113_s4 + $0x2f4] ss:$8 sps:$4 sm:$0xff]  }
 0x3ca   : > { %2293 = vmatpush1.bf16.msra.mxu1 %v7380_v56  ;;  %v7468_v56 = vld [vmem:[%s9113_s4 + $0x2f0] ss:$8 sps:$4 sm:$0xff]  }
 0x3cb   : > { %2294 = vmatprep.subr.bf16.mxu1 %v7385_v57 }
 0x3ce   : > { %2295 = vmatpush1.bf16.msra.mxu1 %v7383_v58 }
 0x3cf   : > { %2296 = vmatprep.subr.bf16.mxu1 %v7388_v60 }
 0x3d2   : > { %2297 = vmatpush1.bf16.msra.mxu1 %v7386_v43 }
 0x3d3   : > { %2298 = vmatprep.subr.bf16.mxu1 %v7391_v47 }
 0x3d6   : > { %2299 = vmatpush1.bf16.msra.mxu1 %v7389_v50 }
 0x3d7   : > { %2300 = vmatprep.subr.bf16.mxu1 %v7394_v62  ;;  %v7474_v62 = vld [vmem:[%s9113_s4 + $0x304] ss:$8 sps:$4 sm:$0xff]  }
 0x3da   : > { %2301 = vmatpush1.bf16.msra.mxu1 %v7392_v59  ;;  %v7472_v59 = vld [vmem:[%s9113_s4 + $0x300] ss:$8 sps:$4 sm:$0xff]  }
 0x3db   : > { %2302 = vmatprep.subr.bf16.mxu1 %v7397_v63  ;;  %v7478_v63 = vld [vmem:[%s9113_s4 + $0x320] ss:$8 sps:$4 sm:$0xff]  }
 0x3de   : > { %2303 = vmatpush1.bf16.msra.mxu1 %v7395_v2  ;;  %v7483_v2 = vld [vmem:[%s9113_s4 + $0x334] ss:$8 sps:$4 sm:$0xff]  }
 0x3df   : > { %2304 = vmatprep.subr.bf16.mxu1 %v7400_v3  ;;  %v7481_v3 = vld [vmem:[%s9113_s4 + $0x330] ss:$8 sps:$4 sm:$0xff]  }
 0x3e2   : > { %2305 = vmatpush1.bf16.msra.mxu1 %v7398_v4  ;;  %v7486_v4 = vld [vmem:[%s9113_s4 + $0x344] ss:$8 sps:$4 sm:$0xff]  }
 0x3e3   : > { %2306 = vmatprep.subr.bf16.mxu1 %v7403_v5  ;;  %v7484_v5 = vld [vmem:[%s9113_s4 + $0x340] ss:$8 sps:$4 sm:$0xff]  }
 0x3e6   : > { %2307 = vmatpush1.bf16.msra.mxu1 %v7401_v6  ;;  %v7489_v6 = vld [vmem:[%s9113_s4 + $0x354] ss:$8 sps:$4 sm:$0xff]  }
 0x3e7   : > { %2308 = vmatprep.subr.bf16.mxu1 %v7406_v7  ;;  %v7487_v7 = vld [vmem:[%s9113_s4 + $0x350] ss:$8 sps:$4 sm:$0xff]  }
 0x3ea   : > { %2309 = vmatpush1.bf16.msra.mxu1 %v7404_v8  ;;  %v7492_v8 = vld [vmem:[%s9113_s4 + $0x364] ss:$8 sps:$4 sm:$0xff]  }
 0x3eb   : > { %2310 = vmatprep.subr.bf16.mxu1 %v7409_v9  ;;  %v7490_v9 = vld [vmem:[%s9113_s4 + $0x360] ss:$8 sps:$4 sm:$0xff]  }
 0x3ee   : > { %2311 = vmatpush1.bf16.msra.mxu1 %v7407_v10  ;;  %v7495_v10 = vld [vmem:[%s9113_s4 + $0x374] ss:$8 sps:$4 sm:$0xff]  }
 0x3ef   : > { %2312 = vmatprep.subr.bf16.mxu1 %v7412_v12  ;;  %v7493_v12 = vld [vmem:[%s9113_s4 + $0x370] ss:$8 sps:$4 sm:$0xff]  }
 0x3f2   : > { %2313 = vmatpush1.bf16.msra.mxu1 %v7410_v13  ;;  %v7498_v13 = vld [vmem:[%s9113_s4 + $0x384] ss:$8 sps:$4 sm:$0xff]  }
 0x3f3   : > { %2314 = vmatprep.subr.bf16.mxu1 %v7415_v15  ;;  %v7496_v15 = vld [vmem:[%s9113_s4 + $0x380] ss:$8 sps:$4 sm:$0xff]  }
 0x3f6   : > { %2315 = vmatpush1.bf16.msra.mxu1 %v7413_v17  ;;  %v7501_v17 = vld [vmem:[%s9113_s4 + $0x394] ss:$8 sps:$4 sm:$0xff]  }
 0x3f7   : > { %2316 = vmatprep.subr.bf16.mxu1 %v7418_v18  ;;  %v7499_v18 = vld [vmem:[%s9113_s4 + $0x390] ss:$8 sps:$4 sm:$0xff]  }
 0x3fa   : > { %2317 = vmatpush1.bf16.msra.mxu1 %v7416_v19  ;;  %v7504_v19 = vld [vmem:[%s9113_s4 + $0x3a4] ss:$8 sps:$4 sm:$0xff]  }
 0x3fb   : > { %2318 = vmatprep.subr.bf16.mxu1 %v7421_v20  ;;  %v7502_v20 = vld [vmem:[%s9113_s4 + $0x3a0] ss:$8 sps:$4 sm:$0xff]  }
 0x3fe   : > { %2319 = vmatpush1.bf16.msra.mxu1 %v7419_v11  ;;  %v7507_v11 = vld [vmem:[%s9113_s4 + $0x3b4] ss:$8 sps:$4 sm:$0xff]  }
 0x3ff   : > { %2342 = vmatprep.subr.bf16.mxu1 %v8533_v44 }
 0x401   : > { %2321 = vmatmul.mubr.bf16.vlgmr.msra.gmra.mrb[32].mxu1 %v1802_v48  ;;  %v7452_v48 = vld [vmem:[%s9113_s4 + $0x294] ss:$8 sps:$4 sm:$0xff]  }
 0x402   : > { %2343 = vmatpush1.bf16.msra.mxu1 %v8531_v52  ;;  %2374 = vmatprep.mubr.bf16.mxu1 %v8112_v0 }
 0x403   : > { %2344 = vmatprep.subr.bf16.mxu1 %v8539_v1 }
 0x406   : > { %2345 = vmatpush1.bf16.msra.mxu1 %v8537_v61 }
 0x407   : > { %2580 = vmatprep.subr.bf16.mxu1 %v7425_v14  ;;  %v7505_v14 = vld [vmem:[%s9113_s4 + $0x3b0] ss:$8 sps:$4 sm:$0xff]  }
 0x409   : > { %6497 = vmatmul.mubr.msk.bf16.vlgmr.msra.gmra.mrb[36].mxu1 %vm1755_vm9, %v7422_v16  ;;  %v7510_v16 = vld [vmem:[%s9113_s4 + $0x3c4] ss:$8 sps:$4 sm:$0xff]  }
 0x40a   : > { %2581 = vmatpush1.bf16.msra.mxu1 %v7423_v22  ;;  %v7508_v22 = vld [vmem:[%s9113_s4 + $0x3c0] ss:$8 sps:$4 sm:$0xff]  }
 0x40b   : > { %2582 = vmatprep.subr.bf16.mxu1 %v7428_v25  ;;  %v7513_v25 = vld [vmem:[%s9113_s4 + $0x3d4] ss:$8 sps:$4 sm:$0xff]  }
 0x40e   : > { %2583 = vmatpush1.bf16.msra.mxu1 %v7426_v26  ;;  %v7511_v26 = vld [vmem:[%s9113_s4 + $0x3d0] ss:$8 sps:$4 sm:$0xff]  }
 0x40f   : > { %2584 = vmatprep.subr.bf16.mxu1 %v7431_v21  ;;  %v7516_v21 = vld [vmem:[%s9113_s4 + $0x3e4] ss:$8 sps:$4 sm:$0xff]  }
 0x412   : > { %2585 = vmatpush1.bf16.msra.mxu1 %v7429_v23  ;;  %v7514_v23 = vld [vmem:[%s9113_s4 + $0x3e0] ss:$8 sps:$4 sm:$0xff]  }
 0x413   : > { %2586 = vmatprep.subr.bf16.mxu1 %v7434_v24  ;;  %v7519_v24 = vld [vmem:[%s9113_s4 + $0x3f4] ss:$8 sps:$4 sm:$0xff]  }
 0x416   : > { %2587 = vmatpush1.bf16.msra.mxu1 %v7432_v27  ;;  %v7517_v27 = vld [vmem:[%s9113_s4 + $0x3f0] ss:$8 sps:$4 sm:$0xff]  }
 0x417   : > { %2588 = vmatprep.subr.bf16.mxu1 %v7437_v28 }
 0x41a   : > { %2589 = vmatpush1.bf16.msra.mxu1 %v7435_v29 }
 0x41b   : > { %2590 = vmatprep.subr.bf16.mxu1 %v7440_v31 }
 0x41e   : > { %2591 = vmatpush1.bf16.msra.mxu1 %v7438_v32 }
 0x41f   : > { %2592 = vmatprep.subr.bf16.mxu1 %v7443_v35 }
 0x422   : > { %2593 = vmatpush1.bf16.msra.mxu1 %v7441_v36 }
 0x423   : > { %2594 = vmatprep.subr.bf16.mxu1 %v7446_v37  ;;  %v2925_v37 = vlaneseq }
 0x426   : > { %2595 = vmatpush1.bf16.msra.mxu1 %v7444_v38  ;;  %v2926_v38 = vshrl.u32 %v2925_v37, 7  ;;  %v7579_v37 = vld [vmem:[#allocation4 + $0x214] ss:$8 sps:$4 sm:$0xff]  }
 0x427   : > { %2596 = vmatprep.subr.bf16.mxu1 %v7449_v39 }
 0x428   : > { %v8968_v39 = vsub.s32 0, %v2926_v38 }
 0x42a   : > { %2597 = vmatpush1.bf16.msra.mxu1 %v7447_v41  ;;  %v2923_v41 = vld [vmem:[%s9120_s11] sm:$0x3] }
 0x42b   : > { %2598 = vmatprep.subr.bf16.mxu1 %v7452_v48  ;;  %v8973_v48 = vsub.s32 1, %v2926_v38  ;;  %v7577_v38 = vld [vmem:[#allocation4 + $0x210] ss:$8 sps:$4 sm:$0xff]  }
 0x42e   : > { %2599 = vmatpush1.bf16.msra.mxu1 %v7450_v51  ;;  %v2928_v51 = vrot.slane %v2923_v41, %v8968_v39 }
 0x42f   : > { %2600 = vmatprep.subr.bf16.mxu1 %v7455_v30  ;;  %v2932_v30 = vrot.slane %v2923_v41, %v8973_v48  ;;  %v7585_v41 = vld [vmem:[#allocation4 + $0x224] ss:$8 sps:$4 sm:$0xff]  }
 0x432   : > { %2601 = vmatpush1.bf16.msra.mxu1 %v7453_v33 }
 0x433   : > { %2602 = vmatprep.subr.bf16.mxu1 %v7458_v34 }
 0x436   : > { %2603 = vmatpush1.bf16.msra.mxu1 %v7456_v42 }
 0x437   : > { %2604 = vmatprep.subr.bf16.mxu1 %v7461_v46 }
 0x43a   : > { %2605 = vmatpush1.bf16.msra.mxu1 %v7459_v49 }
 0x43b   : > { %2606 = vmatprep.subr.bf16.mxu1 %v7464_v40 }
 0x43e   : > { %2607 = vmatpush1.bf16.msra.mxu1 %v7462_v45 }
 0x43f   : > { %2608 = vmatprep.subr.bf16.mxu1 %v7467_v53 }
 0x442   : > { %2609 = vmatpush1.bf16.msra.mxu1 %v7465_v54 }
 0x443   : > { %2610 = vmatprep.subr.bf16.mxu1 %v7470_v55 }
 0x446   : > { %2611 = vmatpush1.bf16.msra.mxu1 %v7468_v56 }
 0x447   : > { %2638 = vmatprep.subr.bf16.mxu1 %v8533_v44  ;;  %v7471_v44 = vld [vmem:[%s9112_s3 + $0x18] sm:$0xff]  }
 0x4dc   : > { %v2376_v57 = vpop.f32.mrb[36].mxu1 }
 0x4dd   : > { %v2378_v58 = vpop.f32.mrb[37].mxu1 }
 0x4de   : > { %v2380_v60 = vpop.f32.mrb[38].mxu1 }
 0x4df   : > { %v2385_v43 = vpack.c.bf16 %v2380_v60, %v2376_v57  ;;  %v2382_v47 = vpop.f32.mrb[39].mxu1 }
 0x4e0   : > { %v2386_v50 = vpack.c.bf16 %v2382_v47, %v2378_v58 }
 0x4e2   : > { %2612 = vmatprep.mubr.bf16.mxu1 %v2386_v50 }
 0x4e3   : > { %2613 = vmatmul.mubr.bf16.vlgmr.msra.gmra.mrb[32].mxu1 %v2385_v43 }
 0x4e4   : > { %2639 = vmatpush1.bf16.msra.mxu1 %v8531_v52  ;;  %2670 = vmatprep.mubr.bf16.mxu1 %v8112_v0  ;;  %v7477_v52 = vld [vmem:[%s9113_s4 + $0x314] ss:$8 sps:$4 sm:$0xff]  }
 0x4e5   : > { %2640 = vmatprep.subr.bf16.mxu1 %v8539_v1  ;;  %v7475_v1 = vld [vmem:[%s9113_s4 + $0x310] ss:$8 sps:$4 sm:$0xff]  }
 0x4e8   : > { %2641 = vmatpush1.bf16.msra.mxu1 %v8537_v61  ;;  %v7480_v61 = vld [vmem:[%s9113_s4 + $0x324] ss:$8 sps:$4 sm:$0xff]  }
 0x4e9   : > { %2876 = vmatprep.subr.bf16.mxu1 %v7474_v62 }
 0x4eb   : > { %6565 = vmatmul.mubr.msk.bf16.vlgmr.msra.gmra.mrb[40].mxu1 %vm1755_vm9, %v7471_v44  ;;  %v2953_v44 = vld [vmem:[%s9114_s5] sm:$0xf] }
 0x4ec   : > { %2877 = vmatpush1.bf16.msra.mxu1 %v7472_v59  ;;  %v6697_v59 = vld [vmem:[%s9114_s5 + $0x8] sm:$0xf] }
 0x4ed   : > { %2878 = vmatprep.subr.bf16.mxu1 %v7477_v52  ;;  %v7522_v52 = vld [vmem:[#allocation4 + $0x104] ss:$8 sps:$4 sm:$0xff]  }
 0x4f0   : > { %2879 = vmatpush1.bf16.msra.mxu1 %v7475_v1  ;;  %v6631_v1 = vld [vmem:[%s9114_s5 + $0x4] sm:$0xf] }
 0x4f1   : > { %2880 = vmatprep.subr.bf16.mxu1 %v7480_v61  ;;  %v7520_v61 = vld [vmem:[#allocation4 + $0x100] ss:$8 sps:$4 sm:$0xff]  }
 0x4f4   : > { %2881 = vmatpush1.bf16.msra.mxu1 %v7478_v63  ;;  %v7525_v63 = vld [vmem:[#allocation4 + $0x114] ss:$8 sps:$4 sm:$0xff]  }
 0x4f5   : > { %2882 = vmatprep.subr.bf16.mxu1 %v7483_v2  ;;  %v7523_v2 = vld [vmem:[#allocation4 + $0x110] ss:$8 sps:$4 sm:$0xff]  }
 0x4f8   : > { %2883 = vmatpush1.bf16.msra.mxu1 %v7481_v3  ;;  %v7528_v3 = vld [vmem:[#allocation4 + $0x124] ss:$8 sps:$4 sm:$0xff]  }
 0x4f9   : > { %2884 = vmatprep.subr.bf16.mxu1 %v7486_v4  ;;  %v7526_v4 = vld [vmem:[#allocation4 + $0x120] ss:$8 sps:$4 sm:$0xff]  }
 0x4fc   : > { %2885 = vmatpush1.bf16.msra.mxu1 %v7484_v5  ;;  %v7531_v5 = vld [vmem:[#allocation4 + $0x134] ss:$8 sps:$4 sm:$0xff]  }
 0x4fd   : > { %2886 = vmatprep.subr.bf16.mxu1 %v7489_v6  ;;  %v7529_v6 = vld [vmem:[#allocation4 + $0x130] ss:$8 sps:$4 sm:$0xff]  }
 0x500   : > { %2887 = vmatpush1.bf16.msra.mxu1 %v7487_v7  ;;  %v7534_v7 = vld [vmem:[#allocation4 + $0x144] ss:$8 sps:$4 sm:$0xff]  }
 0x501   : > { %2888 = vmatprep.subr.bf16.mxu1 %v7492_v8  ;;  %v7532_v8 = vld [vmem:[#allocation4 + $0x140] ss:$8 sps:$4 sm:$0xff]  }
 0x504   : > { %2889 = vmatpush1.bf16.msra.mxu1 %v7490_v9  ;;  %v7537_v9 = vld [vmem:[#allocation4 + $0x154] ss:$8 sps:$4 sm:$0xff]  }
 0x505   : > { %2890 = vmatprep.subr.bf16.mxu1 %v7495_v10  ;;  %v7535_v10 = vld [vmem:[#allocation4 + $0x150] ss:$8 sps:$4 sm:$0xff]  }
 0x508   : > { %2891 = vmatpush1.bf16.msra.mxu1 %v7493_v12  ;;  %v7540_v12 = vld [vmem:[#allocation4 + $0x164] ss:$8 sps:$4 sm:$0xff]  }
 0x509   : > { %2892 = vmatprep.subr.bf16.mxu1 %v7498_v13  ;;  %v7538_v13 = vld [vmem:[#allocation4 + $0x160] ss:$8 sps:$4 sm:$0xff]  }
 0x50c   : > { %2893 = vmatpush1.bf16.msra.mxu1 %v7496_v15  ;;  %v7543_v15 = vld [vmem:[#allocation4 + $0x174] ss:$8 sps:$4 sm:$0xff]  }
 0x50d   : > { %2894 = vmatprep.subr.bf16.mxu1 %v7501_v17  ;;  %v7541_v17 = vld [vmem:[#allocation4 + $0x170] ss:$8 sps:$4 sm:$0xff]  }
 0x510   : > { %2895 = vmatpush1.bf16.msra.mxu1 %v7499_v18  ;;  %v7546_v18 = vld [vmem:[#allocation4 + $0x184] ss:$8 sps:$4 sm:$0xff]  }
 0x511   : > { %2896 = vmatprep.subr.bf16.mxu1 %v7504_v19  ;;  %v7544_v19 = vld [vmem:[#allocation4 + $0x180] ss:$8 sps:$4 sm:$0xff]  }
 0x514   : > { %2897 = vmatpush1.bf16.msra.mxu1 %v7502_v20  ;;  %v7549_v20 = vld [vmem:[#allocation4 + $0x194] ss:$8 sps:$4 sm:$0xff]  }
 0x515   : > { %2898 = vmatprep.subr.bf16.mxu1 %v7507_v11  ;;  %v7547_v11 = vld [vmem:[#allocation4 + $0x190] ss:$8 sps:$4 sm:$0xff]  }
 0x518   : > { %2899 = vmatpush1.bf16.msra.mxu1 %v7505_v14  ;;  %v7552_v14 = vld [vmem:[#allocation4 + $0x1a4] ss:$8 sps:$4 sm:$0xff]  }
 0x519   : > { %2900 = vmatprep.subr.bf16.mxu1 %v7510_v16  ;;  %v7550_v16 = vld [vmem:[#allocation4 + $0x1a0] ss:$8 sps:$4 sm:$0xff]  }
 0x51c   : > { %2901 = vmatpush1.bf16.msra.mxu1 %v7508_v22  ;;  %v7555_v22 = vld [vmem:[#allocation4 + $0x1b4] ss:$8 sps:$4 sm:$0xff]  }
 0x51d   : > { %2902 = vmatprep.subr.bf16.mxu1 %v7513_v25  ;;  %v7553_v25 = vld [vmem:[#allocation4 + $0x1b0] ss:$8 sps:$4 sm:$0xff]  }
 0x520   : > { %2903 = vmatpush1.bf16.msra.mxu1 %v7511_v26  ;;  %v7558_v26 = vld [vmem:[#allocation4 + $0x1c4] ss:$8 sps:$4 sm:$0xff]  }
 0x521   : > { %2904 = vmatprep.subr.bf16.mxu1 %v7516_v21  ;;  %v7556_v21 = vld [vmem:[#allocation4 + $0x1c0] ss:$8 sps:$4 sm:$0xff]  }
 0x524   : > { %2905 = vmatpush1.bf16.msra.mxu1 %v7514_v23  ;;  %v7561_v23 = vld [vmem:[#allocation4 + $0x1d4] ss:$8 sps:$4 sm:$0xff]  }
 0x525   : > { %2906 = vmatprep.subr.bf16.mxu1 %v7519_v24  ;;  %v7559_v24 = vld [vmem:[#allocation4 + $0x1d0] ss:$8 sps:$4 sm:$0xff]  }
 0x528   : > { %2907 = vmatpush1.bf16.msra.mxu1 %v7517_v27  ;;  %v7562_v27 = vld [vmem:[#allocation4 + $0x1e0] ss:$8 sps:$4 sm:$0xff]  }
 0x5be   : > { %v2672_v28 = vpop.f32.mrb[40].mxu1 }
 0x5bf   : > { %v2674_v29 = vpop.f32.mrb[41].mxu1 }
 0x5c0   : > { %v2676_v31 = vpop.f32.mrb[42].mxu1 }
 0x5c1   : > { %v2681_v32 = vpack.c.bf16 %v2676_v31, %v2672_v28  ;;  %v2678_v35 = vpop.f32.mrb[43].mxu1  ;;  %v7564_v28 = vld [vmem:[#allocation4 + $0x1e4] ss:$8 sps:$4 sm:$0xff]   ;;  %v7565_v31 = vld [vmem:[#allocation4 + $0x1f0] ss:$8 sps:$4 sm:$0xff]  }
 0x5c2   : > { %v2682_v36 = vpack.c.bf16 %v2678_v35, %v2674_v29  ;;  %v7567_v29 = vld [vmem:[#allocation4 + $0x1f4] ss:$8 sps:$4 sm:$0xff]   ;;  %v7573_v35 = vld [vmem:[#allocation4 + $0x204] ss:$8 sps:$4 sm:$0xff]  }
 0x5c4   : > { %2908 = vmatprep.mubr.bf16.mxu1 %v2682_v36  ;;  %v7571_v36 = vld [vmem:[#allocation4 + $0x200] ss:$8 sps:$4 sm:$0xff]  }
 0x5c5   : > { %2909 = vmatmul.mubr.bf16.vlgmr.msra.gmra.mrb[32].mxu1 %v2681_v32  ;;  %v7570_v32 = vld [vmem:[#allocation4 + $0x4] ss:$8 sps:$4 sm:$0xff]  }
 0x5c6   : > { %3553 = vmatprep.mubr.bf16.mxu1 %v8112_v0 }
 0x698   : > { %v2910_v33 = vpop.f32.mrb[32].mxu1 }
 0x699   : > { %v2935_v34 = vadd.f32 %v2928_v51, %v2910_v33  ;;  %v2912_v42 = vpop.f32.mrb[33].mxu1  ;;  %v7589_v33 = vld [vmem:[#allocation4 + $0x230] ss:$8 sps:$4 sm:$0xff]  }
 0x69a   : > { %v2936_v46 = vadd.f32 %v2932_v30, %v2912_v42  ;;  %v2914_v49 = vpop.f32.mrb[34].mxu1  ;;  %v7595_v42 = vld [vmem:[#allocation4 + $0x240] ss:$8 sps:$4 sm:$0xff]  }
 0x69b   : > { %v2943_v40 = vmul.f32 0.2, %v2935_v34  ;;  %v2937_v45 = vadd.f32 %v2928_v51, %v2914_v49  ;;  %v2916_v53 = vpop.f32.mrb[35].mxu1  ;;  %vm2939_vm10 = vcmp.gt.f32.partialorder %v2935_v34, 0.0  ;;  %v7583_v51 = vld [vmem:[#allocation4 + $0x220] ss:$8 sps:$4 sm:$0xff]  }
 0x69c   : > { %v2944_v54 = vmul.f32 0.2, %v2936_v46  ;;  %v2938_v55 = vadd.f32 %v2932_v30, %v2916_v53  ;;  %vm2940_vm11 = vcmp.gt.f32.partialorder %v2936_v46, 0.0  ;;  %v7591_v30 = vld [vmem:[#allocation4 + $0x234] ss:$8 sps:$4 sm:$0xff]  }
 0x69d   : > { %vm2941_vm12 = vcmp.gt.f32.partialorder %v2937_v45, 0.0  ;;  %v2945_v56 = vmul.f32 0.2, %v2937_v45  ;;  %v2947_v58 = vsel %vm2939_vm10, %v2935_v34, %v2943_v40  ;;  %v7597_v34 = vld [vmem:[#allocation4 + $0x244] ss:$8 sps:$4 sm:$0xff]  }
 0x69e   : > { %vm2942_vm13 = vcmp.gt.f32.partialorder %v2938_v55, 0.0  ;;  %v2946_v57 = vmul.f32 0.2, %v2938_v55  ;;  %v2948_v43 = vsel %vm2940_vm11, %v2936_v46, %v2944_v54  ;;  %v7603_v46 = vld [vmem:[#allocation4 + $0x254] ss:$8 sps:$4 sm:$0xff]  }
 0x69f   : > { %v2949_v60 = vsel %vm2941_vm12, %v2937_v45, %v2945_v56  ;;  %v7601_v49 = vld [vmem:[#allocation4 + $0x250] ss:$8 sps:$4 sm:$0xff]   ;;  %v7609_v40 = vld [vmem:[#allocation4 + $0x264] ss:$8 sps:$4 sm:$0xff]   ;;  %v7607_v45 = vld [vmem:[#allocation4 + $0x260] ss:$8 sps:$4 sm:$0xff]  }
 0x6a0   : > { %v8977_v47 = vpack.c.bf16 %v2949_v60, %v2947_v58  ;;  %v2950_v50 = vsel %vm2942_vm13, %v2938_v55, %v2946_v57  ;;  %v7615_v53 = vld [vmem:[#allocation4 + $0x274] ss:$8 sps:$4 sm:$0xff]   ;;  %v7613_v54 = vld [vmem:[#allocation4 + $0x270] ss:$8 sps:$4 sm:$0xff]   ;;  %v7621_v55 = vld [vmem:[#allocation4 + $0x284] ss:$8 sps:$4 sm:$0xff]  }
 0x6a1   : > { %v8979_v62 = vpack.c.bf16 %v2950_v50, %v2948_v43  ;;  %v7619_v56 = vld [vmem:[#allocation4 + $0x280] ss:$8 sps:$4 sm:$0xff]   ;;  %v7627_v57 = vld [vmem:[#allocation4 + $0x294] ss:$8 sps:$4 sm:$0xff]   ;;  %v7625_v58 = vld [vmem:[#allocation4 + $0x290] ss:$8 sps:$4 sm:$0xff]  }
 0x6a2   : > { %v7633_v60 = vld [vmem:[#allocation4 + $0x2a4] ss:$8 sps:$4 sm:$0xff]   ;;  %v7631_v43 = vld [vmem:[#allocation4 + $0x2a0] ss:$8 sps:$4 sm:$0xff]   ;;  %v7639_v50 = vld [vmem:[#allocation4 + $0x2b4] ss:$8 sps:$4 sm:$0xff]  }
 0x6a3   : > { %2958 = vmatprep.subr.bf16.mxu0 %v8979_v62  ;;  %3521 = vmatprep.subr.bf16.mxu1 %v8979_v62 }
 0x6a4   : > { %2959 = vmatpush1.bf16.msra.mxu0 %v8977_v47  ;;  %3522 = vmatpush1.bf16.msra.mxu1 %v8977_v47 }
 0x6a5   : > { %3038 = vmatprep.subr.bf16.mxu0 %v8979_v62  ;;  %3757 = vmatprep.subr.bf16.mxu1 %v7573_v35  ;;  %v7598_v35 = vld [vmem:[#allocation4 + $0x50] ss:$8 sps:$4 sm:$0xff]  }
 0x6a7   : > { %6630 = vmatmul.mubr.msk.bf16.vlgmr.msra.gmra.mrb[16].mxu0 %vm2954_vm14, %v2953_v44  ;;  %6698 = vmatmul.mubr.msk.bf16.vlgmr.msra.gmra.mrb[44].mxu1 %vm2954_vm14, %v6697_v59  ;;  %v7637_v44 = vld [vmem:[#allocation4 + $0x2b0] ss:$8 sps:$4 sm:$0xff]   ;;  %v7645_v59 = vld [vmem:[#allocation4 + $0x2c4] ss:$8 sps:$4 sm:$0xff]  }
 0x6a8   : > { %3039 = vmatpush1.bf16.msra.mxu0 %v8977_v47  ;;  %3070 = vmatprep.mubr.bf16.mxu0 %v8112_v0 }
 0x6a9   : > { %3274 = vmatprep.subr.bf16.mxu0 %v7522_v52  ;;  %3758 = vmatpush1.bf16.msra.mxu1 %v7571_v36  ;;  %v7643_v52 = vld [vmem:[#allocation4 + $0x2c0] ss:$8 sps:$4 sm:$0xff]   ;;  %v7606_v36 = vld [vmem:[#allocation4 + $0x64] ss:$8 sps:$4 sm:$0xff]  }
 0x6aa   : > { %3759 = vmatprep.subr.bf16.mxu1 %v7579_v37  ;;  %v7604_v37 = vld [vmem:[#allocation4 + $0x60] ss:$8 sps:$4 sm:$0xff]  }
 0x6ad   : > { %3760 = vmatpush1.bf16.msra.mxu1 %v7577_v38  ;;  %v7612_v38 = vld [vmem:[#allocation4 + $0x74] ss:$8 sps:$4 sm:$0xff]  }
 0x6ae   : > { %3761 = vmatprep.subr.bf16.mxu1 %v7585_v41  ;;  %v7610_v41 = vld [vmem:[#allocation4 + $0x70] ss:$8 sps:$4 sm:$0xff]  }
 0x6af   : > { %6632 = vmatmul.mubr.msk.bf16.vlgmr.msra.gmra.mrb[20].mxu0 %vm2954_vm14, %v6631_v1  ;;  %v7651_v1 = vld [vmem:[#allocation4 + $0x2d4] ss:$8 sps:$4 sm:$0xff]  }
 0x6b0   : > { %3275 = vmatpush1.bf16.msra.mxu0 %v7520_v61  ;;  %v7649_v61 = vld [vmem:[#allocation4 + $0x2d0] ss:$8 sps:$4 sm:$0xff]  }
 0x6b1   : > { %3276 = vmatprep.subr.bf16.mxu0 %v7525_v63  ;;  %3762 = vmatpush1.bf16.msra.mxu1 %v7583_v51  ;;  %v7657_v63 = vld [vmem:[#allocation4 + $0x2e4] ss:$8 sps:$4 sm:$0xff]  }
 0x6b2   : > { %3763 = vmatprep.subr.bf16.mxu1 %v7591_v30  ;;  %v7618_v51 = vld [vmem:[#allocation4 + $0x84] ss:$8 sps:$4 sm:$0xff]   ;;  %v7616_v30 = vld [vmem:[#allocation4 + $0x80] ss:$8 sps:$4 sm:$0xff]  }
 0x6b4   : > { %3277 = vmatpush1.bf16.msra.mxu0 %v7523_v2  ;;  %v7655_v2 = vld [vmem:[#allocation4 + $0x2e0] ss:$8 sps:$4 sm:$0xff]  }
 0x6b5   : > { %3278 = vmatprep.subr.bf16.mxu0 %v7528_v3  ;;  %3764 = vmatpush1.bf16.msra.mxu1 %v7589_v33  ;;  %v7663_v3 = vld [vmem:[#allocation4 + $0x2f4] ss:$8 sps:$4 sm:$0xff]  }
 0x6b6   : > { %3765 = vmatprep.subr.bf16.mxu1 %v7597_v34  ;;  %v7624_v33 = vld [vmem:[#allocation4 + $0x94] ss:$8 sps:$4 sm:$0xff]   ;;  %v7622_v34 = vld [vmem:[#allocation4 + $0x90] ss:$8 sps:$4 sm:$0xff]  }
 0x6b8   : > { %3279 = vmatpush1.bf16.msra.mxu0 %v7526_v4  ;;  %v7661_v4 = vld [vmem:[#allocation4 + $0x2f0] ss:$8 sps:$4 sm:$0xff]  }
 0x6b9   : > { %3280 = vmatprep.subr.bf16.mxu0 %v7531_v5  ;;  %3766 = vmatpush1.bf16.msra.mxu1 %v7595_v42  ;;  %v7630_v42 = vld [vmem:[#allocation4 + $0xa4] ss:$8 sps:$4 sm:$0xff]  }
 0x6ba   : > { %3767 = vmatprep.subr.bf16.mxu1 %v7603_v46  ;;  %v7628_v46 = vld [vmem:[#allocation4 + $0xa0] ss:$8 sps:$4 sm:$0xff]  }
 0x6bc   : > { %3281 = vmatpush1.bf16.msra.mxu0 %v7529_v6 }
 0x6bd   : > { %3282 = vmatprep.subr.bf16.mxu0 %v7534_v7  ;;  %3768 = vmatpush1.bf16.msra.mxu1 %v7601_v49  ;;  %v7636_v49 = vld [vmem:[#allocation4 + $0xb4] ss:$8 sps:$4 sm:$0xff]  }
 0x6be   : > { %3769 = vmatprep.subr.bf16.mxu1 %v7609_v40  ;;  %v7634_v40 = vld [vmem:[#allocation4 + $0xb0] ss:$8 sps:$4 sm:$0xff]  }
 0x6c0   : > { %3283 = vmatpush1.bf16.msra.mxu0 %v7532_v8 }
 0x6c1   : > { %3284 = vmatprep.subr.bf16.mxu0 %v7537_v9  ;;  %3770 = vmatpush1.bf16.msra.mxu1 %v7607_v45  ;;  %v7642_v45 = vld [vmem:[#allocation4 + $0xc4] ss:$8 sps:$4 sm:$0xff]  }
 0x6c2   : > { %3771 = vmatprep.subr.bf16.mxu1 %v7615_v53  ;;  %v7640_v53 = vld [vmem:[#allocation4 + $0xc0] ss:$8 sps:$4 sm:$0xff]  }
 0x6c4   : > { %3285 = vmatpush1.bf16.msra.mxu0 %v7535_v10 }
 0x6c5   : > { %3286 = vmatprep.subr.bf16.mxu0 %v7540_v12  ;;  %3772 = vmatpush1.bf16.msra.mxu1 %v7613_v54  ;;  %v7648_v54 = vld [vmem:[#allocation4 + $0xd4] ss:$8 sps:$4 sm:$0xff]  }
 0x6c6   : > { %3773 = vmatprep.subr.bf16.mxu1 %v7621_v55  ;;  %v7646_v55 = vld [vmem:[#allocation4 + $0xd0] ss:$8 sps:$4 sm:$0xff]  }
 0x6c8   : > { %3287 = vmatpush1.bf16.msra.mxu0 %v7538_v13 }
 0x6c9   : > { %3288 = vmatprep.subr.bf16.mxu0 %v7543_v15  ;;  %3774 = vmatpush1.bf16.msra.mxu1 %v7619_v56  ;;  %v7654_v56 = vld [vmem:[#allocation4 + $0xe4] ss:$8 sps:$4 sm:$0xff]  }
 0x6ca   : > { %3775 = vmatprep.subr.bf16.mxu1 %v7627_v57  ;;  %v7652_v57 = vld [vmem:[#allocation4 + $0xe0] ss:$8 sps:$4 sm:$0xff]  }
 0x6cc   : > { %3289 = vmatpush1.bf16.msra.mxu0 %v7541_v17 }
 0x6cd   : > { %3290 = vmatprep.subr.bf16.mxu0 %v7546_v18  ;;  %3776 = vmatpush1.bf16.msra.mxu1 %v7625_v58  ;;  %v7660_v58 = vld [vmem:[#allocation4 + $0xf4] ss:$8 sps:$4 sm:$0xff]  }
 0x6ce   : > { %3777 = vmatprep.subr.bf16.mxu1 %v7633_v60  ;;  %v7658_v60 = vld [vmem:[#allocation4 + $0xf0] ss:$8 sps:$4 sm:$0xff]  }
 0x6d0   : > { %3291 = vmatpush1.bf16.msra.mxu0 %v7544_v19 }
 0x6d1   : > { %3292 = vmatprep.subr.bf16.mxu0 %v7549_v20  ;;  %3778 = vmatpush1.bf16.msra.mxu1 %v7631_v43 }
 0x6d2   : > { %3779 = vmatprep.subr.bf16.mxu1 %v7639_v50  ;;  %v6731_v50 = vld [vmem:[%s9114_s5 + $0xc] sm:$0xf] }
 0x6d4   : > { %3293 = vmatpush1.bf16.msra.mxu0 %v7547_v11  ;;  %v7568_v11 = vld [vmem:[#allocation4] ss:$8 sps:$4 sm:$0xff]  }
 0x6d5   : > { %3294 = vmatprep.subr.bf16.mxu0 %v7552_v14  ;;  %3780 = vmatpush1.bf16.msra.mxu1 %v7637_v44  ;;  %v7664_v44 = vld [vmem:[#allocation4 + $0x300] ss:$8 sps:$4 sm:$0xff]  }
 0x6d6   : > { %3781 = vmatprep.subr.bf16.mxu1 %v7645_v59  ;;  %v7666_v59 = vld [vmem:[#allocation4 + $0x304] ss:$8 sps:$4 sm:$0xff]  }
 0x6d8   : > { %3295 = vmatpush1.bf16.msra.mxu0 %v7550_v16 }
 0x6d9   : > { %3296 = vmatprep.subr.bf16.mxu0 %v7555_v22  ;;  %3782 = vmatpush1.bf16.msra.mxu1 %v7643_v52  ;;  %v7669_v52 = vld [vmem:[#allocation4 + $0x314] ss:$8 sps:$4 sm:$0xff]  }
 0x6da   : > { %3783 = vmatprep.subr.bf16.mxu1 %v7651_v1  ;;  %v7667_v1 = vld [vmem:[#allocation4 + $0x310] ss:$8 sps:$4 sm:$0xff]  }
 0x6dc   : > { %3297 = vmatpush1.bf16.msra.mxu0 %v7553_v25  ;;  %v7576_v25 = vld [vmem:[#allocation4 + $0x14] ss:$8 sps:$4 sm:$0xff]  }
 0x6dd   : > { %3298 = vmatprep.subr.bf16.mxu0 %v7558_v26  ;;  %3784 = vmatpush1.bf16.msra.mxu1 %v7649_v61  ;;  %v7672_v61 = vld [vmem:[#allocation4 + $0x324] ss:$8 sps:$4 sm:$0xff]  }
 0x6de   : > { %3785 = vmatprep.subr.bf16.mxu1 %v7657_v63  ;;  %v7673_v63 = vld [vmem:[#allocation4 + $0x330] ss:$8 sps:$4 sm:$0xff]  }
 0x6e0   : > { %3299 = vmatpush1.bf16.msra.mxu0 %v7556_v21  ;;  %v7574_v21 = vld [vmem:[#allocation4 + $0x10] ss:$8 sps:$4 sm:$0xff]  }
 0x6e1   : > { %3300 = vmatprep.subr.bf16.mxu0 %v7561_v23  ;;  %3786 = vmatpush1.bf16.msra.mxu1 %v7655_v2  ;;  %v7582_v23 = vld [vmem:[#allocation4 + $0x24] ss:$8 sps:$4 sm:$0xff]  }
 0x6e2   : > { %3787 = vmatprep.subr.bf16.mxu1 %v7663_v3  ;;  %v7678_v2 = vld [vmem:[#allocation4 + $0x344] ss:$8 sps:$4 sm:$0xff]   ;;  %v7676_v3 = vld [vmem:[#allocation4 + $0x340] ss:$8 sps:$4 sm:$0xff]  }
 0x6e4   : > { %3301 = vmatpush1.bf16.msra.mxu0 %v7559_v24  ;;  %v7580_v24 = vld [vmem:[#allocation4 + $0x20] ss:$8 sps:$4 sm:$0xff]  }
 0x6e5   : > { %3302 = vmatprep.subr.bf16.mxu0 %v7564_v28  ;;  %3788 = vmatpush1.bf16.msra.mxu1 %v7661_v4  ;;  %v7586_v28 = vld [vmem:[#allocation4 + $0x30] ss:$8 sps:$4 sm:$0xff]   ;;  %v7681_v4 = vld [vmem:[#allocation4 + $0x354] ss:$8 sps:$4 sm:$0xff]  }
 0x6e8   : > { %3303 = vmatpush1.bf16.msra.mxu0 %v7562_v27  ;;  %v7588_v27 = vld [vmem:[#allocation4 + $0x34] ss:$8 sps:$4 sm:$0xff]  }
 0x6e9   : > { %3304 = vmatprep.subr.bf16.mxu0 %v7567_v29  ;;  %v7594_v29 = vld [vmem:[#allocation4 + $0x44] ss:$8 sps:$4 sm:$0xff]  }
 0x6ec   : > { %3305 = vmatpush1.bf16.msra.mxu0 %v7565_v31  ;;  %v7592_v31 = vld [vmem:[#allocation4 + $0x40] ss:$8 sps:$4 sm:$0xff]  }
 0x6ed   : > { %3475 = vmatprep.subr.bf16.mxu0 %v7570_v32  ;;  %v7600_v32 = vld [vmem:[#allocation4 + $0x54] ss:$8 sps:$4 sm:$0xff]  }
 0x77a   : > { %v9000_v5 = vpop.f32.mrb[16].mxu0  ;;  %v3555_v6 = vpop.f32.mrb[44].mxu1 }
 0x77b   : > { %v2994_v7 = vpop.f32.mrb[17].mxu0  ;;  %v3562_v8 = vpack.c.bf16 %v3555_v6, %v3555_v6  ;;  %v3557_v9 = vpop.f32.mrb[45].mxu1  ;;  %v2999_v43 = vpack.c.bf16 %v9000_v5, %v9000_v5  ;;  %v7679_v5 = vld [vmem:[#allocation4 + $0x350] ss:$8 sps:$4 sm:$0xff]   ;;  %v7684_v6 = vld [vmem:[#allocation4 + $0x364] ss:$8 sps:$4 sm:$0xff]  }
 0x77c   : > { %v2996_v10 = vpop.f32.mrb[18].mxu0  ;;  %v3563_v12 = vpack.c.bf16 %v3557_v9, %v3557_v9  ;;  %v3559_v13 = vpop.f32.mrb[46].mxu1  ;;  %v3000_v26 = vpack.c.bf16 %v2994_v7, %v2994_v7  ;;  %v7682_v7 = vld [vmem:[#allocation4 + $0x360] ss:$8 sps:$4 sm:$0xff]   ;;  %v7685_v9 = vld [vmem:[#allocation4 + $0x370] ss:$8 sps:$4 sm:$0xff]  }
 0x77d   : > { %v2997_v15 = vpop.f32.mrb[19].mxu0  ;;  %v3560_v17 = vpop.f32.mrb[47].mxu1  ;;  %v7690_v10 = vld [vmem:[#allocation4 + $0x384] ss:$8 sps:$4 sm:$0xff]   ;;  %v7693_v13 = vld [vmem:[#allocation4 + $0x394] ss:$8 sps:$4 sm:$0xff]  }
 0x77e   : > { %3789 = vmatprep.mubr.bf16.mxu1 %v3563_v12  ;;  %v7688_v12 = vld [vmem:[#allocation4 + $0x380] ss:$8 sps:$4 sm:$0xff]   ;;  %v7691_v15 = vld [vmem:[#allocation4 + $0x390] ss:$8 sps:$4 sm:$0xff]   ;;  %v7696_v17 = vld [vmem:[#allocation4 + $0x3a4] ss:$8 sps:$4 sm:$0xff]  }
 0x77f   : > { %3790 = vmatmul.mubr.bf16.vlgmr.msra.gmra.mrb[48].mxu1 %v3562_v8  ;;  %v7687_v8 = vld [vmem:[#allocation4 + $0x374] ss:$8 sps:$4 sm:$0xff]  }
 0x780   : > { %4150 = vmatprep.mubr.bf16.mxu1 %v8112_v0 }
 0x782   : > { %v3072_v18 = vpop.f32.mrb[20].mxu0 }
 0x783   : > { %v3074_v19 = vpop.f32.mrb[21].mxu0  ;;  %v3079_v16 = vpack.c.bf16 %v3072_v18, %v3072_v18  ;;  %v7694_v18 = vld [vmem:[#allocation4 + $0x3a0] ss:$8 sps:$4 sm:$0xff]  }
 0x784   : > { %v3080_v20 = vpack.c.bf16 %v3074_v19, %v3074_v19  ;;  %v3076_v14 = vpop.f32.mrb[22].mxu0  ;;  %v7699_v19 = vld [vmem:[#allocation4 + $0x3b4] ss:$8 sps:$4 sm:$0xff]  }
 0x785   : > { %v3077_v22 = vpop.f32.mrb[23].mxu0  ;;  %v7700_v14 = vld [vmem:[#allocation4 + $0x3c0] ss:$8 sps:$4 sm:$0xff]  }
 0x786   : > { %3306 = vmatprep.mubr.bf16.mxu0 %v3080_v20  ;;  %v7697_v20 = vld [vmem:[#allocation4 + $0x3b0] ss:$8 sps:$4 sm:$0xff]  }
 0x787   : > { %3307 = vmatmul.mubr.bf16.vlgmr.msra.gmra.mrb[24].mxu0 %v3079_v16  ;;  %v7705_v16 = vld [vmem:[#allocation4 + $0x3d4] ss:$8 sps:$4 sm:$0xff]   ;;  %v7703_v22 = vld [vmem:[#allocation4 + $0x3d0] ss:$8 sps:$4 sm:$0xff]  }
 0x788   : > { %3476 = vmatpush1.bf16.msra.mxu0 %v7568_v11  ;;  %3507 = vmatprep.mubr.bf16.mxu0 %v3000_v26  ;;  %v7702_v11 = vld [vmem:[#allocation4 + $0x3c4] ss:$8 sps:$4 sm:$0xff]   ;;  %v7706_v26 = vld [vmem:[#allocation4 + $0x3e0] ss:$8 sps:$4 sm:$0xff]  }
 0x789   : > { %3477 = vmatprep.subr.bf16.mxu0 %v7576_v25  ;;  %v7708_v25 = vld [vmem:[#allocation4 + $0x3e4] ss:$8 sps:$4 sm:$0xff]  }
 0x78c   : > { %3478 = vmatpush1.bf16.msra.mxu0 %v7574_v21  ;;  %v7711_v21 = vld [vmem:[#allocation4 + $0x3f4] ss:$8 sps:$4 sm:$0xff]  }
 0x78d   : > { %3479 = vmatprep.subr.bf16.mxu0 %v7582_v23  ;;  %v7709_v23 = vld [vmem:[#allocation4 + $0x3f0] ss:$8 sps:$4 sm:$0xff]  }
 0x790   : > { %3480 = vmatpush1.bf16.msra.mxu0 %v7580_v24  ;;  %v7714_v24 = vld [vmem:[#allocation6 + $0x4] ss:$8 sps:$4 sm:$0xff]  }
 0x791   : > { %3481 = vmatprep.subr.bf16.mxu0 %v7588_v27 }
 0x794   : > { %3482 = vmatpush1.bf16.msra.mxu0 %v7586_v28 }
 0x795   : > { %3483 = vmatprep.subr.bf16.mxu0 %v7594_v29 }
 0x798   : > { %3484 = vmatpush1.bf16.msra.mxu0 %v7592_v31 }
 0x799   : > { %3485 = vmatprep.subr.bf16.mxu0 %v7600_v32 }
 0x79c   : > { %3486 = vmatpush1.bf16.msra.mxu0 %v7598_v35 }
 0x79d   : > { %3487 = vmatprep.subr.bf16.mxu0 %v7606_v36 }
 0x7a0   : > { %3488 = vmatpush1.bf16.msra.mxu0 %v7604_v37 }
 0x7a1   : > { %3489 = vmatprep.subr.bf16.mxu0 %v7612_v38 }
 0x7a4   : > { %3490 = vmatpush1.bf16.msra.mxu0 %v7610_v41 }
 0x7a5   : > { %3491 = vmatprep.subr.bf16.mxu0 %v7618_v51 }
 0x7a8   : > { %3492 = vmatpush1.bf16.msra.mxu0 %v7616_v30 }
 0x7a9   : > { %3493 = vmatprep.subr.bf16.mxu0 %v7624_v33 }
 0x7ac   : > { %3494 = vmatpush1.bf16.msra.mxu0 %v7622_v34 }
 0x7ad   : > { %3495 = vmatprep.subr.bf16.mxu0 %v7630_v42 }
 0x7b0   : > { %3496 = vmatpush1.bf16.msra.mxu0 %v7628_v46 }
 0x7b1   : > { %3497 = vmatprep.subr.bf16.mxu0 %v7636_v49 }
 0x7b4   : > { %3498 = vmatpush1.bf16.msra.mxu0 %v7634_v40 }
 0x7b5   : > { %3499 = vmatprep.subr.bf16.mxu0 %v7642_v45 }
 0x7b8   : > { %3500 = vmatpush1.bf16.msra.mxu0 %v7640_v53 }
 0x7b9   : > { %3501 = vmatprep.subr.bf16.mxu0 %v7648_v54  ;;  %v7712_v54 = vld [vmem:[#allocation6] ss:$8 sps:$4 sm:$0xff]  }
 0x7bc   : > { %3502 = vmatpush1.bf16.msra.mxu0 %v7646_v55 }
 0x7bd   : > { %3503 = vmatprep.subr.bf16.mxu0 %v7654_v56 }
 0x7c0   : > { %3504 = vmatpush1.bf16.msra.mxu0 %v7652_v57  ;;  %v7717_v57 = vld [vmem:[#allocation6 + $0x14] ss:$8 sps:$4 sm:$0xff]  }
 0x7c1   : > { %3505 = vmatprep.subr.bf16.mxu0 %v7660_v58  ;;  %v7715_v58 = vld [vmem:[#allocation6 + $0x10] ss:$8 sps:$4 sm:$0xff]  }
 0x7c4   : > { %3506 = vmatpush1.bf16.msra.mxu0 %v7658_v60  ;;  %v7720_v60 = vld [vmem:[#allocation6 + $0x24] ss:$8 sps:$4 sm:$0xff]  }
 0x7c5   : > { %3805 = vmatprep.subr.bf16.mxu0 %v8979_v62  ;;  %v7670_v62 = vld [vmem:[#allocation4 + $0x320] ss:$8 sps:$4 sm:$0xff]  }
 0x7c7   : > { %3508 = vmatmul.mubr.bf16.vlgmr.msra.gmra.mrb[28].mxu0 %v2999_v43  ;;  %v7718_v43 = vld [vmem:[#allocation6 + $0x20] ss:$8 sps:$4 sm:$0xff]  }
 0x7c8   : > { %3806 = vmatpush1.bf16.msra.mxu0 %v8977_v47  ;;  %3837 = vmatprep.mubr.bf16.mxu0 %v8112_v0  ;;  %v7675_v47 = vld [vmem:[#allocation4 + $0x334] ss:$8 sps:$4 sm:$0xff]  }
 0x7c9   : > { %4041 = vmatprep.subr.bf16.mxu0 %v7666_v59  ;;  %v7726_v59 = vld [vmem:[#allocation6 + $0x44] ss:$8 sps:$4 sm:$0xff]  }
 0x7cf   : > { %6732 = vmatmul.mubr.msk.bf16.vlgmr.msra.gmra.mrb[32].mxu0 %vm2954_vm14, %v6731_v50  ;;  %v7723_v50 = vld [vmem:[#allocation6 + $0x34] ss:$8 sps:$4 sm:$0xff]  }
 0x7d0   : > { %4042 = vmatpush1.bf16.msra.mxu0 %v7664_v44  ;;  %v7721_v44 = vld [vmem:[#allocation6 + $0x30] ss:$8 sps:$4 sm:$0xff]  }
 0x7d1   : > { %4043 = vmatprep.subr.bf16.mxu0 %v7669_v52  ;;  %v7724_v52 = vld [vmem:[#allocation6 + $0x40] ss:$8 sps:$4 sm:$0xff]  }
 0x7d4   : > { %4044 = vmatpush1.bf16.msra.mxu0 %v7667_v1  ;;  %v7729_v1 = vld [vmem:[#allocation6 + $0x54] ss:$8 sps:$4 sm:$0xff]  }
 0x7d5   : > { %4045 = vmatprep.subr.bf16.mxu0 %v7672_v61  ;;  %v7727_v61 = vld [vmem:[#allocation6 + $0x50] ss:$8 sps:$4 sm:$0xff]  }
 0x7d8   : > { %4046 = vmatpush1.bf16.msra.mxu0 %v7670_v62  ;;  %v7732_v62 = vld [vmem:[#allocation6 + $0x64] ss:$8 sps:$4 sm:$0xff]  }
 0x7d9   : > { %4047 = vmatprep.subr.bf16.mxu0 %v7675_v47  ;;  %v7730_v47 = vld [vmem:[#allocation6 + $0x60] ss:$8 sps:$4 sm:$0xff]  }
 0x7dc   : > { %4048 = vmatpush1.bf16.msra.mxu0 %v7673_v63  ;;  %v7735_v63 = vld [vmem:[#allocation6 + $0x74] ss:$8 sps:$4 sm:$0xff]  }
 0x7dd   : > { %4049 = vmatprep.subr.bf16.mxu0 %v7678_v2  ;;  %v7733_v2 = vld [vmem:[#allocation6 + $0x70] ss:$8 sps:$4 sm:$0xff]  }
 0x7e0   : > { %4050 = vmatpush1.bf16.msra.mxu0 %v7676_v3  ;;  %v7738_v3 = vld [vmem:[#allocation6 + $0x84] ss:$8 sps:$4 sm:$0xff]  }
 0x7e1   : > { %4051 = vmatprep.subr.bf16.mxu0 %v7681_v4  ;;  %v7736_v4 = vld [vmem:[#allocation6 + $0x80] ss:$8 sps:$4 sm:$0xff]  }
 0x7e4   : > { %4052 = vmatpush1.bf16.msra.mxu0 %v7679_v5  ;;  %v7741_v5 = vld [vmem:[#allocation6 + $0x94] ss:$8 sps:$4 sm:$0xff]  }
 0x7e5   : > { %4053 = vmatprep.subr.bf16.mxu0 %v7684_v6  ;;  %v7739_v6 = vld [vmem:[#allocation6 + $0x90] ss:$8 sps:$4 sm:$0xff]  }
 0x7e8   : > { %4054 = vmatpush1.bf16.msra.mxu0 %v7682_v7  ;;  %v7744_v7 = vld [vmem:[#allocation6 + $0xa4] ss:$8 sps:$4 sm:$0xff]  }
 0x7e9   : > { %4055 = vmatprep.subr.bf16.mxu0 %v7687_v8  ;;  %v7742_v8 = vld [vmem:[#allocation6 + $0xa0] ss:$8 sps:$4 sm:$0xff]  }
 0x7ec   : > { %4056 = vmatpush1.bf16.msra.mxu0 %v7685_v9  ;;  %v7747_v9 = vld [vmem:[#allocation6 + $0xb4] ss:$8 sps:$4 sm:$0xff]  }
 0x7ed   : > { %4057 = vmatprep.subr.bf16.mxu0 %v7690_v10  ;;  %v7745_v10 = vld [vmem:[#allocation6 + $0xb0] ss:$8 sps:$4 sm:$0xff]  }
 0x7f0   : > { %4058 = vmatpush1.bf16.msra.mxu0 %v7688_v12  ;;  %v7750_v12 = vld [vmem:[#allocation6 + $0xc4] ss:$8 sps:$4 sm:$0xff]  }
 0x7f1   : > { %4059 = vmatprep.subr.bf16.mxu0 %v7693_v13  ;;  %v7748_v13 = vld [vmem:[#allocation6 + $0xc0] ss:$8 sps:$4 sm:$0xff]  }
 0x7f4   : > { %4060 = vmatpush1.bf16.msra.mxu0 %v7691_v15  ;;  %v7753_v15 = vld [vmem:[#allocation6 + $0xd4] ss:$8 sps:$4 sm:$0xff]  }
 0x7f5   : > { %4061 = vmatprep.subr.bf16.mxu0 %v7696_v17  ;;  %v7751_v17 = vld [vmem:[#allocation6 + $0xd0] ss:$8 sps:$4 sm:$0xff]  }
 0x7f8   : > { %4062 = vmatpush1.bf16.msra.mxu0 %v7694_v18  ;;  %v7756_v18 = vld [vmem:[#allocation6 + $0xe4] ss:$8 sps:$4 sm:$0xff]  }
 0x7f9   : > { %4063 = vmatprep.subr.bf16.mxu0 %v7699_v19  ;;  %v7754_v19 = vld [vmem:[#allocation6 + $0xe0] ss:$8 sps:$4 sm:$0xff]  }
 0x7fc   : > { %4064 = vmatpush1.bf16.msra.mxu0 %v7697_v20  ;;  %v7759_v20 = vld [vmem:[#allocation6 + $0xf4] ss:$8 sps:$4 sm:$0xff]  }
 0x7fd   : > { %4065 = vmatprep.subr.bf16.mxu0 %v7702_v11  ;;  %v7757_v11 = vld [vmem:[#allocation6 + $0xf0] ss:$8 sps:$4 sm:$0xff]  }
 0x800   : > { %4066 = vmatpush1.bf16.msra.mxu0 %v7700_v14  ;;  %v4084_v14 = vld [vmem:[%s9121_s12] sm:$0x3] }
 0x801   : > { %4067 = vmatprep.subr.bf16.mxu0 %v7705_v16  ;;  %v4089_v16 = vrot.slane %v4084_v14, %v8968_v39 }
 0x804   : > { %4068 = vmatpush1.bf16.msra.mxu0 %v7703_v22 }
 0x805   : > { %4069 = vmatprep.subr.bf16.mxu0 %v7708_v25  ;;  %v4093_v25 = vrot.slane %v4084_v14, %v8973_v48 }
 0x808   : > { %4070 = vmatpush1.bf16.msra.mxu0 %v7706_v26 }
 0x809   : > { %4071 = vmatprep.subr.bf16.mxu0 %v7711_v21 }
 0x80c   : > { %4072 = vmatpush1.bf16.msra.mxu0 %v7709_v23 }
 0x80d   : > { %4635 = vmatprep.subr.bf16.mxu0 %v7714_v24 }
 0x852   : > { %v3791_v27 = vpop.f32.mrb[48].mxu1 }
 0x853   : > { %v3793_v28 = vpop.f32.mrb[49].mxu1 }
 0x854   : > { %v3795_v29 = vpop.f32.mrb[50].mxu1 }
 0x855   : > { %v3796_v31 = vpop.f32.mrb[51].mxu1 }
 0x85a   : > { %v3308_v32 = vpop.f32.mrb[24].mxu0 }
 0x85b   : > { %v3310_v35 = vpop.f32.mrb[25].mxu0 }
 0x85c   : > { %v3312_v36 = vpop.f32.mrb[26].mxu0 }
 0x85d   : > { %v3313_v37 = vpop.f32.mrb[27].mxu0 }
 0x89a   : > { %v3509_v38 = vpop.f32.mrb[28].mxu0 }
 0x89b   : > { %v3510_v41 = vadd.f32 %v3509_v38, %v3308_v32  ;;  %v3511_v51 = vpop.f32.mrb[29].mxu0 }
 0x89c   : > { %v3512_v30 = vadd.f32 %v3511_v51, %v3310_v35  ;;  %v3513_v33 = vpop.f32.mrb[30].mxu0  ;;  %v4106_v51 = vld [vmem:[%s9116_s7] sm:$0x3] }
 0x89d   : > { %v9012_v34 = vadd.f32 %v3791_v27, %v3510_v41  ;;  %v3514_v42 = vpop.f32.mrb[31].mxu0  ;;  %v7760_v33 = vld [vmem:[#allocation6 + $0x100] ss:$8 sps:$4 sm:$0xff]  }
 0x89e   : > { %v9014_v46 = vadd.f32 %v3793_v28, %v3512_v30  ;;  %v7762_v30 = vld [vmem:[#allocation6 + $0x104] ss:$8 sps:$4 sm:$0xff]   ;;  %v7765_v42 = vld [vmem:[#allocation6 + $0x114] ss:$8 sps:$4 sm:$0xff]  }
 0x8a2   : > { %v3839_v49 = vpop.f32.mrb[32].mxu0 }
 0x8a3   : > { %v3841_v40 = vpop.f32.mrb[33].mxu0  ;;  %v3846_v55 = vpack.c.bf16 %v3839_v49, %v3839_v49  ;;  %v7768_v49 = vld [vmem:[#allocation6 + $0x124] ss:$8 sps:$4 sm:$0xff]  }
 0x8a4   : > { %v3847_v45 = vpack.c.bf16 %v3841_v40, %v3841_v40  ;;  %v3843_v53 = vpop.f32.mrb[34].mxu0  ;;  %v7766_v40 = vld [vmem:[#allocation6 + $0x120] ss:$8 sps:$4 sm:$0xff]  }
 0x8a5   : > { %v3844_v56 = vpop.f32.mrb[35].mxu0  ;;  %v7769_v53 = vld [vmem:[#allocation6 + $0x130] ss:$8 sps:$4 sm:$0xff]  }
 0x8a6   : > { %4073 = vmatprep.mubr.bf16.mxu0 %v3847_v45  ;;  %v7771_v45 = vld [vmem:[#allocation6 + $0x134] ss:$8 sps:$4 sm:$0xff]  }
 0x8a7   : > { %4074 = vmatmul.mubr.bf16.vlgmr.msra.gmra.mrb[36].mxu0 %v3846_v55  ;;  %v7772_v55 = vld [vmem:[#allocation6 + $0x140] ss:$8 sps:$4 sm:$0xff]   ;;  %v7777_v56 = vld [vmem:[#allocation6 + $0x154] ss:$8 sps:$4 sm:$0xff]  }
 0x8a8   : > { %4636 = vmatpush1.bf16.msra.mxu0 %v7712_v54  ;;  %v7774_v54 = vld [vmem:[#allocation6 + $0x144] ss:$8 sps:$4 sm:$0xff]  }
 0x8a9   : > { %4637 = vmatprep.subr.bf16.mxu0 %v7717_v57  ;;  %v7775_v57 = vld [vmem:[#allocation6 + $0x150] ss:$8 sps:$4 sm:$0xff]  }
 0x8ac   : > { %4638 = vmatpush1.bf16.msra.mxu0 %v7715_v58  ;;  %v7780_v58 = vld [vmem:[#allocation6 + $0x164] ss:$8 sps:$4 sm:$0xff]  }
 0x8ad   : > { %4639 = vmatprep.subr.bf16.mxu0 %v7720_v60  ;;  %v7778_v60 = vld [vmem:[#allocation6 + $0x160] ss:$8 sps:$4 sm:$0xff]  }
 0x8b0   : > { %4640 = vmatpush1.bf16.msra.mxu0 %v7718_v43  ;;  %v7783_v43 = vld [vmem:[#allocation6 + $0x174] ss:$8 sps:$4 sm:$0xff]  }
 0x8b1   : > { %4641 = vmatprep.subr.bf16.mxu0 %v7723_v50  ;;  %v7781_v50 = vld [vmem:[#allocation6 + $0x170] ss:$8 sps:$4 sm:$0xff]  }
 0x8b4   : > { %4642 = vmatpush1.bf16.msra.mxu0 %v7721_v44  ;;  %v7786_v44 = vld [vmem:[#allocation6 + $0x184] ss:$8 sps:$4 sm:$0xff]  }
 0x8b5   : > { %4643 = vmatprep.subr.bf16.mxu0 %v7726_v59  ;;  %v7784_v59 = vld [vmem:[#allocation6 + $0x180] ss:$8 sps:$4 sm:$0xff]  }
 0x8b8   : > { %4644 = vmatpush1.bf16.msra.mxu0 %v7724_v52  ;;  %v7789_v52 = vld [vmem:[#allocation6 + $0x194] ss:$8 sps:$4 sm:$0xff]  }
 0x8b9   : > { %4645 = vmatprep.subr.bf16.mxu0 %v7729_v1  ;;  %v7787_v1 = vld [vmem:[#allocation6 + $0x190] ss:$8 sps:$4 sm:$0xff]  }
 0x8bc   : > { %4646 = vmatpush1.bf16.msra.mxu0 %v7727_v61  ;;  %v7792_v61 = vld [vmem:[#allocation6 + $0x1a4] ss:$8 sps:$4 sm:$0xff]  }
 0x8bd   : > { %4647 = vmatprep.subr.bf16.mxu0 %v7732_v62  ;;  %v7790_v62 = vld [vmem:[#allocation6 + $0x1a0] ss:$8 sps:$4 sm:$0xff]  }
 0x8c0   : > { %4648 = vmatpush1.bf16.msra.mxu0 %v7730_v47  ;;  %v7795_v47 = vld [vmem:[#allocation6 + $0x1b4] ss:$8 sps:$4 sm:$0xff]  }
 0x8c1   : > { %4649 = vmatprep.subr.bf16.mxu0 %v7735_v63  ;;  %v7793_v63 = vld [vmem:[#allocation6 + $0x1b0] ss:$8 sps:$4 sm:$0xff]  }
 0x8c4   : > { %4650 = vmatpush1.bf16.msra.mxu0 %v7733_v2  ;;  %v7798_v2 = vld [vmem:[#allocation6 + $0x1c4] ss:$8 sps:$4 sm:$0xff]  }
 0x8c5   : > { %4651 = vmatprep.subr.bf16.mxu0 %v7738_v3  ;;  %v7796_v3 = vld [vmem:[#allocation6 + $0x1c0] ss:$8 sps:$4 sm:$0xff]  }
 0x8c8   : > { %4652 = vmatpush1.bf16.msra.mxu0 %v7736_v4  ;;  %v7801_v4 = vld [vmem:[#allocation6 + $0x1d4] ss:$8 sps:$4 sm:$0xff]  }
 0x8c9   : > { %4653 = vmatprep.subr.bf16.mxu0 %v7741_v5  ;;  %v7799_v5 = vld [vmem:[#allocation6 + $0x1d0] ss:$8 sps:$4 sm:$0xff]  }
 0x8cc   : > { %4654 = vmatpush1.bf16.msra.mxu0 %v7739_v6  ;;  %v7804_v6 = vld [vmem:[#allocation6 + $0x1e4] ss:$8 sps:$4 sm:$0xff]  }
 0x8cd   : > { %4655 = vmatprep.subr.bf16.mxu0 %v7744_v7  ;;  %v7802_v7 = vld [vmem:[#allocation6 + $0x1e0] ss:$8 sps:$4 sm:$0xff]  }
 0x8d0   : > { %4656 = vmatpush1.bf16.msra.mxu0 %v7742_v8  ;;  %v7807_v8 = vld [vmem:[#allocation6 + $0x1f4] ss:$8 sps:$4 sm:$0xff]  }
 0x8d1   : > { %4657 = vmatprep.subr.bf16.mxu0 %v7747_v9  ;;  %v7805_v9 = vld [vmem:[#allocation6 + $0x1f0] ss:$8 sps:$4 sm:$0xff]  }
 0x8d4   : > { %4658 = vmatpush1.bf16.msra.mxu0 %v7745_v10 }
 0x8d5   : > { %4659 = vmatprep.subr.bf16.mxu0 %v7750_v12 }
 0x8d8   : > { %4660 = vmatpush1.bf16.msra.mxu0 %v7748_v13 }
 0x8d9   : > { %4661 = vmatprep.subr.bf16.mxu0 %v7753_v15 }
 0x8dc   : > { %4662 = vmatpush1.bf16.msra.mxu0 %v7751_v17 }
 0x8dd   : > { %4663 = vmatprep.subr.bf16.mxu0 %v7756_v18 }
 0x8e0   : > { %4664 = vmatpush1.bf16.msra.mxu0 %v7754_v19  ;;  %v7813_v19 = vld [vmem:[#allocation6 + $0x304] ss:$8 sps:$4 sm:$0xff]  }
 0x8e1   : > { %4665 = vmatprep.subr.bf16.mxu0 %v7759_v20 }
 0x8e4   : > { %4666 = vmatpush1.bf16.msra.mxu0 %v7757_v11 }
 0x97a   : > { %v4075_v22 = vpop.f32.mrb[36].mxu0 }
 0x97b   : > { %v4082_v26 = vadd.f32 %v4075_v22, %v9012_v34  ;;  %v4077_v21 = vpop.f32.mrb[37].mxu0  ;;  %v6767_v34 = vld [vmem:[%s9116_s7 + $0x2] sm:$0x3]  ;;  %v6869_v22 = vld [vmem:[%s9116_s7 + $0x6] sm:$0x3] }
 0x97c   : > { %v4083_v23 = vadd.f32 %v4077_v21, %v9014_v46  ;;  %v4079_v24 = vpop.f32.mrb[38].mxu0  ;;  %v7763_v46 = vld [vmem:[#allocation6 + $0x110] ss:$8 sps:$4 sm:$0xff]   ;;  %v7810_v21 = vld [vmem:[#allocation6 + $0x204] ss:$8 sps:$4 sm:$0xff]  }
 0x97d   : > { %v4096_v27 = vadd.f32 %v4089_v16, %v4082_v26  ;;  %v4080_v28 = vpop.f32.mrb[39].mxu0  ;;  %v7819_v24 = vld [vmem:[#allocation6 + $0x314] ss:$8 sps:$4 sm:$0xff]  }
 0x97e   : > { %v4097_v29 = vadd.f32 %v4093_v25, %v4083_v23  ;;  %v7811_v23 = vld [vmem:[#allocation6 + $0x300] ss:$8 sps:$4 sm:$0xff]   ;;  %v7825_v28 = vld [vmem:[#allocation6 + $0x324] ss:$8 sps:$4 sm:$0xff]  }
 0x97f   : > { %vm4098_vm15 = vcmp.gt.f32.partialorder %v4096_v27, 0.0  ;;  %v4100_v31 = vmul.f32 0.2, %v4096_v27 }
 0x980   : > { %vm4099_vm0 = vcmp.gt.f32.partialorder %v4097_v29, 0.0  ;;  %v4101_v32 = vmul.f32 0.2, %v4097_v29 }
 0x981   : > { %v4102_v35 = vsel %vm4098_vm15, %v4096_v27, %v4100_v31  ;;  %v7817_v27 = vld [vmem:[#allocation6 + $0x310] ss:$8 sps:$4 sm:$0xff]   ;;  %v7808_v31 = vld [vmem:[#allocation6 + $0x200] ss:$8 sps:$4 sm:$0xff]  }
 0x982   : > { %v4103_v36 = vsel %vm4099_vm0, %v4097_v29, %v4101_v32  ;;  %v4104_v37 = vpack.c.bf16 %v4102_v35, %v4102_v35  ;;  %v6834_v29 = vld [vmem:[%s9116_s7 + $0x4] sm:$0x3]  ;;  %v7816_v32 = vld [vmem:[#allocation6 + $0x214] ss:$8 sps:$4 sm:$0xff]   ;;  %v7823_v35 = vld [vmem:[#allocation6 + $0x320] ss:$8 sps:$4 sm:$0xff]  }
 0x983   : > { %v9023_v38 = vpack.c.bf16 %v4103_v36, %v4103_v36  ;;  %v7831_v36 = vld [vmem:[#allocation6 + $0x334] ss:$8 sps:$4 sm:$0xff]  }
 0x984   : > { %v9026_v41 = vsel %vm4111_vm1, %v4104_v37, 0  ;;  %v7814_v37 = vld [vmem:[#allocation6 + $0x210] ss:$8 sps:$4 sm:$0xff]  }
 0x985   : > { %6765 = vmatprep.subr.msk.bf16.mxu1 %vm4111_vm1, %v9023_v38  ;;  %6870 = vmatprep.subr.msk.bf16.mxu0 %vm4111_vm1, %v9023_v38 }
 0x986   : > { %4119 = vmatpush1.bf16.msra.mxu1 %v9026_v41 }
 0x987   : > { %6768 = vmatprep.subr.msk.bf16.mxu1 %vm4111_vm1, %v9023_v38 }
 0x989   : > { %6766 = vmatmul.mubr.msk.bf16.vlgmr.msra.gmra.mrb[52].mxu1 %vm4107_vm2, %v4106_v51  ;;  %v7837_v51 = vld [vmem:[#allocation6 + $0x344] ss:$8 sps:$4 sm:$0xff]  }
 0x98a   : > { %4199 = vmatpush1.bf16.msra.mxu1 %v9026_v41  ;;  %4230 = vmatprep.mubr.bf16.mxu1 %v8112_v0 }
 0x98b   : > { %4434 = vmatprep.subr.bf16.mxu1 %v7762_v30  ;;  %v7820_v30 = vld [vmem:[#allocation6 + $0x220] ss:$8 sps:$4 sm:$0xff]  }
 0x991   : > { %6769 = vmatmul.mubr.msk.bf16.vlgmr.msra.gmra.mrb[56].mxu1 %vm4107_vm2, %v6767_v34  ;;  %v7835_v34 = vld [vmem:[#allocation6 + $0x340] ss:$8 sps:$4 sm:$0xff]  }
 0x992   : > { %4435 = vmatpush1.bf16.msra.mxu1 %v7760_v33  ;;  %v7828_v33 = vld [vmem:[#allocation6 + $0x234] ss:$8 sps:$4 sm:$0xff]  }
 0x993   : > { %4436 = vmatprep.subr.bf16.mxu1 %v7765_v42  ;;  %v7843_v42 = vld [vmem:[#allocation6 + $0x354] ss:$8 sps:$4 sm:$0xff]  }
 0x996   : > { %4437 = vmatpush1.bf16.msra.mxu1 %v7763_v46  ;;  %v7826_v46 = vld [vmem:[#allocation6 + $0x230] ss:$8 sps:$4 sm:$0xff]  }
 0x997   : > { %4438 = vmatprep.subr.bf16.mxu1 %v7768_v49  ;;  %v7834_v49 = vld [vmem:[#allocation6 + $0x244] ss:$8 sps:$4 sm:$0xff]  }
 0x99a   : > { %4439 = vmatpush1.bf16.msra.mxu1 %v7766_v40  ;;  %v7841_v40 = vld [vmem:[#allocation6 + $0x350] ss:$8 sps:$4 sm:$0xff]  }
 0x99b   : > { %4440 = vmatprep.subr.bf16.mxu1 %v7771_v45  ;;  %v7849_v45 = vld [vmem:[#allocation6 + $0x364] ss:$8 sps:$4 sm:$0xff]  }
 0x99e   : > { %4441 = vmatpush1.bf16.msra.mxu1 %v7769_v53  ;;  %v7832_v53 = vld [vmem:[#allocation6 + $0x240] ss:$8 sps:$4 sm:$0xff]  }
 0x99f   : > { %4442 = vmatprep.subr.bf16.mxu1 %v7774_v54  ;;  %v7840_v54 = vld [vmem:[#allocation6 + $0x254] ss:$8 sps:$4 sm:$0xff]  }
 0x9a2   : > { %4443 = vmatpush1.bf16.msra.mxu1 %v7772_v55  ;;  %v7847_v55 = vld [vmem:[#allocation6 + $0x360] ss:$8 sps:$4 sm:$0xff]  }
 0x9a3   : > { %4444 = vmatprep.subr.bf16.mxu1 %v7777_v56  ;;  %v7855_v56 = vld [vmem:[#allocation6 + $0x374] ss:$8 sps:$4 sm:$0xff]  }
 0x9a6   : > { %4445 = vmatpush1.bf16.msra.mxu1 %v7775_v57  ;;  %v7838_v57 = vld [vmem:[#allocation6 + $0x250] ss:$8 sps:$4 sm:$0xff]  }
 0x9a7   : > { %4446 = vmatprep.subr.bf16.mxu1 %v7780_v58  ;;  %v7846_v58 = vld [vmem:[#allocation6 + $0x264] ss:$8 sps:$4 sm:$0xff]  }
 0x9aa   : > { %4447 = vmatpush1.bf16.msra.mxu1 %v7778_v60  ;;  %v7853_v60 = vld [vmem:[#allocation6 + $0x370] ss:$8 sps:$4 sm:$0xff]  }
 0x9ab   : > { %4448 = vmatprep.subr.bf16.mxu1 %v7783_v43  ;;  %v7861_v43 = vld [vmem:[#allocation6 + $0x384] ss:$8 sps:$4 sm:$0xff]  }
 0x9ae   : > { %4449 = vmatpush1.bf16.msra.mxu1 %v7781_v50  ;;  %v7844_v50 = vld [vmem:[#allocation6 + $0x260] ss:$8 sps:$4 sm:$0xff]  }
 0x9af   : > { %4450 = vmatprep.subr.bf16.mxu1 %v7786_v44  ;;  %v7852_v44 = vld [vmem:[#allocation6 + $0x274] ss:$8 sps:$4 sm:$0xff]  }
 0x9b2   : > { %4451 = vmatpush1.bf16.msra.mxu1 %v7784_v59  ;;  %v7859_v59 = vld [vmem:[#allocation6 + $0x380] ss:$8 sps:$4 sm:$0xff]  }
 0x9b3   : > { %4452 = vmatprep.subr.bf16.mxu1 %v7789_v52  ;;  %v7867_v52 = vld [vmem:[#allocation6 + $0x394] ss:$8 sps:$4 sm:$0xff]  }
 0x9b6   : > { %4453 = vmatpush1.bf16.msra.mxu1 %v7787_v1  ;;  %v7850_v1 = vld [vmem:[#allocation6 + $0x270] ss:$8 sps:$4 sm:$0xff]  }
 0x9b7   : > { %4454 = vmatprep.subr.bf16.mxu1 %v7792_v61  ;;  %v7858_v61 = vld [vmem:[#allocation6 + $0x284] ss:$8 sps:$4 sm:$0xff]  }
 0x9ba   : > { %4455 = vmatpush1.bf16.msra.mxu1 %v7790_v62  ;;  %v7865_v62 = vld [vmem:[#allocation6 + $0x390] ss:$8 sps:$4 sm:$0xff]  }
 0x9bb   : > { %4456 = vmatprep.subr.bf16.mxu1 %v7795_v47  ;;  %v7873_v47 = vld [vmem:[#allocation6 + $0x3a4] ss:$8 sps:$4 sm:$0xff]  }
 0x9be   : > { %4457 = vmatpush1.bf16.msra.mxu1 %v7793_v63  ;;  %v7856_v63 = vld [vmem:[#allocation6 + $0x280] ss:$8 sps:$4 sm:$0xff]  }
 0x9bf   : > { %4458 = vmatprep.subr.bf16.mxu1 %v7798_v2  ;;  %v7864_v2 = vld [vmem:[#allocation6 + $0x294] ss:$8 sps:$4 sm:$0xff]  }
 0x9c2   : > { %4459 = vmatpush1.bf16.msra.mxu1 %v7796_v3  ;;  %v7871_v3 = vld [vmem:[#allocation6 + $0x3a0] ss:$8 sps:$4 sm:$0xff]  }
 0x9c3   : > { %4460 = vmatprep.subr.bf16.mxu1 %v7801_v4  ;;  %v7862_v4 = vld [vmem:[#allocation6 + $0x290] ss:$8 sps:$4 sm:$0xff]  }
 0x9c6   : > { %4461 = vmatpush1.bf16.msra.mxu1 %v7799_v5  ;;  %v7870_v5 = vld [vmem:[#allocation6 + $0x2a4] ss:$8 sps:$4 sm:$0xff]  }
 0x9c7   : > { %4462 = vmatprep.subr.bf16.mxu1 %v7804_v6  ;;  %v7868_v6 = vld [vmem:[#allocation6 + $0x2a0] ss:$8 sps:$4 sm:$0xff]  }
 0x9ca   : > { %4463 = vmatpush1.bf16.msra.mxu1 %v7802_v7  ;;  %v7876_v7 = vld [vmem:[#allocation6 + $0x2b4] ss:$8 sps:$4 sm:$0xff]  }
 0x9cb   : > { %4464 = vmatprep.subr.bf16.mxu1 %v7807_v8  ;;  %v7874_v8 = vld [vmem:[#allocation6 + $0x2b0] ss:$8 sps:$4 sm:$0xff]  }
 0x9ce   : > { %4465 = vmatpush1.bf16.msra.mxu1 %v7805_v9  ;;  %v7879_v9 = vld [vmem:[#allocation6 + $0x3b4] ss:$8 sps:$4 sm:$0xff]  }
 0x9cf   : > { %6835 = vmatprep.subr.msk.bf16.mxu1 %vm4111_vm1, %v9023_v38  ;;  %v7822_v38 = vld [vmem:[#allocation6 + $0x224] ss:$8 sps:$4 sm:$0xff]  }
 0xa5c   : > { %v4152_v10 = vpop.f32.mrb[52].mxu1 }
 0xa5d   : > { %v4154_v12 = vpop.f32.mrb[53].mxu1  ;;  %v4159_v17 = vpack.c.bf16 %v4152_v10, %v4152_v10  ;;  %v7877_v10 = vld [vmem:[#allocation6 + $0x3b0] ss:$8 sps:$4 sm:$0xff]  }
 0xa5e   : > { %v4160_v13 = vpack.c.bf16 %v4154_v12, %v4154_v12  ;;  %v4156_v15 = vpop.f32.mrb[54].mxu1  ;;  %v7885_v12 = vld [vmem:[#allocation6 + $0x3c4] ss:$8 sps:$4 sm:$0xff]  }
 0xa5f   : > { %v4157_v18 = vpop.f32.mrb[55].mxu1  ;;  %v7882_v15 = vld [vmem:[#allocation6 + $0x2c4] ss:$8 sps:$4 sm:$0xff]  }
 0xa60   : > { %4667 = vmatprep.mubr.bf16.mxu0 %v4160_v13  ;;  %v7880_v13 = vld [vmem:[#allocation6 + $0x2c0] ss:$8 sps:$4 sm:$0xff]   ;;  %v7891_v18 = vld [vmem:[#allocation6 + $0x3d4] ss:$8 sps:$4 sm:$0xff]  }
 0xa61   : > { %4668 = vmatmul.mubr.bf16.vlgmr.msra.gmra.mrb[40].mxu0 %v4159_v17  ;;  %v7883_v17 = vld [vmem:[#allocation6 + $0x3c0] ss:$8 sps:$4 sm:$0xff]  }
 0xa62   : > { %4966 = vmatpush1.bf16.msra.mxu0 %v9026_v41  ;;  %4997 = vmatprep.mubr.bf16.mxu0 %v8112_v0 }
 0xa63   : > { %5201 = vmatprep.subr.bf16.mxu0 %v7813_v19  ;;  %v7889_v19 = vld [vmem:[#allocation6 + $0x3d0] ss:$8 sps:$4 sm:$0xff]  }
 0xa64   : > { %v4232_v20 = vpop.f32.mrb[56].mxu1 }
 0xa65   : > { %v4234_v11 = vpop.f32.mrb[57].mxu1  ;;  %v4239_v25 = vpack.c.bf16 %v4232_v20, %v4232_v20  ;;  %v7888_v20 = vld [vmem:[#allocation6 + $0x2d4] ss:$8 sps:$4 sm:$0xff]  }
 0xa66   : > { %v4240_v14 = vpack.c.bf16 %v4234_v11, %v4234_v11  ;;  %v4236_v16 = vpop.f32.mrb[58].mxu1  ;;  %v7886_v11 = vld [vmem:[#allocation6 + $0x2d0] ss:$8 sps:$4 sm:$0xff]  }
 0xa67   : > { %v4237_v26 = vpop.f32.mrb[59].mxu1  ;;  %v7894_v16 = vld [vmem:[#allocation6 + $0x2e4] ss:$8 sps:$4 sm:$0xff]  }
 0xa68   : > { %4466 = vmatprep.mubr.bf16.mxu1 %v4240_v14  ;;  %v7897_v14 = vld [vmem:[#allocation6 + $0x3e4] ss:$8 sps:$4 sm:$0xff]   ;;  %v7903_v26 = vld [vmem:[#allocation6 + $0x3f4] ss:$8 sps:$4 sm:$0xff]  }
 0xa69   : > { %4467 = vmatmul.mubr.bf16.vlgmr.msra.gmra.mrb[60].mxu1 %v4239_v25  ;;  %6871 = vmatmul.mubr.msk.bf16.vlgmr.msra.gmra.mrb[44].mxu0 %vm4107_vm2, %v6869_v22  ;;  %v7895_v22 = vld [vmem:[#allocation6 + $0x3e0] ss:$8 sps:$4 sm:$0xff]  }
 0xa6a   : > { %4682 = vmatpush1.bf16.msra.mxu1 %v9026_v41  ;;  %4713 = vmatprep.mubr.bf16.mxu1 %v8112_v0  ;;  %v7829_v41 = vld [vmem:[#allocation6 + $0x330] ss:$8 sps:$4 sm:$0xff]   ;;  %v7892_v25 = vld [vmem:[#allocation6 + $0x2e0] ss:$8 sps:$4 sm:$0xff]  }
 0xa6b   : > { %4917 = vmatprep.subr.bf16.mxu1 %v7810_v21  ;;  %5202 = vmatpush1.bf16.msra.mxu0 %v7811_v23  ;;  %v7901_v21 = vld [vmem:[#allocation6 + $0x3f0] ss:$8 sps:$4 sm:$0xff]   ;;  %v7900_v23 = vld [vmem:[#allocation6 + $0x2f4] ss:$8 sps:$4 sm:$0xff]  }
 0xa6c   : > { %5203 = vmatprep.subr.bf16.mxu0 %v7819_v24  ;;  %v7898_v24 = vld [vmem:[#allocation6 + $0x2f0] ss:$8 sps:$4 sm:$0xff]  }
 0xa6f   : > { %5204 = vmatpush1.bf16.msra.mxu0 %v7817_v27  ;;  %v7904_v27 = vld [vmem:[#allocation7 + $0xc0] sm:$0xff]  }
 0xa70   : > { %5205 = vmatprep.subr.bf16.mxu0 %v7825_v28 }
 0xa71   : > { %6836 = vmatmul.mubr.msk.bf16.vlgmr.msra.gmra.mrb[64].mxu1 %vm4107_vm2, %v6834_v29 }
 0xa72   : > { %4918 = vmatpush1.bf16.msra.mxu1 %v7808_v31 }
 0xa73   : > { %4919 = vmatprep.subr.bf16.mxu1 %v7816_v32  ;;  %5206 = vmatpush1.bf16.msra.mxu0 %v7823_v35 }
 0xa74   : > { %5207 = vmatprep.subr.bf16.mxu0 %v7831_v36 }
 0xa76   : > { %4920 = vmatpush1.bf16.msra.mxu1 %v7814_v37 }
 0xa77   : > { %4921 = vmatprep.subr.bf16.mxu1 %v7822_v38  ;;  %5208 = vmatpush1.bf16.msra.mxu0 %v7829_v41 }
 0xa78   : > { %5209 = vmatprep.subr.bf16.mxu0 %v7837_v51 }
 0xa7a   : > { %4922 = vmatpush1.bf16.msra.mxu1 %v7820_v30 }
 0xa7b   : > { %4923 = vmatprep.subr.bf16.mxu1 %v7828_v33  ;;  %5210 = vmatpush1.bf16.msra.mxu0 %v7835_v34 }
 0xa7c   : > { %5211 = vmatprep.subr.bf16.mxu0 %v7843_v42 }
 0xa7e   : > { %4924 = vmatpush1.bf16.msra.mxu1 %v7826_v46  ;;  %v7905_v46 = vld [vmem:[#allocation7 + $0x80] sm:$0xff]  }
 0xa7f   : > { %4925 = vmatprep.subr.bf16.mxu1 %v7834_v49  ;;  %5212 = vmatpush1.bf16.msra.mxu0 %v7841_v40 }
 0xa80   : > { %5213 = vmatprep.subr.bf16.mxu0 %v7849_v45  ;;  %v7906_v45 = vld [vmem:[#allocation7 + $0xc8] sm:$0xff]  }
 0xa82   : > { %4926 = vmatpush1.bf16.msra.mxu1 %v7832_v53  ;;  %v7907_v53 = vld [vmem:[#allocation7 + $0x88] sm:$0xff]  }
 0xa83   : > { %4927 = vmatprep.subr.bf16.mxu1 %v7840_v54  ;;  %5214 = vmatpush1.bf16.msra.mxu0 %v7847_v55  ;;  %v7908_v54 = vld [vmem:[#allocation7 + $0xd0] sm:$0xff]  }
 0xa84   : > { %5215 = vmatprep.subr.bf16.mxu0 %v7855_v56 }
 0xa86   : > { %4928 = vmatpush1.bf16.msra.mxu1 %v7838_v57 }
 0xa87   : > { %4929 = vmatprep.subr.bf16.mxu1 %v7846_v58  ;;  %5216 = vmatpush1.bf16.msra.mxu0 %v7853_v60  ;;  %v7909_v60 = vld [vmem:[#allocation7 + $0x90] sm:$0xff]  }
 0xa88   : > { %5217 = vmatprep.subr.bf16.mxu0 %v7861_v43 }
 0xa8a   : > { %4930 = vmatpush1.bf16.msra.mxu1 %v7844_v50 }
 0xa8b   : > { %4931 = vmatprep.subr.bf16.mxu1 %v7852_v44  ;;  %5218 = vmatpush1.bf16.msra.mxu0 %v7859_v59  ;;  %v7910_v44 = vld [vmem:[#allocation7 + $0xd8] sm:$0xff]  }
 0xa8c   : > { %5219 = vmatprep.subr.bf16.mxu0 %v7867_v52  ;;  %v7911_v59 = vld [vmem:[#allocation7 + $0x98] sm:$0xff]   ;;  %v7912_v52 = vld [vmem:[#allocation7 + $0xe0] sm:$0xff]  }
 0xa8e   : > { %4932 = vmatpush1.bf16.msra.mxu1 %v7850_v1  ;;  %v7913_v1 = vld [vmem:[#allocation7 + $0xa0] sm:$0xff]  }
 0xa8f   : > { %4933 = vmatprep.subr.bf16.mxu1 %v7858_v61  ;;  %5220 = vmatpush1.bf16.msra.mxu0 %v7865_v62  ;;  %v7914_v61 = vld [vmem:[#allocation7 + $0xe8] sm:$0xff]  }
 0xa90   : > { %5221 = vmatprep.subr.bf16.mxu0 %v7873_v47  ;;  %v7915_v62 = vld [vmem:[#allocation7 + $0xa8] sm:$0xff]   ;;  %v7916_v47 = vld [vmem:[#allocation7 + $0xf0] sm:$0xff]  }
 0xa92   : > { %4934 = vmatpush1.bf16.msra.mxu1 %v7856_v63  ;;  %v7917_v63 = vld [vmem:[#allocation7 + $0xb0] sm:$0xff]  }
 0xa93   : > { %4935 = vmatprep.subr.bf16.mxu1 %v7864_v2  ;;  %5222 = vmatpush1.bf16.msra.mxu0 %v7871_v3  ;;  %v7918_v2 = vld [vmem:[#allocation7 + $0xf8] sm:$0xff]  }
 0xa94   : > { %5223 = vmatprep.subr.bf16.mxu0 %v7879_v9  ;;  %v7919_v3 = vld [vmem:[#allocation7 + $0xb8] sm:$0xff]  }
 0xa96   : > { %4936 = vmatpush1.bf16.msra.mxu1 %v7862_v4 }
 0xa97   : > { %4937 = vmatprep.subr.bf16.mxu1 %v7870_v5  ;;  %5224 = vmatpush1.bf16.msra.mxu0 %v7877_v10 }
 0xa98   : > { %5225 = vmatprep.subr.bf16.mxu0 %v7885_v12 }
 0xa9a   : > { %4938 = vmatpush1.bf16.msra.mxu1 %v7868_v6 }
 0xa9b   : > { %4939 = vmatprep.subr.bf16.mxu1 %v7876_v7  ;;  %5226 = vmatpush1.bf16.msra.mxu0 %v7883_v17 }
 0xa9c   : > { %5227 = vmatprep.subr.bf16.mxu0 %v7891_v18 }
 0xa9e   : > { %4940 = vmatpush1.bf16.msra.mxu1 %v7874_v8  ;;  %v5244_v8 = vld [vmem:[%s9142_s20] sm:$0x3] }
 0xa9f   : > { %4941 = vmatprep.subr.bf16.mxu1 %v7882_v15  ;;  %5228 = vmatpush1.bf16.msra.mxu0 %v7889_v19  ;;  %v5253_v17 = vrot.slane %v5244_v8, %v8973_v48  ;;  %v5266_v48 = vld [vmem:[%s9143_s17] sm:$0x1] }
 0xaa0   : > { %5229 = vmatprep.subr.bf16.mxu0 %v7897_v14 }
 0xaa2   : > { %4942 = vmatpush1.bf16.msra.mxu1 %v7880_v13  ;;  %v5249_v13 = vrot.slane %v5244_v8, %v8968_v39  ;;  %v7943_v8 = vld [vmem:[#allocation7 + $0x180] sm:$0xff]  }
 0xaa3   : > { %4943 = vmatprep.subr.bf16.mxu1 %v7888_v20  ;;  %5230 = vmatpush1.bf16.msra.mxu0 %v7895_v22 }
 0xaa4   : > { %5231 = vmatprep.subr.bf16.mxu0 %v7903_v26 }
 0xaa6   : > { %4944 = vmatpush1.bf16.msra.mxu1 %v7886_v11 }
 0xaa7   : > { %4945 = vmatprep.subr.bf16.mxu1 %v7894_v16  ;;  %5232 = vmatpush1.bf16.msra.mxu0 %v7901_v21 }
 0xaa8   : > { %6982 = vmatprep.subr.bf16.mxu0 %v7904_v27  ;;  %v7920_v27 = vld [vmem:[#allocation7 + $0x40] sm:$0xff]  }
 0xaaa   : > { %4946 = vmatpush1.bf16.msra.mxu1 %v7892_v25 }
 0xaab   : > { %4947 = vmatprep.subr.bf16.mxu1 %v7900_v23 }
 0xaae   : > { %4948 = vmatpush1.bf16.msra.mxu1 %v7898_v24 }
 0xb34   : > { %v4669_v28 = vpop.f32.mrb[40].mxu0 }
 0xb35   : > { %v4671_v29 = vpop.f32.mrb[41].mxu0 }
 0xb36   : > { %v4673_v31 = vpop.f32.mrb[42].mxu0 }
 0xb37   : > { %v4674_v32 = vpop.f32.mrb[43].mxu0  ;;  %v7922_v31 = vld [vmem:[#allocation7 + $0x48] sm:$0xff]  }
 0xb38   : > { %v7923_v32 = vld [vmem:[#allocation7 + $0x8] sm:$0xff]  }
 0xb3c   : > { %v4468_v35 = vpop.f32.mrb[60].mxu1  ;;  %v4999_v36 = vpop.f32.mrb[44].mxu0 }
 0xb3d   : > { %v4670_v37 = vadd.f32 %v4669_v28, %v4468_v35  ;;  %v4470_v38 = vpop.f32.mrb[61].mxu1  ;;  %v5006_v41 = vpack.c.bf16 %v4999_v36, %v4999_v36  ;;  %v5001_v51 = vpop.f32.mrb[45].mxu0  ;;  %v6906_v28 = vld [vmem:[%s9143_s17 + $0x1] sm:$0x1]  ;;  %v7924_v35 = vld [vmem:[#allocation7 + $0x50] sm:$0xff]  }
 0xb3e   : > { %v4672_v30 = vadd.f32 %v4671_v29, %v4470_v38  ;;  %v4472_v33 = vpop.f32.mrb[62].mxu1  ;;  %v5007_v34 = vpack.c.bf16 %v5001_v51, %v5001_v51  ;;  %v5003_v42 = vpop.f32.mrb[46].mxu0  ;;  %v7921_v29 = vld [vmem:[#allocation7] sm:$0xff]   ;;  %v7925_v36 = vld [vmem:[#allocation7 + $0x10] sm:$0xff]   ;;  %v7927_v38 = vld [vmem:[#allocation7 + $0x18] sm:$0xff]  }
 0xb3f   : > { %v4473_v49 = vpop.f32.mrb[63].mxu1  ;;  %v5004_v40 = vpop.f32.mrb[47].mxu0  ;;  %v7929_v51 = vld [vmem:[#allocation7 + $0x20] sm:$0xff]   ;;  %v7931_v33 = vld [vmem:[#allocation7 + $0x28] sm:$0xff]   ;;  %v7933_v42 = vld [vmem:[#allocation7 + $0x30] sm:$0xff]  }
 0xb40   : > { %5233 = vmatprep.mubr.bf16.mxu0 %v5007_v34  ;;  %v7932_v34 = vld [vmem:[#allocation7 + $0x70] sm:$0xff]   ;;  %v7935_v49 = vld [vmem:[#allocation7 + $0x38] sm:$0xff]   ;;  %v7936_v40 = vld [vmem:[#allocation7 + $0x140] sm:$0xff]  }
 0xb41   : > { %5234 = vmatmul.mubr.bf16.vlgmr.msra.gmra.mrb[48].mxu0 %v5006_v41  ;;  %v7928_v41 = vld [vmem:[#allocation7 + $0x60] sm:$0xff]  }
 0xb42   : > { %6983 = vmatpush3.bf16.msra.mxu0 %v7905_v46  ;;  %v7934_v46 = vld [vmem:[#allocation7 + $0x78] sm:$0xff]  }
 0xb43   : > { %6984 = vmatprep.subr.bf16.mxu0 %v7906_v45 }
 0xb44   : > { %v4715_v55 = vpop.f32.mrb[64].mxu1 }
 0xb45   : > { %v4717_v56 = vpop.f32.mrb[65].mxu1  ;;  %v4722_v43 = vpack.c.bf16 %v4715_v55, %v4715_v55 }
 0xb46   : > { %v4723_v57 = vpack.c.bf16 %v4717_v56, %v4717_v56  ;;  %v4719_v58 = vpop.f32.mrb[66].mxu1  ;;  %6985 = vmatpush3.bf16.msra.mxu0 %v7907_v53  ;;  %v7937_v56 = vld [vmem:[#allocation7 + $0x100] sm:$0xff]  }
 0xb47   : > { %v4720_v50 = vpop.f32.mrb[67].mxu1  ;;  %6986 = vmatprep.subr.bf16.mxu0 %v7908_v54 }
 0xb48   : > { %4949 = vmatprep.mubr.bf16.mxu1 %v4723_v57  ;;  %v7940_v50 = vld [vmem:[#allocation7 + $0x150] sm:$0xff]  }
 0xb49   : > { %4950 = vmatmul.mubr.bf16.vlgmr.msra.gmra.mrb[68].mxu1 %v4722_v43  ;;  %v7939_v43 = vld [vmem:[#allocation7 + $0x108] sm:$0xff]  }
 0xb4a   : > { %6987 = vmatpush3.bf16.msra.mxu0 %v7909_v60  ;;  %5310 = vmatprep.mubr.bf16.mxu1 %v8112_v0  ;;  %v7938_v60 = vld [vmem:[#allocation7 + $0x148] sm:$0xff]  }
 0xb4b   : > { %6988 = vmatprep.subr.bf16.mxu0 %v7910_v44 }
 0xb4e   : > { %6989 = vmatpush3.bf16.msra.mxu0 %v7911_v59 }
 0xb4f   : > { %6990 = vmatprep.subr.bf16.mxu0 %v7912_v52 }
 0xb52   : > { %6991 = vmatpush3.bf16.msra.mxu0 %v7913_v1 }
 0xb53   : > { %6992 = vmatprep.subr.bf16.mxu0 %v7914_v61 }
 0xb56   : > { %6993 = vmatpush3.bf16.msra.mxu0 %v7915_v62 }
 0xb57   : > { %6994 = vmatprep.subr.bf16.mxu0 %v7916_v47  ;;  %v7942_v47 = vld [vmem:[#allocation7 + $0x110] sm:$0xff]  }
 0xb5a   : > { %6995 = vmatpush3.bf16.msra.mxu0 %v7917_v63  ;;  %v7944_v63 = vld [vmem:[#allocation7 + $0x158] sm:$0xff]  }
 0xb5b   : > { %6996 = vmatprep.subr.bf16.mxu0 %v7918_v2  ;;  %v7946_v2 = vld [vmem:[#allocation7 + $0x118] sm:$0xff]  }
 0xb5e   : > { %6997 = vmatpush3.bf16.msra.mxu0 %v7919_v3  ;;  %v7948_v3 = vld [vmem:[#allocation7 + $0x160] sm:$0xff]  }
 0xc14   : > { %v5235_v4 = vpop.f32.mrb[48].mxu0 }
 0xc15   : > { %v5237_v5 = vpop.f32.mrb[49].mxu0 }
 0xc16   : > { %v5239_v6 = vpop.f32.mrb[50].mxu0 }
 0xc17   : > { %v5240_v7 = vpop.f32.mrb[51].mxu0  ;;  %v7950_v6 = vld [vmem:[#allocation7 + $0x120] sm:$0xff]  }
 0xc18   : > { %v6960_v7 = vld [vmem:[%s9143_s17 + $0x3] sm:$0x1] }
 0xc1c   : > { %v4951_v9 = vpop.f32.mrb[68].mxu1 }
 0xc1d   : > { %v4958_v10 = vadd.f32 %v4951_v9, %v4670_v37  ;;  %v4953_v12 = vpop.f32.mrb[69].mxu1  ;;  %v7926_v37 = vld [vmem:[#allocation7 + $0x58] sm:$0xff]   ;;  %v7945_v9 = vld [vmem:[#allocation7 + $0x1c8] sm:$0xff]  }
 0xc1e   : > { %v4959_v15 = vadd.f32 %v4953_v12, %v4672_v30  ;;  %v4955_v18 = vpop.f32.mrb[70].mxu1  ;;  %v7930_v30 = vld [vmem:[#allocation7 + $0x68] sm:$0xff]   ;;  %v7949_v12 = vld [vmem:[#allocation7 + $0x1d0] sm:$0xff]  }
 0xc1f   : > { %v5242_v19 = vadd.f32 %v5235_v4, %v4958_v10  ;;  %v4956_v20 = vpop.f32.mrb[71].mxu1  ;;  %v6941_v4 = vld [vmem:[%s9143_s17 + $0x2] sm:$0x1]  ;;  %v7947_v10 = vld [vmem:[#allocation7 + $0x188] sm:$0xff]   ;;  %v7955_v18 = vld [vmem:[#allocation7 + $0x198] sm:$0xff]  }
 0xc20   : > { %v5243_v11 = vadd.f32 %v5237_v5, %v4959_v15  ;;  %v7941_v5 = vld [vmem:[#allocation7 + $0x1c0] sm:$0xff]   ;;  %v7952_v15 = vld [vmem:[#allocation7 + $0x168] sm:$0xff]  }
 0xc21   : > { %v5256_v14 = vadd.f32 %v5249_v13, %v5242_v19  ;;  %v7951_v13 = vld [vmem:[#allocation7 + $0x190] sm:$0xff]   ;;  %v7957_v20 = vld [vmem:[#allocation7 + $0x1e0] sm:$0xff]  }
 0xc22   : > { %v5257_v16 = vadd.f32 %v5253_v17, %v5243_v11  ;;  %v7954_v17 = vld [vmem:[#allocation7 + $0x128] sm:$0xff]   ;;  %v7956_v19 = vld [vmem:[#allocation7 + $0x170] sm:$0xff]  }
 0xc23   : > { %vm5258_vm3 = vcmp.gt.f32.partialorder %v5256_v14, 0.0  ;;  %v5260_v22 = vmul.f32 0.2, %v5256_v14  ;;  %v7958_v11 = vld [vmem:[#allocation7 + $0x130] sm:$0xff]  }
 0xc24   : > { %vm5259_vm4 = vcmp.gt.f32.partialorder %v5257_v16, 0.0  ;;  %v5261_v25 = vmul.f32 0.2, %v5257_v16 }
 0xc25   : > { %v5262_v26 = vsel %vm5258_vm3, %v5256_v14, %v5260_v22  ;;  %v7959_v14 = vld [vmem:[#allocation7 + $0x1a0] sm:$0xff]   ;;  %v7961_v22 = vld [vmem:[#allocation7 + $0x1e8] sm:$0xff]  }
 0xc26   : > { %v5263_v21 = vsel %vm5259_vm4, %v5257_v16, %v5261_v25  ;;  %v5264_v23 = vpack.c.bf16 %v5262_v26, %v5262_v26  ;;  %v7960_v16 = vld [vmem:[#allocation7 + $0x178] sm:$0xff]   ;;  %v7963_v26 = vld [vmem:[#allocation7 + $0x1a8] sm:$0xff]  }
 0xc27   : > { %v9065_v24 = vpack.c.bf16 %v5263_v21, %v5263_v21  ;;  %v7962_v25 = vld [vmem:[#allocation7 + $0x138] sm:$0xff]   ;;  %v7964_v21 = vld [vmem:[#allocation7 + $0x1f0] sm:$0xff]  }
 0xc28   : > { %v9068_v39 = vsel %vm5271_vm5, %v5264_v23, 0  ;;  %v7965_v23 = vld [vmem:[#allocation7 + $0x1b0] sm:$0xff]  }
 0xc29   : > { %6904 = vmatprep.subr.msk.bf16.mxu1 %vm5271_vm5, %v9065_v24  ;;  %6942 = vmatprep.subr.msk.bf16.mxu0 %vm5271_vm5, %v9065_v24 }
 0xc2a   : > { %5279 = vmatpush1.bf16.msra.mxu1 %v9068_v39 }
 0xc2b   : > { %6907 = vmatprep.subr.msk.bf16.mxu1 %vm5271_vm5, %v9065_v24 }
 0xc2d   : > { %6905 = vmatmul.mubr.msk.bf16.vlgmr.msra.gmra.mrb[72].mxu1 %vm5267_vm6, %v5266_v48 }
 0xc2e   : > { %5359 = vmatpush1.bf16.msra.mxu1 %v9068_v39  ;;  %5390 = vmatprep.mubr.bf16.mxu1 %v8112_v0 }
 0xc2f   : > { %7004 = vmatprep.subr.bf16.mxu1 %v7920_v27 }
 0xc35   : > { %6908 = vmatmul.mubr.msk.bf16.vlgmr.msra.gmra.mrb[76].mxu1 %vm5267_vm6, %v6906_v28 }
 0xc36   : > { %7005 = vmatpush3.bf16.msra.mxu1 %v7921_v29 }
 0xc37   : > { %7006 = vmatprep.subr.bf16.mxu1 %v7922_v31 }
 0xc3a   : > { %7007 = vmatpush3.bf16.msra.mxu1 %v7923_v32 }
 0xc3b   : > { %7008 = vmatprep.subr.bf16.mxu1 %v7924_v35 }
 0xc3e   : > { %7009 = vmatpush3.bf16.msra.mxu1 %v7925_v36 }
 0xc3f   : > { %7010 = vmatprep.subr.bf16.mxu1 %v7926_v37 }
 0xc42   : > { %7011 = vmatpush3.bf16.msra.mxu1 %v7927_v38 }
 0xc43   : > { %7012 = vmatprep.subr.bf16.mxu1 %v7928_v41 }
 0xc46   : > { %7013 = vmatpush3.bf16.msra.mxu1 %v7929_v51 }
 0xc47   : > { %7014 = vmatprep.subr.bf16.mxu1 %v7930_v30 }
 0xc4a   : > { %7015 = vmatpush3.bf16.msra.mxu1 %v7931_v33 }
 0xc4b   : > { %7016 = vmatprep.subr.bf16.mxu1 %v7932_v34 }
 0xc4e   : > { %7017 = vmatpush3.bf16.msra.mxu1 %v7933_v42 }
 0xc4f   : > { %7018 = vmatprep.subr.bf16.mxu1 %v7934_v46 }
 0xc52   : > { %7019 = vmatpush3.bf16.msra.mxu1 %v7935_v49 }
 0xc53   : > { %7026 = vmatprep.subr.bf16.mxu1 %v7936_v40 }
 0xd00   : > { %v5312_v45 = vpop.f32.mrb[72].mxu1 }
 0xd01   : > { %v5314_v53 = vpop.f32.mrb[73].mxu1  ;;  %v5319_v57 = vpack.c.bf16 %v5312_v45, %v5312_v45 }
 0xd02   : > { %v5320_v54 = vpack.c.bf16 %v5314_v53, %v5314_v53  ;;  %v5316_v55 = vpop.f32.mrb[74].mxu1 }
 0xd03   : > { %v5317_v58 = vpop.f32.mrb[75].mxu1 }
 0xd04   : > { %5698 = vmatprep.mubr.bf16.mxu1 %v5320_v54 }
 0xd05   : > { %5699 = vmatmul.mubr.bf16.vlgmr.msra.gmra.mrb[80].mxu1 %v5319_v57 }
 0xd06   : > { %7027 = vmatpush3.bf16.msra.mxu1 %v7937_v56 }
 0xd07   : > { %7028 = vmatprep.subr.bf16.mxu1 %v7938_v60 }
 0xd08   : > { %v5392_v44 = vpop.f32.mrb[76].mxu1 }
 0xd09   : > { %v5394_v59 = vpop.f32.mrb[77].mxu1  ;;  %v5399_v61 = vpack.c.bf16 %v5392_v44, %v5392_v44 }
 0xd0a   : > { %v5400_v52 = vpack.c.bf16 %v5394_v59, %v5394_v59  ;;  %v5396_v1 = vpop.f32.mrb[78].mxu1  ;;  %7029 = vmatpush3.bf16.msra.mxu1 %v7939_v43 }
 0xd0b   : > { %v5397_v62 = vpop.f32.mrb[79].mxu1  ;;  %7030 = vmatprep.subr.bf16.mxu1 %v7940_v50 }
 0xd0c   : > { %5562 = vmatprep.mubr.bf16.mxu0 %v5400_v52 }
 0xd0d   : > { %5563 = vmatmul.mubr.bf16.vlgmr.msra.gmra.mrb[52].mxu0 %v5399_v61 }
 0xd0e   : > { %5712 = vmatpush1.bf16.msra.mxu0 %v9068_v39  ;;  %5743 = vmatprep.mubr.bf16.mxu0 %v8112_v0 }
 0xd0f   : > { %6961 = vmatprep.subr.msk.bf16.mxu0 %vm5271_vm5, %v9065_v24  ;;  %7031 = vmatpush3.bf16.msra.mxu1 %v7942_v47  ;;  %v7966_v24 = vld [vmem:[#allocation7 + $0x1f8] sm:$0xff]  }
 0xd10   : > { %7032 = vmatprep.subr.bf16.mxu1 %v7944_v63 }
 0xd13   : > { %7033 = vmatpush3.bf16.msra.mxu1 %v7946_v2 }
 0xd14   : > { %7034 = vmatprep.subr.bf16.mxu1 %v7948_v3 }
 0xd15   : > { %6943 = vmatmul.mubr.msk.bf16.vlgmr.msra.gmra.mrb[56].mxu0 %vm5267_vm6, %v6941_v4 }
 0xd16   : > { %5930 = vmatpush1.bf16.msra.mxu0 %v9068_v39  ;;  %5961 = vmatprep.mubr.bf16.mxu0 %v8112_v0  ;;  %v7953_v0 = vld [vmem:[#allocation7 + $0x1d8] sm:$0xff]  }
 0xd17   : > { %7048 = vmatprep.subr.bf16.mxu0 %v7941_v5  ;;  %7035 = vmatpush3.bf16.msra.mxu1 %v7950_v6  ;;  %v7967_v39 = vld [vmem:[#allocation7 + $0x1b8] sm:$0xff]  }
 0xd18   : > { %7036 = vmatprep.subr.bf16.mxu1 %v7952_v15 }
 0xd1b   : > { %7037 = vmatpush3.bf16.msra.mxu1 %v7954_v17 }
 0xd1c   : > { %7038 = vmatprep.subr.bf16.mxu1 %v7956_v19 }
 0xd1d   : > { %6962 = vmatmul.mubr.msk.bf16.vlgmr.msra.gmra.mrb[60].mxu0 %vm5267_vm6, %v6960_v7 }
 0xd1e   : > { %7049 = vmatpush3.bf16.msra.mxu0 %v7943_v8 }
 0xd1f   : > { %7050 = vmatprep.subr.bf16.mxu0 %v7945_v9  ;;  %7039 = vmatpush3.bf16.msra.mxu1 %v7958_v11 }
 0xd20   : > { %7040 = vmatprep.subr.bf16.mxu1 %v7960_v16 }
 0xd22   : > { %7051 = vmatpush3.bf16.msra.mxu0 %v7947_v10 }
 0xd23   : > { %7052 = vmatprep.subr.bf16.mxu0 %v7949_v12  ;;  %7041 = vmatpush3.bf16.msra.mxu1 %v7962_v25 }
 0xd26   : > { %7053 = vmatpush3.bf16.msra.mxu0 %v7951_v13 }
 0xd27   : > { %7054 = vmatprep.subr.bf16.mxu0 %v7953_v0 }
 0xd2a   : > { %7055 = vmatpush3.bf16.msra.mxu0 %v7955_v18 }
 0xd2b   : > { %7056 = vmatprep.subr.bf16.mxu0 %v7957_v20 }
 0xd2e   : > { %7057 = vmatpush3.bf16.msra.mxu0 %v7959_v14 }
 0xd2f   : > { %7058 = vmatprep.subr.bf16.mxu0 %v7961_v22 }
 0xd32   : > { %7059 = vmatpush3.bf16.msra.mxu0 %v7963_v26 }
 0xd33   : > { %7060 = vmatprep.subr.bf16.mxu0 %v7964_v21 }
 0xd36   : > { %7061 = vmatpush3.bf16.msra.mxu0 %v7965_v23 }
 0xd37   : > { %7062 = vmatprep.subr.bf16.mxu0 %v7966_v24 }
 0xd3a   : > { %7063 = vmatpush3.bf16.msra.mxu0 %v7967_v39 }
 0xdd8   : > { %v7020_v48 = vpop.f32.mrb[80].mxu1 }
 0xdd9   : > { %v7021_v27 = vpop.f32.mrb[81].mxu1 }
 0xdda   : > { %v7022_v28 = vadd.f32 %v7021_v27, %v7020_v48  ;;  %v7023_v29 = vpop.f32.mrb[82].mxu1 }
 0xddb   : > { %v7024_v31 = vpop.f32.mrb[83].mxu1 }
 0xde0   : > { %v6998_v32 = vpop.f32.mrb[52].mxu0 }
 0xde1   : > { %v6999_v35 = vpop.f32.mrb[53].mxu0 }
 0xde2   : > { %v7000_v36 = vadd.f32 %v6999_v35, %v6998_v32  ;;  %v7001_v37 = vpop.f32.mrb[54].mxu0 }
 0xde3   : > { %v7002_v38 = vpop.f32.mrb[55].mxu0 }
 0xde4   : > { %v5701_v41 = vadd.f32 %v7022_v28, %v7000_v36 }
 0xde8   : > { %v5745_v51 = vpop.f32.mrb[56].mxu0 }
 0xde9   : > { %v5747_v30 = vpop.f32.mrb[57].mxu0  ;;  %v5752_v42 = vpack.c.bf16 %v5745_v51, %v5745_v51 }
 0xdea   : > { %v5753_v33 = vpack.c.bf16 %v5747_v30, %v5747_v30  ;;  %v5749_v34 = vpop.f32.mrb[58].mxu0 }
 0xdeb   : > { %v5750_v46 = vpop.f32.mrb[59].mxu0 }
 0xdec   : > { %5915 = vmatprep.mubr.bf16.mxu1 %v5753_v33 }
 0xded   : > { %5916 = vmatmul.mubr.bf16.vlgmr.msra.gmra.mrb[84].mxu1 %v5752_v42 }
 0xdf0   : > { %v5963_v49 = vpop.f32.mrb[60].mxu0 }
 0xdf1   : > { %v5965_v40 = vpop.f32.mrb[61].mxu0  ;;  %v5970_v54 = vpack.c.bf16 %v5963_v49, %v5963_v49 }
 0xdf2   : > { %v5971_v45 = vpack.c.bf16 %v5965_v40, %v5965_v40  ;;  %v5967_v53 = vpop.f32.mrb[62].mxu0 }
 0xdf3   : > { %v5968_v55 = vpop.f32.mrb[63].mxu0 }
 0xdf4   : > { %6133 = vmatprep.mubr.bf16.mxu0 %v5971_v45 }
 0xdf5   : > { %6134 = vmatmul.mubr.bf16.vlgmr.msra.gmra.mrb[64].mxu0 %v5970_v54 }
 0xec0   : > { %v7042_v56 = vpop.f32.mrb[84].mxu1 }
 0xec1   : > { %v7043_v57 = vpop.f32.mrb[85].mxu1 }
 0xec2   : > { %v7044_v58 = vadd.f32 %v7043_v57, %v7042_v56  ;;  %v7045_v60 = vpop.f32.mrb[86].mxu1 }
 0xec3   : > { %v7046_v43 = vpop.f32.mrb[87].mxu1 }
 0xec4   : > { %v5923_v50 = vadd.f32 %v7044_v58, %v5701_v41 }
 0xec8   : > { %v7064_v44 = vpop.f32.mrb[64].mxu0 }
 0xec9   : > { %v7065_v59 = vpop.f32.mrb[65].mxu0 }
 0xeca   : > { %v7066_v52 = vadd.f32 %v7065_v59, %v7064_v44  ;;  %v7067_v1 = vpop.f32.mrb[66].mxu0 }
 0xecb   : > { %v7068_v61 = vpop.f32.mrb[67].mxu0 }
 0xecc   : > { %v6141_v62 = vadd.f32 %v7066_v52, %v5923_v50 }
 0xece   : > { %v6142_v47 = vsub.f32 0.0, %v6141_v62 }
 0xed0   : > { %v6143_v63 = vmul.f32 1.442695, %v6142_v47 }
 0xed2   : > { %7968 = vpow2.f32 %v6143_v63 }
 0xedc   : > { %v7969_v2 = vpop.eup %7968 }
 0xedd   : > { %v6145_v3 = vadd.f32 1.0, %v7969_v2 }
 0xedf   : > { %7970 = vrcp.f32 %v6145_v3 }
 0xee9   : > { %v7971_v4 = vpop.eup %7970 }
 0xeea   : > { %6147 = vst [vmem:[%s527_s22] sm:$0x1] %v7971_v4 }
 0xeeb PF: > { %s9145_s26 = sld [smem:[#allocation12_spill]] }
 0xef1   : > { %s27_s29 = sadd.s32 1, %s9145_s26  }
 0xef2   : > { %p24_p8 = scmp.ge.s32.totalorder %s27_s29, 4  }
 0xef4   :  { %26 = sbr.rel (!%p24_p8) target bundleno = 7 (0x7), region = 153 }
 0xefb   :  { %6165 = vsyncpa [#allocation3], 1 }
 0xefc   :  { %6167 = vsyncpa [#allocation3 + $0x1], 1 }
 0xefd   :  { %6168 = vsyncpa [#allocation5], 1 }
 0xefe   :  { %6169 = vsyncpa [#allocation8], 1 }

</bundles_post_ra>
